<compile_context>
chip_gen: v7x
topology: tpu7x:2x2x1
jax: 0.10.0
libtpu: 0.0.40
codegen_flags: <defaults>
</compile_context>

<pallas_src>
import jax
import jax.numpy as jnp
from jax.experimental import pallas as pl
from jax.experimental.pallas import tpu as pltpu

_BN_EPS = 1e-5
_GELU_K = 0.7978845608028654  # sqrt(2/pi)


# ----------------------------------------------------------------------------
# elementwise helpers (used inside kernels)
# ----------------------------------------------------------------------------
def _gelu(x):
    # tanh-approx GELU: the transcendental lands on the EUP slot (free vs. VALU).
    # (Not bit-identical to torch.nn.GELU()'s exact erf; agrees to ~1e-3 abs.)
    return 0.5 * x * (1.0 + jnp.tanh(_GELU_K * (x + 0.044715 * x * x * x)))


# ----------------------------------------------------------------------------
# kernel 1: fused CMUNeXt stage
#   Residual( dw3x3 -> GELU -> BN ) -> 1x1 (C->4C) -> GELU -> BN -> 1x1 (4C->C) -> GELU -> BN
# ----------------------------------------------------------------------------
def _stage_kernel(x_ref, dww_ref, dwb_ref, s1_ref, sh1_ref,
                  w1_ref, b1_ref, s2_ref, sh2_ref,
                  w2_ref, b2_ref, s3_ref, sh3_ref,
                  o_ref, pad_ref, flat_ref):
    # x_ref  : (1, H, W, C) unpadded input (f32)
    # dww_ref: (9, C) depthwise taps (row-major dh*3+dw) ; dwb_ref: (1, C)
    # s*/sh* : (1, C) or (1, 4C) folded BatchNorm scale / shift (f32)
    # w1_ref : (C, 4C) bf16 ; w2_ref: (4C, C) bf16
    # o_ref  : (1, H*W, C) f32
    # pad_ref : VMEM scratch (H+2, W+2, C) f32 — in-kernel zero halo
    # flat_ref: VMEM scratch (H*W, C) f32 — flattened spatial result for the MXU
    H = x_ref.shape[1]
    W = x_ref.shape[2]
    C = x_ref.shape[3]

    x = x_ref[0]                                      # (H, W, C)

    # build the zero-padded halo entirely in VMEM (no padded activation in HBM)
    pad_ref[...] = jnp.zeros_like(pad_ref)
    pad_ref[pl.ds(1, H), pl.ds(1, W), :] = x
    xp = pad_ref[...]                                 # (H+2, W+2, C)

    # three W-shifted (sublane) views, computed once and reused across dh
    xw = [xp[:, d:d + W, :] for d in range(3)]        # each (H+2, W, C)

    acc = jnp.zeros((H, W, C), jnp.float32)
    for dh in range(3):
        for dw in range(3):
            acc = acc + xw[dw][dh:dh + H] * dww_ref[dh * 3 + dw, :]

    t = _gelu(acc + dwb_ref[0, :])
    t = t * s1_ref[0, :] + sh1_ref[0, :]
    t = t + x                                         # residual add (input reused directly)

    # flatten (H, W, C) -> (H*W, C) with aligned row stores into VMEM scratch
    # (layout-preserving; avoids relying on an in-kernel reshape lowering)
    for h in range(H):
        flat_ref[pl.ds(h * W, W), :] = t[h]
    t2 = flat_ref[...]

    # pointwise MLP: bf16 operands on the MXU, f32 accumulation; the (HW, 4C)
    # intermediate never leaves VMEM.
    h1 = jnp.dot(t2.astype(jnp.bfloat16), w1_ref[...],
                 preferred_element_type=jnp.float32) + b1_ref[0, :]
    h1 = _gelu(h1)
    h1 = h1 * s2_ref[0, :] + sh2_ref[0, :]

    y = jnp.dot(h1.astype(jnp.bfloat16), w2_ref[...],
                preferred_element_type=jnp.float32) + b2_ref[0, :]
    y = _gelu(y)
    y = y * s3_ref[0, :] + sh3_ref[0, :]
    o_ref[0] = y


# ----------------------------------------------------------------------------
# kernel 2: 3x3 stride-2 conv (+bias) -> BN -> ReLU   ("up" conv_block)
#   single K = 9*C matmul on bf16 im2col input
# ----------------------------------------------------------------------------
def _up_conv_kernel(col_ref, w_ref, b_ref, s_ref, sh_ref, o_ref):
    # col_ref: (1, Ho*Wo, 9*C) bf16 im2col ; w_ref: (9*C, Co) bf16
    y = jnp.dot(col_ref[0], w_ref[...], preferred_element_type=jnp.float32)
    y = y + b_ref[0, :]
    y = y * s_ref[0, :] + sh_ref[0, :]
    o_ref[0] = jnp.maximum(y, 0.0)                    # ReLU


# ----------------------------------------------------------------------------
# wrappers (pallas_call plumbing + glue reshapes)
# ----------------------------------------------------------------------------
def _const_spec(shape):
    zeros = (0,) * len(shape)
    return pl.BlockSpec(shape, lambda n: zeros)       # grid-invariant (resident) block


def _stage(x, p):
    N, H, W, C = x.shape
    C4 = p["pw1_w"].shape[1]
    out = pl.pallas_call(
        _stage_kernel,
        out_shape=jax.ShapeDtypeStruct((N, H * W, C), jnp.float32),
        grid_spec=pltpu.PrefetchScalarGridSpec(
            num_scalar_prefetch=0,
            grid=(N,),
            in_specs=[
                pl.BlockSpec((1, H, W, C), lambda n: (n, 0, 0, 0)),
                _const_spec((9, C)),
                _const_spec((1, C)), _const_spec((1, C)), _const_spec((1, C)),
                _const_spec((C, C4)),
                _const_spec((1, C4)), _const_spec((1, C4)), _const_spec((1, C4)),
                _const_spec((C4, C)),
                _const_spec((1, C)), _const_spec((1, C)), _const_spec((1, C)),
            ],
            out_specs=pl.BlockSpec((1, H * W, C), lambda n: (n, 0, 0)),
            scratch_shapes=[pltpu.VMEM((H + 2, W + 2, C), jnp.float32),
                            pltpu.VMEM((H * W, C), jnp.float32)],
        ),
        compiler_params=pltpu.CompilerParams(dimension_semantics=("parallel",)),
    )(x, p["dw_w"], p["dw_b"], p["bn1_s"], p["bn1_sh"],
      p["pw1_w"], p["pw1_b"], p["bn2_s"], p["bn2_sh"],
      p["pw2_w"], p["pw2_b"], p["bn3_s"], p["bn3_sh"])
    return out.reshape(N, H, W, C)


def _up_conv(x, p, stride=2):
    N, H, W, C = x.shape
    Co = p["up_b"].shape[1]
    xp = jnp.pad(x, ((0, 0), (1, 1), (1, 1), (0, 0)))
    Ho = (H + 2 - 3) // stride + 1
    Wo = (W + 2 - 3) // stride + 1
    # im2col packed channel-dense: (N, Ho*Wo, 9*C) so the kernel runs ONE deep-K matmul.
    # TODO(synk): gather the stride-2 taps inside the kernel (strided pl.ds loads from a
    #             pl.ANY ref) to avoid materializing the im2col buffer in HBM.
    taps = []
    for dh in range(3):
        for dw in range(3):
            taps.append(xp[:, dh:dh + stride * (Ho - 1) + 1:stride,
                            dw:dw + stride * (Wo - 1) + 1:stride, :])
    col = jnp.concatenate(taps, axis=-1).reshape(N, Ho * Wo, 9 * C).astype(jnp.bfloat16)
    out = pl.pallas_call(
        _up_conv_kernel,
        out_shape=jax.ShapeDtypeStruct((N, Ho * Wo, Co), jnp.float32),
        grid_spec=pltpu.PrefetchScalarGridSpec(
            num_scalar_prefetch=0,
            grid=(N,),
            in_specs=[
                pl.BlockSpec((1, Ho * Wo, 9 * C), lambda n: (n, 0, 0)),
                _const_spec((9 * C, Co)),
                _const_spec((1, Co)), _const_spec((1, Co)), _const_spec((1, Co)),
            ],
            out_specs=pl.BlockSpec((1, Ho * Wo, Co), lambda n: (n, 0, 0)),
        ),
        compiler_params=pltpu.CompilerParams(dimension_semantics=("parallel",)),
    )(col, p["up_w"], p["up_b"], p["bn4_s"], p["bn4_sh"])
    return out.reshape(N, Ho, Wo, Co)


@jax.jit
def cmunext_block_forward(x_nchw, params):
    # PyTorch NCHW -> NHWC (channels on the lane axis)
    x = jnp.transpose(x_nchw, (0, 2, 3, 1)).astype(jnp.float32)
    for stage_p in params["stages"]:          # `depth` repeats of the fused CMUNeXt stage
        x = _stage(x, stage_p)
    y = _up_conv(x, params["up"], stride=2)   # conv_block: 3x3/s2 conv + BN + ReLU
    return jnp.transpose(y, (0, 3, 1, 2))     # back to NCHW


# ----------------------------------------------------------------------------
# deterministic parameter init (shapes follow CMUNeXtBlock.__init__)
# ----------------------------------------------------------------------------
def _fold_bn(gamma, beta, mean, var, eps=_BN_EPS):
    scale = gamma / jnp.sqrt(var + eps)
    shift = beta - mean * scale
    return scale.reshape(1, -1), shift.reshape(1, -1)


def _bn_params(key, c):
    kg, kb, km, kv = jax.random.split(key, 4)
    gamma = 1.0 + 0.1 * jax.random.normal(kg, (c,), jnp.float32)
    beta = 0.1 * jax.random.normal(kb, (c,), jnp.float32)
    mean = 0.1 * jax.random.normal(km, (c,), jnp.float32)
    var = jax.random.uniform(kv, (c,), jnp.float32, 0.5, 1.5)
    return _fold_bn(gamma, beta, mean, var)


def init_params(key, ch_in, ch_out, depth=1):
    c, c4 = ch_in, 4 * ch_in
    params = {"stages": []}
    for _ in range(depth):
        (key, k_dww, k_dwb, k_w1, k_b1, k_w2, k_b2,
         k_bn1, k_bn2, k_bn3) = jax.random.split(key, 10)
        s1, sh1 = _bn_params(k_bn1, c)
        s2, sh2 = _bn_params(k_bn2, c4)
        s3, sh3 = _bn_params(k_bn3, c)
        params["stages"].append({
            "dw_w": 0.3 * jax.random.normal(k_dww, (9, c), jnp.float32),
            "dw_b": 0.1 * jax.random.normal(k_dwb, (1, c), jnp.float32),
            "bn1_s": s1, "bn1_sh": sh1,
            "pw1_w": (0.3 * jax.random.normal(k_w1, (c, c4), jnp.float32)
                      ).astype(jnp.bfloat16),
            "pw1_b": 0.1 * jax.random.normal(k_b1, (1, c4), jnp.float32),
            "bn2_s": s2, "bn2_sh": sh2,
            "pw2_w": (0.3 * jax.random.normal(k_w2, (c4, c), jnp.float32)
                      ).astype(jnp.bfloat16),
            "pw2_b": 0.1 * jax.random.normal(k_b2, (1, c), jnp.float32),
            "bn3_s": s3, "bn3_sh": sh3,
        })
    key, k_uw, k_ub, k_ubn = jax.random.split(key, 4)
    s4, sh4 = _bn_params(k_ubn, ch_out)
    params["up"] = {
        # (9*C, Co): tap-major, channel-minor rows — matches the im2col packing order.
        "up_w": (0.3 * jax.random.normal(k_uw, (9 * ch_in, ch_out), jnp.float32)
                 ).astype(jnp.bfloat16),
        "up_b": 0.1 * jax.random.normal(k_ub, (1, ch_out), jnp.float32),
        "bn4_s": s4, "bn4_sh": sh4,
    }
    return params


if __name__ == "__main__":
    N, C_in, H, W = 2, 4, 16, 16
    C_out = 8
    key = jax.random.PRNGKey(0)
    kx, kp = jax.random.split(key)
    x = jax.random.normal(kx, (N, C_in, H, W), jnp.float32)   # NCHW, like PyTorch
    params = init_params(kp, C_in, C_out, depth=1)

    y = cmunext_block_forward(x, params)
    y = jax.block_until_ready(y)

    assert y.shape == (N, C_out, H // 2, W // 2), y.shape
    assert bool(jnp.all(jnp.isfinite(y)))
    print("KERNEL_OK")
</pallas_src>

<mosaic_0001>
module attributes {stable_mosaic.version = 11 : i64} {
  func.func @_stage_kernel(%arg0: i32, %arg1: memref<1x16x16x4xf32, #tpu.memory_space<vmem>>, %arg2: memref<9x4xf32, #tpu.memory_space<vmem>>, %arg3: memref<1x4xf32, #tpu.memory_space<vmem>>, %arg4: memref<1x4xf32, #tpu.memory_space<vmem>>, %arg5: memref<1x4xf32, #tpu.memory_space<vmem>>, %arg6: memref<4x16xbf16, #tpu.memory_space<vmem>>, %arg7: memref<1x16xf32, #tpu.memory_space<vmem>>, %arg8: memref<1x16xf32, #tpu.memory_space<vmem>>, %arg9: memref<1x16xf32, #tpu.memory_space<vmem>>, %arg10: memref<16x4xbf16, #tpu.memory_space<vmem>>, %arg11: memref<1x4xf32, #tpu.memory_space<vmem>>, %arg12: memref<1x4xf32, #tpu.memory_space<vmem>>, %arg13: memref<1x4xf32, #tpu.memory_space<vmem>>, %arg14: memref<1x256x4xf32, #tpu.memory_space<vmem>>, %arg15: memref<18x18x4xf32, #tpu.memory_space<vmem>>, %arg16: memref<256x4xf32, #tpu.memory_space<vmem>>) attributes {dimension_semantics = [#tpu.dimension_semantics<parallel>], iteration_bounds = array<i64: 2>, scalar_prefetch = 0 : i64, scratch_operands = 2 : i64, tpu.core_type = #tpu.core_type<tc>, window_params = [{transform_indices = @transform_0, window_bounds = array<i64: 1, 16, 16, 4>}, {pipeline_mode = #tpu.pipeline_mode<synchronous>, transform_indices = @transform_1, window_bounds = array<i64: 9, 4>}, {pipeline_mode = #tpu.pipeline_mode<synchronous>, transform_indices = @transform_2, window_bounds = array<i64: 1, 4>}, {pipeline_mode = #tpu.pipeline_mode<synchronous>, transform_indices = @transform_3, window_bounds = array<i64: 1, 4>}, {pipeline_mode = #tpu.pipeline_mode<synchronous>, transform_indices = @transform_4, window_bounds = array<i64: 1, 4>}, {pipeline_mode = #tpu.pipeline_mode<synchronous>, transform_indices = @transform_5, window_bounds = array<i64: 4, 16>}, {pipeline_mode = #tpu.pipeline_mode<synchronous>, transform_indices = @transform_6, window_bounds = array<i64: 1, 16>}, {pipeline_mode = #tpu.pipeline_mode<synchronous>, transform_indices = @transform_7, window_bounds = array<i64: 1, 16>}, {pipeline_mode = #tpu.pipeline_mode<synchronous>, transform_indices = @transform_8, window_bounds = array<i64: 1, 16>}, {pipeline_mode = #tpu.pipeline_mode<synchronous>, transform_indices = @transform_9, window_bounds = array<i64: 16, 4>}, {pipeline_mode = #tpu.pipeline_mode<synchronous>, transform_indices = @transform_10, window_bounds = array<i64: 1, 4>}, {pipeline_mode = #tpu.pipeline_mode<synchronous>, transform_indices = @transform_11, window_bounds = array<i64: 1, 4>}, {pipeline_mode = #tpu.pipeline_mode<synchronous>, transform_indices = @transform_12, window_bounds = array<i64: 1, 4>}, {transform_indices = @transform_13, window_bounds = array<i64: 1, 256, 4>}]} {
    %c0 = arith.constant 0 : index
    %c0_0 = arith.constant 0 : index
    %c0_1 = arith.constant 0 : index
    %c0_2 = arith.constant 0 : index
    %0 = vector.load %arg1[%c0, %c0_0, %c0_1, %c0_2] : memref<1x16x16x4xf32, #tpu.memory_space<vmem>>, vector<1x16x16x4xf32>
    %1 = vector.shape_cast %0 : vector<1x16x16x4xf32> to vector<16x16x4xf32>
    %cst = arith.constant 0.000000e+00 : f32
    %2 = vector.broadcast %cst : f32 to vector<18x18x4xf32>
    %c0_3 = arith.constant 0 : index
    %c0_4 = arith.constant 0 : index
    %c0_5 = arith.constant 0 : index
    %3 = vector.load %arg15[%c0_3, %c0_4, %c0_5] : memref<18x18x4xf32, #tpu.memory_space<vmem>>, vector<18x18x4xf32>
    tpu.vector_store %arg15[%c0_3, %c0_4, %c0_5], %2 {strides = array<i32>} : memref<18x18x4xf32, #tpu.memory_space<vmem>>, vector<18x18x4xf32>,
    %c1 = arith.constant 1 : index
    %c1_6 = arith.constant 1 : index
    %c0_7 = arith.constant 0 : index
    %4 = vector.load %arg15[%c1, %c1_6, %c0_7] : memref<18x18x4xf32, #tpu.memory_space<vmem>>, vector<16x16x4xf32>
    tpu.vector_store %arg15[%c1, %c1_6, %c0_7], %1 {strides = array<i32>} : memref<18x18x4xf32, #tpu.memory_space<vmem>>, vector<16x16x4xf32>,
    %c0_8 = arith.constant 0 : index
    %c0_9 = arith.constant 0 : index
    %c0_10 = arith.constant 0 : index
    %5 = vector.load %arg15[%c0_8, %c0_9, %c0_10] : memref<18x18x4xf32, #tpu.memory_space<vmem>>, vector<18x18x4xf32>
    %6 = vector.extract_strided_slice %5 {offsets = [0, 0, 0], sizes = [18, 16, 4], strides = [1, 1, 1]} : vector<18x18x4xf32> to vector<18x16x4xf32>
    %7 = vector.extract_strided_slice %5 {offsets = [0, 1, 0], sizes = [18, 16, 4], strides = [1, 1, 1]} : vector<18x18x4xf32> to vector<18x16x4xf32>
    %8 = vector.extract_strided_slice %5 {offsets = [0, 2, 0], sizes = [18, 16, 4], strides = [1, 1, 1]} : vector<18x18x4xf32> to vector<18x16x4xf32>
    %cst_11 = arith.constant 0.000000e+00 : f32
    %9 = vector.broadcast %cst_11 : f32 to vector<16x16x4xf32>
    %10 = vector.extract_strided_slice %6 {offsets = [0, 0, 0], sizes = [16, 16, 4], strides = [1, 1, 1]} : vector<18x16x4xf32> to vector<16x16x4xf32>
    %c0_12 = arith.constant 0 : index
    %c0_13 = arith.constant 0 : index
    %11 = vector.load %arg2[%c0_12, %c0_13] : memref<9x4xf32, #tpu.memory_space<vmem>>, vector<1x4xf32>
    %12 = vector.shape_cast %11 : vector<1x4xf32> to vector<4xf32>
    %13 = vector.shape_cast %12 : vector<4xf32> to vector<1x1x4xf32>
    %14 = vector.broadcast %13 : vector<1x1x4xf32> to vector<16x16x4xf32>
    %15 = arith.mulf %10, %14 : vector<16x16x4xf32>
    %16 = arith.addf %9, %15 : vector<16x16x4xf32>
    %17 = vector.extract_strided_slice %7 {offsets = [0, 0, 0], sizes = [16, 16, 4], strides = [1, 1, 1]} : vector<18x16x4xf32> to vector<16x16x4xf32>
    %c1_14 = arith.constant 1 : index
    %c0_15 = arith.constant 0 : index
    %18 = vector.load %arg2[%c1_14, %c0_15] : memref<9x4xf32, #tpu.memory_space<vmem>>, vector<1x4xf32>
    %19 = vector.shape_cast %18 : vector<1x4xf32> to vector<4xf32>
    %20 = vector.shape_cast %19 : vector<4xf32> to vector<1x1x4xf32>
    %21 = vector.broadcast %20 : vector<1x1x4xf32> to vector<16x16x4xf32>
    %22 = arith.mulf %17, %21 : vector<16x16x4xf32>
    %23 = arith.addf %16, %22 : vector<16x16x4xf32>
    %24 = vector.extract_strided_slice %8 {offsets = [0, 0, 0], sizes = [16, 16, 4], strides = [1, 1, 1]} : vector<18x16x4xf32> to vector<16x16x4xf32>
    %c2 = arith.constant 2 : index
    %c0_16 = arith.constant 0 : index
    %25 = vector.load %arg2[%c2, %c0_16] : memref<9x4xf32, #tpu.memory_space<vmem>>, vector<1x4xf32>
    %26 = vector.shape_cast %25 : vector<1x4xf32> to vector<4xf32>
    %27 = vector.shape_cast %26 : vector<4xf32> to vector<1x1x4xf32>
    %28 = vector.broadcast %27 : vector<1x1x4xf32> to vector<16x16x4xf32>
    %29 = arith.mulf %24, %28 : vector<16x16x4xf32>
    %30 = arith.addf %23, %29 : vector<16x16x4xf32>
    %31 = vector.extract_strided_slice %6 {offsets = [1, 0, 0], sizes = [16, 16, 4], strides = [1, 1, 1]} : vector<18x16x4xf32> to vector<16x16x4xf32>
    %c3 = arith.constant 3 : index
    %c0_17 = arith.constant 0 : index
    %32 = vector.load %arg2[%c3, %c0_17] : memref<9x4xf32, #tpu.memory_space<vmem>>, vector<1x4xf32>
    %33 = vector.shape_cast %32 : vector<1x4xf32> to vector<4xf32>
    %34 = vector.shape_cast %33 : vector<4xf32> to vector<1x1x4xf32>
    %35 = vector.broadcast %34 : vector<1x1x4xf32> to vector<16x16x4xf32>
    %36 = arith.mulf %31, %35 : vector<16x16x4xf32>
    %37 = arith.addf %30, %36 : vector<16x16x4xf32>
    %38 = vector.extract_strided_slice %7 {offsets = [1, 0, 0], sizes = [16, 16, 4], strides = [1, 1, 1]} : vector<18x16x4xf32> to vector<16x16x4xf32>
    %c4 = arith.constant 4 : index
    %c0_18 = arith.constant 0 : index
    %39 = vector.load %arg2[%c4, %c0_18] : memref<9x4xf32, #tpu.memory_space<vmem>>, vector<1x4xf32>
    %40 = vector.shape_cast %39 : vector<1x4xf32> to vector<4xf32>
    %41 = vector.shape_cast %40 : vector<4xf32> to vector<1x1x4xf32>
    %42 = vector.broadcast %41 : vector<1x1x4xf32> to vector<16x16x4xf32>
    %43 = arith.mulf %38, %42 : vector<16x16x4xf32>
    %44 = arith.addf %37, %43 : vector<16x16x4xf32>
    %45 = vector.extract_strided_slice %8 {offsets = [1, 0, 0], sizes = [16, 16, 4], strides = [1, 1, 1]} : vector<18x16x4xf32> to vector<16x16x4xf32>
    %c5 = arith.constant 5 : index
    %c0_19 = arith.constant 0 : index
    %46 = vector.load %arg2[%c5, %c0_19] : memref<9x4xf32, #tpu.memory_space<vmem>>, vector<1x4xf32>
    %47 = vector.shape_cast %46 : vector<1x4xf32> to vector<4xf32>
    %48 = vector.shape_cast %47 : vector<4xf32> to vector<1x1x4xf32>
    %49 = vector.broadcast %48 : vector<1x1x4xf32> to vector<16x16x4xf32>
    %50 = arith.mulf %45, %49 : vector<16x16x4xf32>
    %51 = arith.addf %44, %50 : vector<16x16x4xf32>
    %52 = vector.extract_strided_slice %6 {offsets = [2, 0, 0], sizes = [16, 16, 4], strides = [1, 1, 1]} : vector<18x16x4xf32> to vector<16x16x4xf32>
    %c6 = arith.constant 6 : index
    %c0_20 = arith.constant 0 : index
    %53 = vector.load %arg2[%c6, %c0_20] : memref<9x4xf32, #tpu.memory_space<vmem>>, vector<1x4xf32>
    %54 = vector.shape_cast %53 : vector<1x4xf32> to vector<4xf32>
    %55 = vector.shape_cast %54 : vector<4xf32> to vector<1x1x4xf32>
    %56 = vector.broadcast %55 : vector<1x1x4xf32> to vector<16x16x4xf32>
    %57 = arith.mulf %52, %56 : vector<16x16x4xf32>
    %58 = arith.addf %51, %57 : vector<16x16x4xf32>
    %59 = vector.extract_strided_slice %7 {offsets = [2, 0, 0], sizes = [16, 16, 4], strides = [1, 1, 1]} : vector<18x16x4xf32> to vector<16x16x4xf32>
    %c7 = arith.constant 7 : index
    %c0_21 = arith.constant 0 : index
    %60 = vector.load %arg2[%c7, %c0_21] : memref<9x4xf32, #tpu.memory_space<vmem>>, vector<1x4xf32>
    %61 = vector.shape_cast %60 : vector<1x4xf32> to vector<4xf32>
    %62 = vector.shape_cast %61 : vector<4xf32> to vector<1x1x4xf32>
    %63 = vector.broadcast %62 : vector<1x1x4xf32> to vector<16x16x4xf32>
    %64 = arith.mulf %59, %63 : vector<16x16x4xf32>
    %65 = arith.addf %58, %64 : vector<16x16x4xf32>
    %66 = vector.extract_strided_slice %8 {offsets = [2, 0, 0], sizes = [16, 16, 4], strides = [1, 1, 1]} : vector<18x16x4xf32> to vector<16x16x4xf32>
    %c8 = arith.constant 8 : index
    %c0_22 = arith.constant 0 : index
    %67 = vector.load %arg2[%c8, %c0_22] : memref<9x4xf32, #tpu.memory_space<vmem>>, vector<1x4xf32>
    %68 = vector.shape_cast %67 : vector<1x4xf32> to vector<4xf32>
    %69 = vector.shape_cast %68 : vector<4xf32> to vector<1x1x4xf32>
    %70 = vector.broadcast %69 : vector<1x1x4xf32> to vector<16x16x4xf32>
    %71 = arith.mulf %66, %70 : vector<16x16x4xf32>
    %72 = arith.addf %65, %71 : vector<16x16x4xf32>
    %c0_23 = arith.constant 0 : index
    %c0_24 = arith.constant 0 : index
    %73 = vector.load %arg3[%c0_23, %c0_24] : memref<1x4xf32, #tpu.memory_space<vmem>>, vector<1x4xf32>
    %74 = vector.shape_cast %73 : vector<1x4xf32> to vector<4xf32>
    %75 = vector.shape_cast %74 : vector<4xf32> to vector<1x1x4xf32>
    %76 = vector.broadcast %75 : vector<1x1x4xf32> to vector<16x16x4xf32>
    %77 = arith.addf %72, %76 : vector<16x16x4xf32>
    %cst_25 = arith.constant 5.000000e-01 : f32
    %78 = vector.broadcast %cst_25 : f32 to vector<16x16x4xf32>
    %79 = arith.mulf %78, %77 : vector<16x16x4xf32>
    %cst_26 = arith.constant 4.471500e-02 : f32
    %80 = vector.broadcast %cst_26 : f32 to vector<16x16x4xf32>
    %81 = arith.mulf %80, %77 : vector<16x16x4xf32>
    %82 = arith.mulf %81, %77 : vector<16x16x4xf32>
    %83 = arith.mulf %82, %77 : vector<16x16x4xf32>
    %84 = arith.addf %77, %83 : vector<16x16x4xf32>
    %cst_27 = arith.constant 0.797884583 : f32
    %85 = vector.broadcast %cst_27 : f32 to vector<16x16x4xf32>
    %86 = arith.mulf %85, %84 : vector<16x16x4xf32>
    %87 = math.tanh %86 : vector<16x16x4xf32>
    %cst_28 = arith.constant 1.000000e+00 : f32
    %88 = vector.broadcast %cst_28 : f32 to vector<16x16x4xf32>
    %89 = arith.addf %88, %87 : vector<16x16x4xf32>
    %90 = arith.mulf %79, %89 : vector<16x16x4xf32>
    %c0_29 = arith.constant 0 : index
    %c0_30 = arith.constant 0 : index
    %91 = vector.load %arg4[%c0_29, %c0_30] : memref<1x4xf32, #tpu.memory_space<vmem>>, vector<1x4xf32>
    %92 = vector.shape_cast %91 : vector<1x4xf32> to vector<4xf32>
    %93 = vector.shape_cast %92 : vector<4xf32> to vector<1x1x4xf32>
    %94 = vector.broadcast %93 : vector<1x1x4xf32> to vector<16x16x4xf32>
    %95 = arith.mulf %90, %94 : vector<16x16x4xf32>
    %c0_31 = arith.constant 0 : index
    %c0_32 = arith.constant 0 : index
    %96 = vector.load %arg5[%c0_31, %c0_32] : memref<1x4xf32, #tpu.memory_space<vmem>>, vector<1x4xf32>
    %97 = vector.shape_cast %96 : vector<1x4xf32> to vector<4xf32>
    %98 = vector.shape_cast %97 : vector<4xf32> to vector<1x1x4xf32>
    %99 = vector.broadcast %98 : vector<1x1x4xf32> to vector<16x16x4xf32>
    %100 = arith.addf %95, %99 : vector<16x16x4xf32>
    %101 = arith.addf %100, %1 : vector<16x16x4xf32>
    %102 = vector.extract_strided_slice %101 {offsets = [0, 0, 0], sizes = [1, 16, 4], strides = [1, 1, 1]} : vector<16x16x4xf32> to vector<1x16x4xf32>
    %103 = vector.shape_cast %102 : vector<1x16x4xf32> to vector<16x4xf32>
    %c0_33 = arith.constant 0 : index
    %c0_34 = arith.constant 0 : index
    %104 = vector.load %arg16[%c0_33, %c0_34] : memref<256x4xf32, #tpu.memory_space<vmem>>, vector<16x4xf32>
    tpu.vector_store %arg16[%c0_33, %c0_34], %103 {strides = array<i32>} : memref<256x4xf32, #tpu.memory_space<vmem>>, vector<16x4xf32>,
    %105 = vector.extract_strided_slice %101 {offsets = [1, 0, 0], sizes = [1, 16, 4], strides = [1, 1, 1]} : vector<16x16x4xf32> to vector<1x16x4xf32>
    %106 = vector.shape_cast %105 : vector<1x16x4xf32> to vector<16x4xf32>
    %c16 = arith.constant 16 : index
    %c0_35 = arith.constant 0 : index
    %107 = vector.load %arg16[%c16, %c0_35] : memref<256x4xf32, #tpu.memory_space<vmem>>, vector<16x4xf32>
    tpu.vector_store %arg16[%c16, %c0_35], %106 {strides = array<i32>} : memref<256x4xf32, #tpu.memory_space<vmem>>, vector<16x4xf32>,
    %108 = vector.extract_strided_slice %101 {offsets = [2, 0, 0], sizes = [1, 16, 4], strides = [1, 1, 1]} : vector<16x16x4xf32> to vector<1x16x4xf32>
    %109 = vector.shape_cast %108 : vector<1x16x4xf32> to vector<16x4xf32>
    %c32 = arith.constant 32 : index
    %c0_36 = arith.constant 0 : index
    %110 = vector.load %arg16[%c32, %c0_36] : memref<256x4xf32, #tpu.memory_space<vmem>>, vector<16x4xf32>
    tpu.vector_store %arg16[%c32, %c0_36], %109 {strides = array<i32>} : memref<256x4xf32, #tpu.memory_space<vmem>>, vector<16x4xf32>,
    %111 = vector.extract_strided_slice %101 {offsets = [3, 0, 0], sizes = [1, 16, 4], strides = [1, 1, 1]} : vector<16x16x4xf32> to vector<1x16x4xf32>
    %112 = vector.shape_cast %111 : vector<1x16x4xf32> to vector<16x4xf32>
    %c48 = arith.constant 48 : index
    %c0_37 = arith.constant 0 : index
    %113 = vector.load %arg16[%c48, %c0_37] : memref<256x4xf32, #tpu.memory_space<vmem>>, vector<16x4xf32>
    tpu.vector_store %arg16[%c48, %c0_37], %112 {strides = array<i32>} : memref<256x4xf32, #tpu.memory_space<vmem>>, vector<16x4xf32>,
    %114 = vector.extract_strided_slice %101 {offsets = [4, 0, 0], sizes = [1, 16, 4], strides = [1, 1, 1]} : vector<16x16x4xf32> to vector<1x16x4xf32>
    %115 = vector.shape_cast %114 : vector<1x16x4xf32> to vector<16x4xf32>
    %c64 = arith.constant 64 : index
    %c0_38 = arith.constant 0 : index
    %116 = vector.load %arg16[%c64, %c0_38] : memref<256x4xf32, #tpu.memory_space<vmem>>, vector<16x4xf32>
    tpu.vector_store %arg16[%c64, %c0_38], %115 {strides = array<i32>} : memref<256x4xf32, #tpu.memory_space<vmem>>, vector<16x4xf32>,
    %117 = vector.extract_strided_slice %101 {offsets = [5, 0, 0], sizes = [1, 16, 4], strides = [1, 1, 1]} : vector<16x16x4xf32> to vector<1x16x4xf32>
    %118 = vector.shape_cast %117 : vector<1x16x4xf32> to vector<16x4xf32>
    %c80 = arith.constant 80 : index
    %c0_39 = arith.constant 0 : index
    %119 = vector.load %arg16[%c80, %c0_39] : memref<256x4xf32, #tpu.memory_space<vmem>>, vector<16x4xf32>
    tpu.vector_store %arg16[%c80, %c0_39], %118 {strides = array<i32>} : memref<256x4xf32, #tpu.memory_space<vmem>>, vector<16x4xf32>,
    %120 = vector.extract_strided_slice %101 {offsets = [6, 0, 0], sizes = [1, 16, 4], strides = [1, 1, 1]} : vector<16x16x4xf32> to vector<1x16x4xf32>
    %121 = vector.shape_cast %120 : vector<1x16x4xf32> to vector<16x4xf32>
    %c96 = arith.constant 96 : index
    %c0_40 = arith.constant 0 : index
    %122 = vector.load %arg16[%c96, %c0_40] : memref<256x4xf32, #tpu.memory_space<vmem>>, vector<16x4xf32>
    tpu.vector_store %arg16[%c96, %c0_40], %121 {strides = array<i32>} : memref<256x4xf32, #tpu.memory_space<vmem>>, vector<16x4xf32>,
    %123 = vector.extract_strided_slice %101 {offsets = [7, 0, 0], sizes = [1, 16, 4], strides = [1, 1, 1]} : vector<16x16x4xf32> to vector<1x16x4xf32>
    %124 = vector.shape_cast %123 : vector<1x16x4xf32> to vector<16x4xf32>
    %c112 = arith.constant 112 : index
    %c0_41 = arith.constant 0 : index
    %125 = vector.load %arg16[%c112, %c0_41] : memref<256x4xf32, #tpu.memory_space<vmem>>, vector<16x4xf32>
    tpu.vector_store %arg16[%c112, %c0_41], %124 {strides = array<i32>} : memref<256x4xf32, #tpu.memory_space<vmem>>, vector<16x4xf32>,
    %126 = vector.extract_strided_slice %101 {offsets = [8, 0, 0], sizes = [1, 16, 4], strides = [1, 1, 1]} : vector<16x16x4xf32> to vector<1x16x4xf32>
    %127 = vector.shape_cast %126 : vector<1x16x4xf32> to vector<16x4xf32>
    %c128 = arith.constant 128 : index
    %c0_42 = arith.constant 0 : index
    %128 = vector.load %arg16[%c128, %c0_42] : memref<256x4xf32, #tpu.memory_space<vmem>>, vector<16x4xf32>
    tpu.vector_store %arg16[%c128, %c0_42], %127 {strides = array<i32>} : memref<256x4xf32, #tpu.memory_space<vmem>>, vector<16x4xf32>,
    %129 = vector.extract_strided_slice %101 {offsets = [9, 0, 0], sizes = [1, 16, 4], strides = [1, 1, 1]} : vector<16x16x4xf32> to vector<1x16x4xf32>
    %130 = vector.shape_cast %129 : vector<1x16x4xf32> to vector<16x4xf32>
    %c144 = arith.constant 144 : index
    %c0_43 = arith.constant 0 : index
    %131 = vector.load %arg16[%c144, %c0_43] : memref<256x4xf32, #tpu.memory_space<vmem>>, vector<16x4xf32>
    tpu.vector_store %arg16[%c144, %c0_43], %130 {strides = array<i32>} : memref<256x4xf32, #tpu.memory_space<vmem>>, vector<16x4xf32>,
    %132 = vector.extract_strided_slice %101 {offsets = [10, 0, 0], sizes = [1, 16, 4], strides = [1, 1, 1]} : vector<16x16x4xf32> to vector<1x16x4xf32>
    %133 = vector.shape_cast %132 : vector<1x16x4xf32> to vector<16x4xf32>
    %c160 = arith.constant 160 : index
    %c0_44 = arith.constant 0 : index
    %134 = vector.load %arg16[%c160, %c0_44] : memref<256x4xf32, #tpu.memory_space<vmem>>, vector<16x4xf32>
    tpu.vector_store %arg16[%c160, %c0_44], %133 {strides = array<i32>} : memref<256x4xf32, #tpu.memory_space<vmem>>, vector<16x4xf32>,
    %135 = vector.extract_strided_slice %101 {offsets = [11, 0, 0], sizes = [1, 16, 4], strides = [1, 1, 1]} : vector<16x16x4xf32> to vector<1x16x4xf32>
    %136 = vector.shape_cast %135 : vector<1x16x4xf32> to vector<16x4xf32>
    %c176 = arith.constant 176 : index
    %c0_45 = arith.constant 0 : index
    %137 = vector.load %arg16[%c176, %c0_45] : memref<256x4xf32, #tpu.memory_space<vmem>>, vector<16x4xf32>
    tpu.vector_store %arg16[%c176, %c0_45], %136 {strides = array<i32>} : memref<256x4xf32, #tpu.memory_space<vmem>>, vector<16x4xf32>,
    %138 = vector.extract_strided_slice %101 {offsets = [12, 0, 0], sizes = [1, 16, 4], strides = [1, 1, 1]} : vector<16x16x4xf32> to vector<1x16x4xf32>
    %139 = vector.shape_cast %138 : vector<1x16x4xf32> to vector<16x4xf32>
    %c192 = arith.constant 192 : index
    %c0_46 = arith.constant 0 : index
    %140 = vector.load %arg16[%c192, %c0_46] : memref<256x4xf32, #tpu.memory_space<vmem>>, vector<16x4xf32>
    tpu.vector_store %arg16[%c192, %c0_46], %139 {strides = array<i32>} : memref<256x4xf32, #tpu.memory_space<vmem>>, vector<16x4xf32>,
    %141 = vector.extract_strided_slice %101 {offsets = [13, 0, 0], sizes = [1, 16, 4], strides = [1, 1, 1]} : vector<16x16x4xf32> to vector<1x16x4xf32>
    %142 = vector.shape_cast %141 : vector<1x16x4xf32> to vector<16x4xf32>
    %c208 = arith.constant 208 : index
    %c0_47 = arith.constant 0 : index
    %143 = vector.load %arg16[%c208, %c0_47] : memref<256x4xf32, #tpu.memory_space<vmem>>, vector<16x4xf32>
    tpu.vector_store %arg16[%c208, %c0_47], %142 {strides = array<i32>} : memref<256x4xf32, #tpu.memory_space<vmem>>, vector<16x4xf32>,
    %144 = vector.extract_strided_slice %101 {offsets = [14, 0, 0], sizes = [1, 16, 4], strides = [1, 1, 1]} : vector<16x16x4xf32> to vector<1x16x4xf32>
    %145 = vector.shape_cast %144 : vector<1x16x4xf32> to vector<16x4xf32>
    %c224 = arith.constant 224 : index
    %c0_48 = arith.constant 0 : index
    %146 = vector.load %arg16[%c224, %c0_48] : memref<256x4xf32, #tpu.memory_space<vmem>>, vector<16x4xf32>
    tpu.vector_store %arg16[%c224, %c0_48], %145 {strides = array<i32>} : memref<256x4xf32, #tpu.memory_space<vmem>>, vector<16x4xf32>,
    %147 = vector.extract_strided_slice %101 {offsets = [15, 0, 0], sizes = [1, 16, 4], strides = [1, 1, 1]} : vector<16x16x4xf32> to vector<1x16x4xf32>
    %148 = vector.shape_cast %147 : vector<1x16x4xf32> to vector<16x4xf32>
    %c240 = arith.constant 240 : index
    %c0_49 = arith.constant 0 : index
    %149 = vector.load %arg16[%c240, %c0_49] : memref<256x4xf32, #tpu.memory_space<vmem>>, vector<16x4xf32>
    tpu.vector_store %arg16[%c240, %c0_49], %148 {strides = array<i32>} : memref<256x4xf32, #tpu.memory_space<vmem>>, vector<16x4xf32>,
    %c0_50 = arith.constant 0 : index
    %c0_51 = arith.constant 0 : index
    %150 = vector.load %arg16[%c0_50, %c0_51] : memref<256x4xf32, #tpu.memory_space<vmem>>, vector<256x4xf32>
    %151 = arith.truncf %150 : vector<256x4xf32> to vector<256x4xbf16>
    %c0_52 = arith.constant 0 : index
    %c0_53 = arith.constant 0 : index
    %152 = vector.load %arg6[%c0_52, %c0_53] : memref<4x16xbf16, #tpu.memory_space<vmem>>, vector<4x16xbf16>
    %cst_54 = arith.constant dense<0.000000e+00> : vector<256x16xf32>
    %153 = tpu.matmul %151, %152, %cst_54 {dimension_numbers = #tpu.dot_dimension_numbers<[1], [0], [0], [1], [0, 0, 1, 1], [], []>} : vector<256x4xbf16>, vector<4x16xbf16>, vector<256x16xf32> -> vector<256x16xf32>
    %c0_55 = arith.constant 0 : index
    %c0_56 = arith.constant 0 : index
    %154 = vector.load %arg7[%c0_55, %c0_56] : memref<1x16xf32, #tpu.memory_space<vmem>>, vector<1x16xf32>
    %155 = vector.shape_cast %154 : vector<1x16xf32> to vector<16xf32>
    %156 = vector.shape_cast %155 : vector<16xf32> to vector<1x16xf32>
    %157 = vector.broadcast %156 : vector<1x16xf32> to vector<256x16xf32>
    %158 = arith.addf %153, %157 : vector<256x16xf32>
    %cst_57 = arith.constant 5.000000e-01 : f32
    %159 = vector.broadcast %cst_57 : f32 to vector<256x16xf32>
    %160 = arith.mulf %159, %158 : vector<256x16xf32>
    %cst_58 = arith.constant 4.471500e-02 : f32
    %161 = vector.broadcast %cst_58 : f32 to vector<256x16xf32>
    %162 = arith.mulf %161, %158 : vector<256x16xf32>
    %163 = arith.mulf %162, %158 : vector<256x16xf32>
    %164 = arith.mulf %163, %158 : vector<256x16xf32>
    %165 = arith.addf %158, %164 : vector<256x16xf32>
    %cst_59 = arith.constant 0.797884583 : f32
    %166 = vector.broadcast %cst_59 : f32 to vector<256x16xf32>
    %167 = arith.mulf %166, %165 : vector<256x16xf32>
    %168 = math.tanh %167 : vector<256x16xf32>
    %cst_60 = arith.constant 1.000000e+00 : f32
    %169 = vector.broadcast %cst_60 : f32 to vector<256x16xf32>
    %170 = arith.addf %169, %168 : vector<256x16xf32>
    %171 = arith.mulf %160, %170 : vector<256x16xf32>
    %c0_61 = arith.constant 0 : index
    %c0_62 = arith.constant 0 : index
    %172 = vector.load %arg8[%c0_61, %c0_62] : memref<1x16xf32, #tpu.memory_space<vmem>>, vector<1x16xf32>
    %173 = vector.shape_cast %172 : vector<1x16xf32> to vector<16xf32>
    %174 = vector.shape_cast %173 : vector<16xf32> to vector<1x16xf32>
    %175 = vector.broadcast %174 : vector<1x16xf32> to vector<256x16xf32>
    %176 = arith.mulf %171, %175 : vector<256x16xf32>
    %c0_63 = arith.constant 0 : index
    %c0_64 = arith.constant 0 : index
    %177 = vector.load %arg9[%c0_63, %c0_64] : memref<1x16xf32, #tpu.memory_space<vmem>>, vector<1x16xf32>
    %178 = vector.shape_cast %177 : vector<1x16xf32> to vector<16xf32>
    %179 = vector.shape_cast %178 : vector<16xf32> to vector<1x16xf32>
    %180 = vector.broadcast %179 : vector<1x16xf32> to vector<256x16xf32>
    %181 = arith.addf %176, %180 : vector<256x16xf32>
    %182 = arith.truncf %181 : vector<256x16xf32> to vector<256x16xbf16>
    %c0_65 = arith.constant 0 : index
    %c0_66 = arith.constant 0 : index
    %183 = vector.load %arg10[%c0_65, %c0_66] : memref<16x4xbf16, #tpu.memory_space<vmem>>, vector<16x4xbf16>
    %cst_67 = arith.constant dense<0.000000e+00> : vector<256x4xf32>
    %184 = tpu.matmul %182, %183, %cst_67 {dimension_numbers = #tpu.dot_dimension_numbers<[1], [0], [0], [1], [0, 0, 1, 1], [], []>} : vector<256x16xbf16>, vector<16x4xbf16>, vector<256x4xf32> -> vector<256x4xf32>
    %c0_68 = arith.constant 0 : index
    %c0_69 = arith.constant 0 : index
    %185 = vector.load %arg11[%c0_68, %c0_69] : memref<1x4xf32, #tpu.memory_space<vmem>>, vector<1x4xf32>
    %186 = vector.shape_cast %185 : vector<1x4xf32> to vector<4xf32>
    %187 = vector.shape_cast %186 : vector<4xf32> to vector<1x4xf32>
    %188 = vector.broadcast %187 : vector<1x4xf32> to vector<256x4xf32>
    %189 = arith.addf %184, %188 : vector<256x4xf32>
    %cst_70 = arith.constant 5.000000e-01 : f32
    %190 = vector.broadcast %cst_70 : f32 to vector<256x4xf32>
    %191 = arith.mulf %190, %189 : vector<256x4xf32>
    %cst_71 = arith.constant 4.471500e-02 : f32
    %192 = vector.broadcast %cst_71 : f32 to vector<256x4xf32>
    %193 = arith.mulf %192, %189 : vector<256x4xf32>
    %194 = arith.mulf %193, %189 : vector<256x4xf32>
    %195 = arith.mulf %194, %189 : vector<256x4xf32>
    %196 = arith.addf %189, %195 : vector<256x4xf32>
    %cst_72 = arith.constant 0.797884583 : f32
    %197 = vector.broadcast %cst_72 : f32 to vector<256x4xf32>
    %198 = arith.mulf %197, %196 : vector<256x4xf32>
    %199 = math.tanh %198 : vector<256x4xf32>
    %cst_73 = arith.constant 1.000000e+00 : f32
    %200 = vector.broadcast %cst_73 : f32 to vector<256x4xf32>
    %201 = arith.addf %200, %199 : vector<256x4xf32>
    %202 = arith.mulf %191, %201 : vector<256x4xf32>
    %c0_74 = arith.constant 0 : index
    %c0_75 = arith.constant 0 : index
    %203 = vector.load %arg12[%c0_74, %c0_75] : memref<1x4xf32, #tpu.memory_space<vmem>>, vector<1x4xf32>
    %204 = vector.shape_cast %203 : vector<1x4xf32> to vector<4xf32>
    %205 = vector.shape_cast %204 : vector<4xf32> to vector<1x4xf32>
    %206 = vector.broadcast %205 : vector<1x4xf32> to vector<256x4xf32>
    %207 = arith.mulf %202, %206 : vector<256x4xf32>
    %c0_76 = arith.constant 0 : index
    %c0_77 = arith.constant 0 : index
    %208 = vector.load %arg13[%c0_76, %c0_77] : memref<1x4xf32, #tpu.memory_space<vmem>>, vector<1x4xf32>
    %209 = vector.shape_cast %208 : vector<1x4xf32> to vector<4xf32>
    %210 = vector.shape_cast %209 : vector<4xf32> to vector<1x4xf32>
    %211 = vector.broadcast %210 : vector<1x4xf32> to vector<256x4xf32>
    %212 = arith.addf %207, %211 : vector<256x4xf32>
    %c0_78 = arith.constant 0 : index
    %c0_79 = arith.constant 0 : index
    %c0_80 = arith.constant 0 : index
    %213 = vector.load %arg14[%c0_78, %c0_79, %c0_80] : memref<1x256x4xf32, #tpu.memory_space<vmem>>, vector<1x256x4xf32>
    %214 = vector.shape_cast %213 : vector<1x256x4xf32> to vector<256x4xf32>
    %215 = vector.shape_cast %212 : vector<256x4xf32> to vector<1x256x4xf32>
    tpu.vector_store %arg14[%c0_78, %c0_79, %c0_80], %215 {strides = array<i32>} : memref<1x256x4xf32, #tpu.memory_space<vmem>>, vector<1x256x4xf32>,
    return
  }
  func.func @transform_0(%arg0: i32) -> (i32, i32, i32, i32) {
    %c0_i32 = arith.constant 0 : i32
    %c0_i32_0 = arith.constant 0 : i32
    %c0_i32_1 = arith.constant 0 : i32
    %c0_i32_2 = arith.constant 0 : i32
    return %arg0, %c0_i32, %c0_i32_0, %c0_i32_1 : i32, i32, i32, i32
  }
  func.func @transform_1(%arg0: i32) -> (i32, i32) {
    %c0_i32 = arith.constant 0 : i32
    %c0_i32_0 = arith.constant 0 : i32
    %c0_i32_1 = arith.constant 0 : i32
    return %c0_i32, %c0_i32_0 : i32, i32
  }
  func.func @transform_2(%arg0: i32) -> (i32, i32) {
    %c0_i32 = arith.constant 0 : i32
    %c0_i32_0 = arith.constant 0 : i32
    %c0_i32_1 = arith.constant 0 : i32
    return %c0_i32, %c0_i32_0 : i32, i32
  }
  func.func @transform_3(%arg0: i32) -> (i32, i32) {
    %c0_i32 = arith.constant 0 : i32
    %c0_i32_0 = arith.constant 0 : i32
    %c0_i32_1 = arith.constant 0 : i32
    return %c0_i32, %c0_i32_0 : i32, i32
  }
  func.func @transform_4(%arg0: i32) -> (i32, i32) {
    %c0_i32 = arith.constant 0 : i32
    %c0_i32_0 = arith.constant 0 : i32
    %c0_i32_1 = arith.constant 0 : i32
    return %c0_i32, %c0_i32_0 : i32, i32
  }
  func.func @transform_5(%arg0: i32) -> (i32, i32) {
    %c0_i32 = arith.constant 0 : i32
    %c0_i32_0 = arith.constant 0 : i32
    %c0_i32_1 = arith.constant 0 : i32
    return %c0_i32, %c0_i32_0 : i32, i32
  }
  func.func @transform_6(%arg0: i32) -> (i32, i32) {
    %c0_i32 = arith.constant 0 : i32
    %c0_i32_0 = arith.constant 0 : i32
    %c0_i32_1 = arith.constant 0 : i32
    return %c0_i32, %c0_i32_0 : i32, i32
  }
  func.func @transform_7(%arg0: i32) -> (i32, i32) {
    %c0_i32 = arith.constant 0 : i32
    %c0_i32_0 = arith.constant 0 : i32
    %c0_i32_1 = arith.constant 0 : i32
    return %c0_i32, %c0_i32_0 : i32, i32
  }
  func.func @transform_8(%arg0: i32) -> (i32, i32) {
    %c0_i32 = arith.constant 0 : i32
    %c0_i32_0 = arith.constant 0 : i32
    %c0_i32_1 = arith.constant 0 : i32
    return %c0_i32, %c0_i32_0 : i32, i32
  }
  func.func @transform_9(%arg0: i32) -> (i32, i32) {
    %c0_i32 = arith.constant 0 : i32
    %c0_i32_0 = arith.constant 0 : i32
    %c0_i32_1 = arith.constant 0 : i32
    return %c0_i32, %c0_i32_0 : i32, i32
  }
  func.func @transform_10(%arg0: i32) -> (i32, i32) {
    %c0_i32 = arith.constant 0 : i32
    %c0_i32_0 = arith.constant 0 : i32
    %c0_i32_1 = arith.constant 0 : i32
    return %c0_i32, %c0_i32_0 : i32, i32
  }
  func.func @transform_11(%arg0: i32) -> (i32, i32) {
    %c0_i32 = arith.constant 0 : i32
    %c0_i32_0 = arith.constant 0 : i32
    %c0_i32_1 = arith.constant 0 : i32
    return %c0_i32, %c0_i32_0 : i32, i32
  }
  func.func @transform_12(%arg0: i32) -> (i32, i32) {
    %c0_i32 = arith.constant 0 : i32
    %c0_i32_0 = arith.constant 0 : i32
    %c0_i32_1 = arith.constant 0 : i32
    return %c0_i32, %c0_i32_0 : i32, i32
  }
  func.func @transform_13(%arg0: i32) -> (i32, i32, i32) {
    %c0_i32 = arith.constant 0 : i32
    %c0_i32_0 = arith.constant 0 : i32
    %c0_i32_1 = arith.constant 0 : i32
    return %arg0, %c0_i32, %c0_i32_0 : i32, i32, i32
  }
}

module attributes {stable_mosaic.version = 11 : i64} {
  func.func @_up_conv_kernel(%arg0: i32, %arg1: memref<1x64x36xbf16, #tpu.memory_space<vmem>>, %arg2: memref<36x8xbf16, #tpu.memory_space<vmem>>, %arg3: memref<1x8xf32, #tpu.memory_space<vmem>>, %arg4: memref<1x8xf32, #tpu.memory_space<vmem>>, %arg5: memref<1x8xf32, #tpu.memory_space<vmem>>, %arg6: memref<1x64x8xf32, #tpu.memory_space<vmem>>) attributes {dimension_semantics = [#tpu.dimension_semantics<parallel>], iteration_bounds = array<i64: 2>, scalar_prefetch = 0 : i64, scratch_operands = 0 : i64, tpu.core_type = #tpu.core_type<tc>, window_params = [{transform_indices = @transform_0, window_bounds = array<i64: 1, 64, 36>}, {pipeline_mode = #tpu.pipeline_mode<synchronous>, transform_indices = @transform_1, window_bounds = array<i64: 36, 8>}, {pipeline_mode = #tpu.pipeline_mode<synchronous>, transform_indices = @transform_2, window_bounds = array<i64: 1, 8>}, {pipeline_mode = #tpu.pipeline_mode<synchronous>, transform_indices = @transform_3, window_bounds = array<i64: 1, 8>}, {pipeline_mode = #tpu.pipeline_mode<synchronous>, transform_indices = @transform_4, window_bounds = array<i64: 1, 8>}, {transform_indices = @transform_5, window_bounds = array<i64: 1, 64, 8>}]} {
    %c0 = arith.constant 0 : index
    %c0_0 = arith.constant 0 : index
    %c0_1 = arith.constant 0 : index
    %0 = vector.load %arg1[%c0, %c0_0, %c0_1] : memref<1x64x36xbf16, #tpu.memory_space<vmem>>, vector<1x64x36xbf16>
    %1 = vector.shape_cast %0 : vector<1x64x36xbf16> to vector<64x36xbf16>
    %c0_2 = arith.constant 0 : index
    %c0_3 = arith.constant 0 : index
    %2 = vector.load %arg2[%c0_2, %c0_3] : memref<36x8xbf16, #tpu.memory_space<vmem>>, vector<36x8xbf16>
    %cst = arith.constant dense<0.000000e+00> : vector<64x8xf32>
    %3 = tpu.matmul %1, %2, %cst {dimension_numbers = #tpu.dot_dimension_numbers<[1], [0], [0], [1], [0, 0, 1, 1], [], []>} : vector<64x36xbf16>, vector<36x8xbf16>, vector<64x8xf32> -> vector<64x8xf32>
    %c0_4 = arith.constant 0 : index
    %c0_5 = arith.constant 0 : index
    %4 = vector.load %arg3[%c0_4, %c0_5] : memref<1x8xf32, #tpu.memory_space<vmem>>, vector<1x8xf32>
    %5 = vector.shape_cast %4 : vector<1x8xf32> to vector<8xf32>
    %6 = vector.shape_cast %5 : vector<8xf32> to vector<1x8xf32>
    %7 = vector.broadcast %6 : vector<1x8xf32> to vector<64x8xf32>
    %8 = arith.addf %3, %7 : vector<64x8xf32>
    %c0_6 = arith.constant 0 : index
    %c0_7 = arith.constant 0 : index
    %9 = vector.load %arg4[%c0_6, %c0_7] : memref<1x8xf32, #tpu.memory_space<vmem>>, vector<1x8xf32>
    %10 = vector.shape_cast %9 : vector<1x8xf32> to vector<8xf32>
    %11 = vector.shape_cast %10 : vector<8xf32> to vector<1x8xf32>
    %12 = vector.broadcast %11 : vector<1x8xf32> to vector<64x8xf32>
    %13 = arith.mulf %8, %12 : vector<64x8xf32>
    %c0_8 = arith.constant 0 : index
    %c0_9 = arith.constant 0 : index
    %14 = vector.load %arg5[%c0_8, %c0_9] : memref<1x8xf32, #tpu.memory_space<vmem>>, vector<1x8xf32>
    %15 = vector.shape_cast %14 : vector<1x8xf32> to vector<8xf32>
    %16 = vector.shape_cast %15 : vector<8xf32> to vector<1x8xf32>
    %17 = vector.broadcast %16 : vector<1x8xf32> to vector<64x8xf32>
    %18 = arith.addf %13, %17 : vector<64x8xf32>
    %cst_10 = arith.constant 0.000000e+00 : f32
    %19 = vector.broadcast %cst_10 : f32 to vector<64x8xf32>
    %20 = arith.maximumf %18, %19 : vector<64x8xf32>
    %c0_11 = arith.constant 0 : index
    %c0_12 = arith.constant 0 : index
    %c0_13 = arith.constant 0 : index
    %21 = vector.load %arg6[%c0_11, %c0_12, %c0_13] : memref<1x64x8xf32, #tpu.memory_space<vmem>>, vector<1x64x8xf32>
    %22 = vector.shape_cast %21 : vector<1x64x8xf32> to vector<64x8xf32>
    %23 = vector.shape_cast %20 : vector<64x8xf32> to vector<1x64x8xf32>
    tpu.vector_store %arg6[%c0_11, %c0_12, %c0_13], %23 {strides = array<i32>} : memref<1x64x8xf32, #tpu.memory_space<vmem>>, vector<1x64x8xf32>,
    return
  }
  func.func @transform_0(%arg0: i32) -> (i32, i32, i32) {
    %c0_i32 = arith.constant 0 : i32
    %c0_i32_0 = arith.constant 0 : i32
    %c0_i32_1 = arith.constant 0 : i32
    return %arg0, %c0_i32, %c0_i32_0 : i32, i32, i32
  }
  func.func @transform_1(%arg0: i32) -> (i32, i32) {
    %c0_i32 = arith.constant 0 : i32
    %c0_i32_0 = arith.constant 0 : i32
    %c0_i32_1 = arith.constant 0 : i32
    return %c0_i32, %c0_i32_0 : i32, i32
  }
  func.func @transform_2(%arg0: i32) -> (i32, i32) {
    %c0_i32 = arith.constant 0 : i32
    %c0_i32_0 = arith.constant 0 : i32
    %c0_i32_1 = arith.constant 0 : i32
    return %c0_i32, %c0_i32_0 : i32, i32
  }
  func.func @transform_3(%arg0: i32) -> (i32, i32) {
    %c0_i32 = arith.constant 0 : i32
    %c0_i32_0 = arith.constant 0 : i32
    %c0_i32_1 = arith.constant 0 : i32
    return %c0_i32, %c0_i32_0 : i32, i32
  }
  func.func @transform_4(%arg0: i32) -> (i32, i32) {
    %c0_i32 = arith.constant 0 : i32
    %c0_i32_0 = arith.constant 0 : i32
    %c0_i32_1 = arith.constant 0 : i32
    return %c0_i32, %c0_i32_0 : i32, i32
  }
  func.func @transform_5(%arg0: i32) -> (i32, i32, i32) {
    %c0_i32 = arith.constant 0 : i32
    %c0_i32_0 = arith.constant 0 : i32
    %c0_i32_1 = arith.constant 0 : i32
    return %arg0, %c0_i32, %c0_i32_0 : i32, i32, i32
  }
}

</mosaic_0001>

<bundles_post_ra>
// kernel: cmunext_block_forward.3
= control target key start
LH: loop header
LB: loop body
LE: loop exit
PB: predicated region body
PF: predicated region fallthrough
CT: control target
= control target key end

     0   :  { %s574_s18 = smov 0   ;;  %s621_s0 = inlined_call_operand.vmem [shape: bf16[2,64,36], index: 0, kind: input, shape index: {}]   ;;  %s622_s1 = inlined_call_operand.vmem [shape: bf16[36,8], index: 1, kind: input, shape index: {}]   ;;  %s623_s2 = inlined_call_operand.vmem [shape: f32[1,8], index: 2, kind: input, shape index: {}]   ;;  %s624_s3 = inlined_call_operand.vmem [shape: f32[1,8], index: 3, kind: input, shape index: {}]   ;;  %s625_s4 = inlined_call_operand.vmem [shape: f32[1,8], index: 4, kind: input, shape index: {}]   ;;  %s626_s5 = inlined_call_operand.vmem [shape: f32[2,64,8], index: 5, kind: output, shape index: {}]  }
   0x1 LB: > { %s465_s19 = sadd.s32 4294967295, %s542_s18   ;;  %p469_p0 = scmp.ge.s32.totalorder %s542_s18, 1  ;;  %s542_s18 = sphi %s574_s18, %s15_s18  }
   0x2   : > { %p187_p1 = scmp.lt.s32.totalorder %s542_s18, 3 }
   0x4   : > { %p188_p2 = pnand %p469_p0, %p187_p1 }
   0x5   : > { %v529_v0 = vld [vmem:[%s622_s1] sm:$0xff] (!%p188_p2)   ;;  %v530_v1 = vld [vmem:[%s622_s1 + $0x8] sm:$0xff] (!%p188_p2)   ;;  %p215_p3 = scmp.lt.s32.totalorder (!%p188_p2), %s465_s19, 1  ;;  %v531_v2 = vld [vmem:[%s622_s1 + $0x10] ss:$0 sps:$4 sm:$0x33] (!%p188_p2)  }
   0x6   : > { %191 = sbr.rel (%p188_p2) target bundleno = 242 (0xf2), region = 40  ;;  %499 = vmatprep.subr.bf16.mxu0 (!%p188_p2), %v529_v0  ;;  %513 = vmatprep.subr.bf16.mxu1 (!%p188_p2), %v529_v0  ;;  %vm294_vm0 = vcmask (!%p188_p2), 1041408   ;;  %vm281_vm1 = vcmask (!%p188_p2), 293888   ;;  %v474_v8 = vld [vmem:[%s623_s2] ss:$0 sm:$0xff] (!%p188_p2)  ;;  %vm401_vm2 = vcmask (!%p188_p2), 64512  }
   0x7   : > { %500 = vmatpush3.bf16.msra.mxu0 (!%p188_p2), %v529_v0  ;;  %516 = vmatpush3.bf16.msra.mxu1 (!%p188_p2), %v529_v0  ;;  %v296_v4 = vsel (!%p188_p2), %vm294_vm0, %v531_v2, 0  ;;  %v486_v10 = vld [vmem:[%s624_s3] ss:$0 sm:$0xff] (!%p188_p2) }
   0x8   : > { %501 = vmatprep.subr.bf16.mxu0 (!%p188_p2), %v530_v1  ;;  %514 = vmatprep.subr.bf16.mxu1 (!%p188_p2), %v530_v1  ;;  %v487_v16 = vld [vmem:[%s625_s4] ss:$0 sm:$0xff] (!%p188_p2) }
   0xb   : > { %502 = vmatpush3.bf16.msra.mxu0 (!%p188_p2), %v530_v1  ;;  %517 = vmatpush3.bf16.msra.mxu1 (!%p188_p2), %v530_v1 }
   0xc   : > { %519 = vmatprep.subr.msk.bf16.mxu0 (!%p188_p2), %vm294_vm0, %v531_v2  ;;  %520 = vmatprep.subr.msk.bf16.mxu1 (!%p188_p2), %vm294_vm0, %v531_v2 }
   0xd   : > { %s628_s19 = smov (!%p215_p3, %s465_s19), 1 }
   0xe   : > { %s490_s26 = sshll.u32 %s628_s19, 5  ;;  %s491_s11 = sshll.u32 %s628_s19, 6 }
   0xf   : > { %s219_s29 = scalar_lea.vmem %s621_s0, %s490_s26  ;;  %504 = vmatpush3.bf16.msra.mxu0 %v296_v4  ;;  %518 = vmatpush3.bf16.msra.mxu1 %v296_v4  ;;  %s224_s14 = scalar_lea.vmem %s626_s5, %s491_s11 }
  0x10   : > { %v532_v3 = vld [vmem:[%s219_s29] sm:$0xff]   ;;  %v533_v5 = vld [vmem:[%s219_s29 + $0x10] sm:$0xff]   ;;  %v534_v6 = vld [vmem:[%s219_s29 + $0x8] sm:$0xff]  }
  0x11   : > { %505 = vmatprep.mubr.msk.bf16.mxu0 %vm281_vm1, %v532_v3  ;;  %509 = vmatprep.mubr.msk.bf16.mxu1 %vm281_vm1, %v533_v5  ;;  %v535_v7 = vld [vmem:[%s219_s29 + $0x18] sm:$0xff]  }
  0x12   : > { %506 = vmatmul.mubr.msk.bf16.vlgmr.msra.gmra.mrb[0].mxu0 %vm281_vm1, %v534_v6  ;;  %510 = vmatmul.mubr.msk.bf16.vlgmr.msra.gmra.mrb[0].mxu1 %vm281_vm1, %v535_v7 }
  0xe5   : > { %v507_v9 = vpop.f32.mrb[0].mxu0  ;;  %v511_v11 = vpop.f32.mrb[0].mxu1 }
  0xe6   : > { %v341_v12 = vadd.f32 %v507_v9, %v474_v8  ;;  %v357_v13 = vadd.f32 %v511_v11, %v474_v8  ;;  %v332_v14 = vpop.f32.mrb[1].mxu0  ;;  %v348_v15 = vpop.f32.mrb[1].mxu1 }
  0xe7   : > { %v333_v17 = vadd.f32 %v474_v8, %v332_v14  ;;  %v349_v18 = vadd.f32 %v474_v8, %v348_v15  ;;  %v508_v19 = vpop.f32.mrb[2].mxu0  ;;  %v512_v20 = vpop.f32.mrb[2].mxu1 }
  0xe8   : > { %v372_v21 = vmul.f32 %v486_v10, %v341_v12  ;;  %v376_v22 = vmul.f32 %v486_v10, %v357_v13  ;;  %v344_v23 = vadd.f32 %v508_v19, %v474_v8  ;;  %v360_v24 = vadd.f32 %v512_v20, %v474_v8  ;;  %v335_v25 = vpop.f32.mrb[3].mxu0  ;;  %v351_v26 = vpop.f32.mrb[3].mxu1 }
  0xe9   : > { %v370_v27 = vmul.f32 %v486_v10, %v333_v17  ;;  %v374_v28 = vmul.f32 %v486_v10, %v349_v18  ;;  %v336_v29 = vadd.f32 %v474_v8, %v335_v25  ;;  %v352_v30 = vadd.f32 %v474_v8, %v351_v26 }
  0xea   : > { %v387_v31 = vadd.f32 %v487_v16, %v372_v21  ;;  %v391_v32 = vadd.f32 %v487_v16, %v376_v22  ;;  %v373_v33 = vmul.f32 %v486_v10, %v344_v23  ;;  %v377_v34 = vmul.f32 %v486_v10, %v360_v24 }
  0xeb   : > { %v385_v35 = vadd.f32 %v487_v16, %v370_v27  ;;  %v389_v36 = vadd.f32 %v487_v16, %v374_v28  ;;  %v371_v37 = vmul.f32 %v486_v10, %v336_v29  ;;  %v375_v38 = vmul.f32 %v486_v10, %v352_v30 }
  0xec   : > { %v395_v39 = vmax.f32 %v387_v31, 0.0  ;;  %v399_v40 = vmax.f32 %v391_v32, 0.0  ;;  %v388_v41 = vadd.f32 %v487_v16, %v373_v33  ;;  %v392_v42 = vadd.f32 %v487_v16, %v377_v34 }
  0xed   : > { %v393_v43 = vmax.f32 %v385_v35, 0.0  ;;  %v397_v44 = vmax.f32 %v389_v36, 0.0  ;;  %v386_v45 = vadd.f32 %v487_v16, %v371_v37  ;;  %v390_v46 = vadd.f32 %v487_v16, %v375_v38 }
  0xee   : > { %404 = vst.msk [vmem:[%s224_s14 + $0x10] sm:$0xff] %vm401_vm2, %v395_v39  ;;  %408 = vst.msk [vmem:[%s224_s14 + $0x30] sm:$0xff] %vm401_vm2, %v399_v40  ;;  %v396_v47 = vmax.f32 %v388_v41, 0.0  ;;  %v400_v48 = vmax.f32 %v392_v42, 0.0 }
  0xef   : > { %402 = vst.msk [vmem:[%s224_s14] sm:$0xff] %vm401_vm2, %v393_v43  ;;  %406 = vst.msk [vmem:[%s224_s14 + $0x20] sm:$0xff] %vm401_vm2, %v397_v44  ;;  %v394_v49 = vmax.f32 %v386_v45, 0.0  ;;  %v398_v50 = vmax.f32 %v390_v46, 0.0 }
  0xf0   : > { %405 = vst.msk [vmem:[%s224_s14 + $0x18] sm:$0xff] %vm401_vm2, %v396_v47  ;;  %409 = vst.msk [vmem:[%s224_s14 + $0x38] sm:$0xff] %vm401_vm2, %v400_v48 }
  0xf1   : > { %403 = vst.msk [vmem:[%s224_s14 + $0x8] sm:$0xff] %vm401_vm2, %v394_v49  ;;  %407 = vst.msk [vmem:[%s224_s14 + $0x28] sm:$0xff] %vm401_vm2, %v398_v50 }
  0xf2 PF: > { %s15_s18 = sadd.s32 1, %s542_s18  }
  0xf3   : > { %p12_p4 = scmp.ge.s32.totalorder %s15_s18, 4  }
  0xf5   :  { %14 = sbr.rel (!%p12_p4) target bundleno = 1 (0x1), region = 70 }

// kernel: cmunext_block_forward.2
= control target key start
LH: loop header
LB: loop body
LE: loop exit
PB: predicated region body
PF: predicated region fallthrough
CT: control target
= control target key end

     0   :  { %s4578_s25 = smov 0   ;;  %s6898_s0 = inlined_call_operand.vmem [shape: f32[2,16,16,4], index: 0, kind: input, shape index: {}]   ;;  %s6899_s1 = inlined_call_operand.vmem [shape: f32[9,4], index: 1, kind: input, shape index: {}]   ;;  %s6900_s2 = inlined_call_operand.vmem [shape: f32[1,4], index: 2, kind: input, shape index: {}]   ;;  %s6901_s3 = inlined_call_operand.vmem [shape: f32[1,4], index: 3, kind: input, shape index: {}]   ;;  %s6902_s4 = inlined_call_operand.vmem [shape: f32[1,4], index: 4, kind: input, shape index: {}]   ;;  %s6903_s5 = inlined_call_operand.vmem [shape: bf16[4,16], index: 5, kind: input, shape index: {}]   ;;  %s6904_s6 = inlined_call_operand.vmem [shape: f32[1,16], index: 6, kind: input, shape index: {}]   ;;  %s6905_s7 = inlined_call_operand.vmem [shape: f32[1,16], index: 7, kind: input, shape index: {}]   ;;  %s6906_s8 = inlined_call_operand.vmem [shape: f32[1,16], index: 8, kind: input, shape index: {}]   ;;  %s6907_s9 = inlined_call_operand.vmem [shape: bf16[16,4], index: 9, kind: input, shape index: {}]   ;;  %s6908_s10 = inlined_call_operand.vmem [shape: f32[1,4], index: 10, kind: input, shape index: {}]   ;;  %s6909_s11 = inlined_call_operand.vmem [shape: f32[1,4], index: 11, kind: input, shape index: {}]   ;;  %s6910_s12 = inlined_call_operand.vmem [shape: f32[1,4], index: 12, kind: input, shape index: {}]   ;;  %s6911_s13 = inlined_call_operand.vmem [shape: f32[2,256,4], index: 13, kind: output, shape index: {}]  }
   0x1 LB: > { %s4094_s26 = sadd.s32 4294967295, %s4505_s25   ;;  %p4098_p0 = scmp.ge.s32.totalorder %s4505_s25, 1  ;;  %s4505_s25 = sphi %s4578_s25, %s23_s25  }
   0x2   : > { %p387_p1 = scmp.lt.s32.totalorder %s4505_s25, 3 }
   0x4   : > { %p388_p2 = pnand %p4098_p0, %p387_p1 }
   0x6   : > { %391 = sbr.rel (%p388_p2) target bundleno = 964 (0x3c4), region = 72 }
   0xd   : > { %v2813_v0 = vld [vmem:[%s6903_s5] sm:$0x3]  ;;  %vm2869_vm0 = vcmask 1041408   ;;  %p4591_p3 = scmp.lt.s32.totalorder %s4094_s26, 1  ;;  %vm474_vm1 = vcmask 31744   ;;  %v4507_v2 = vmov 0.0  }
   0xe   : > { %4260 = vmatprep.subr.msk.bf16.mxu0 %vm2869_vm0, %v2813_v0  ;;  %v2871_v1 = vsel %vm2869_vm0, %v2813_v0, 0  ;;  %475 = vst.msk [vmem:[#allocation2] sm:$0xff] %vm474_vm1, %v4507_v2  ;;  %476 = vst.msk [vmem:[#allocation2 + $0x8] sm:$0xff] %vm474_vm1, %v4507_v2  ;;  %vm477_vm2 = vcmask 25600   ;;  %v4666_v3 = vld [vmem:[%s6899_s1] ss:$0 sm:$0xff] }
   0xf   : > { %479 = vst.msk [vmem:[#allocation2 + $0x18] sm:$0xff] %vm474_vm1, %v4507_v2  ;;  %480 = vst.msk [vmem:[#allocation2 + $0x20] sm:$0xff] %vm474_vm1, %v4507_v2  ;;  %4193 = vmatpush3.bf16.msra.mxu0 %v2871_v1  ;;  %s6918_s26 = smov (!%p4591_p3, %s4094_s26), 1  ;;  %v4671_v4 = vld [vmem:[%s6899_s1 + $0x1] ss:$0 sm:$0xff]  ;;  %vm787_vm3 = vcmask 1046528  }
  0x10   : > { %482 = vst.msk [vmem:[#allocation2 + $0x30] sm:$0xff] %vm474_vm1, %v4507_v2  ;;  %483 = vst.msk [vmem:[#allocation2 + $0x38] sm:$0xff] %vm474_vm1, %v4507_v2  ;;  %s4156_s30 = sshll.u32 %s6918_s26, 8  ;;  %v4694_v9 = vld [vmem:[%s6899_s1 + $0x2] ss:$0 sm:$0xff]  ;;  %vm1033_vm4 = vcmask 1045504  }
  0x11   : > { %485 = vst.msk [vmem:[#allocation2 + $0x48] sm:$0xff] %vm474_vm1, %v4507_v2  ;;  %486 = vst.msk [vmem:[#allocation2 + $0x50] sm:$0xff] %vm474_vm1, %v4507_v2  ;;  %s4661_s16 = scalar_lea.vmem %s6898_s0, %s4156_s30  ;;  %v4790_v52 = vld [vmem:[%s6899_s1 + $0x3] ss:$0 sm:$0xff]  ;;  %v4810_v57 = vld [vmem:[%s6899_s1 + $0x4] ss:$0 sm:$0xff]  ;;  %s6713_s20 = scalar_lea.vmem %s6911_s13, %s4156_s30 }
  0x12   : > { %488 = vst.msk [vmem:[#allocation2 + $0x60] sm:$0xff] %vm474_vm1, %v4507_v2  ;;  %489 = vst.msk [vmem:[#allocation2 + $0x68] sm:$0xff] %vm474_vm1, %v4507_v2  ;;  %v4674_v5 = vld [vmem:[%s4661_s16] sm:$0xff]  ;;  %v4677_v6 = vld [vmem:[%s4661_s16 + $0x8] sm:$0xff]  ;;  %vm3431_vm5 = vcmask 130048  }
  0x13   : > { %491 = vst.msk [vmem:[#allocation2 + $0x78] sm:$0xff] %vm474_vm1, %v4507_v2  ;;  %492 = vst.msk [vmem:[#allocation2 + $0x80] sm:$0xff] %vm474_vm1, %v4507_v2  ;;  %v4680_v7 = vld [vmem:[%s4661_s16 + $0x10] sm:$0xff]  ;;  %v4683_v8 = vld [vmem:[%s4661_s16 + $0x18] sm:$0xff] }
  0x14   : > { %494 = vst.msk [vmem:[#allocation2 + $0x90] sm:$0xff] %vm474_vm1, %v4507_v2  ;;  %495 = vst.msk [vmem:[#allocation2 + $0x98] sm:$0xff] %vm474_vm1, %v4507_v2  ;;  %v4697_v10 = vld [vmem:[%s4661_s16 + $0x20] sm:$0xff]  ;;  %v4702_v13 = vld [vmem:[%s4661_s16 + $0x28] sm:$0xff] }
  0x15   : > { %497 = vst.msk [vmem:[#allocation2 + $0xa8] sm:$0xff] %vm474_vm1, %v4507_v2  ;;  %498 = vst.msk [vmem:[#allocation2 + $0xb0] sm:$0xff] %vm474_vm1, %v4507_v2  ;;  %v563_v11 = vld [vmem:[#allocation2] sm:$0xff]  ;;  %v564_v12 = vld [vmem:[#allocation2 + $0x8] sm:$0xff] }
  0x16   : > { %500 = vst.msk [vmem:[#allocation2 + $0xc0] sm:$0xff] %vm474_vm1, %v4507_v2  ;;  %501 = vst.msk [vmem:[#allocation2 + $0xc8] sm:$0xff] %vm474_vm1, %v4507_v2  ;;  %v622_v15 = vmul.f32 %v4666_v3, %v563_v11  ;;  %v691_v16 = vmul.f32 %v4671_v4, %v563_v11  ;;  %v692_v17 = vmul.f32 %v4671_v4, %v564_v12  ;;  %v4712_v18 = vld [vmem:[%s4661_s16 + $0x30] sm:$0xff]  ;;  %v4715_v19 = vld [vmem:[%s4661_s16 + $0x38] sm:$0xff] }
  0x17   : > { %503 = vst.msk [vmem:[#allocation2 + $0xd8] sm:$0xff] %vm474_vm1, %v4507_v2  ;;  %504 = vst.msk [vmem:[#allocation2 + $0xe0] sm:$0xff] %vm474_vm1, %v4507_v2  ;;  %v937_v21 = vmul.f32 %v4694_v9, %v563_v11  ;;  %v938_v22 = vmul.f32 %v4694_v9, %v564_v12  ;;  %v4726_v24 = vld [vmem:[%s4661_s16 + $0x40] sm:$0xff]  ;;  %v4729_v25 = vld [vmem:[%s4661_s16 + $0x48] sm:$0xff]  ;;  %v623_v27 = vmul.f32 %v4666_v3, %v564_v12 }
  0x18   : > { %506 = vst.msk [vmem:[#allocation2 + $0xf0] sm:$0xff] %vm474_vm1, %v4507_v2  ;;  %507 = vst.msk [vmem:[#allocation2 + $0xf8] sm:$0xff] %vm474_vm1, %v4507_v2  ;;  %v4732_v26 = vld [vmem:[%s4661_s16 + $0x50] sm:$0xff]  ;;  %v788_v28 = vrot.slane %v691_v16, 1  ;;  %v789_v29 = vrot.slane %v692_v17, 1  ;;  %v4740_v30 = vld [vmem:[%s4661_s16 + $0x58] sm:$0xff] }
  0x19   : > { %509 = vst.msk [vmem:[#allocation2 + $0x108] sm:$0xff] %vm474_vm1, %v4507_v2  ;;  %510 = vst.msk [vmem:[#allocation2 + $0x110] sm:$0xff] %vm474_vm1, %v4507_v2  ;;  %v4745_v31 = vld [vmem:[%s4661_s16 + $0x60] sm:$0xff]  ;;  %v4748_v32 = vld [vmem:[%s4661_s16 + $0x68] sm:$0xff]  ;;  %v1034_v34 = vrot.slane %v937_v21, 2  ;;  %v1035_v35 = vrot.slane %v938_v22, 2 }
  0x1a   : > { %512 = vst.msk [vmem:[#allocation2 + $0x120] sm:$0xff] %vm474_vm1, %v4507_v2  ;;  %513 = vst.msk [vmem:[#allocation2 + $0x128] sm:$0xff] %vm474_vm1, %v4507_v2  ;;  %v4757_v37 = vld [vmem:[%s4661_s16 + $0x70] sm:$0xff]  ;;  %v4760_v38 = vld [vmem:[%s4661_s16 + $0x78] sm:$0xff]  ;;  %v790_v39 = vsel %vm787_vm3, %v788_v28, %v789_v29 }
  0x1b   : > { %515 = vst.msk [vmem:[#allocation2 + $0x138] sm:$0xff] %vm474_vm1, %v4507_v2  ;;  %516 = vst.msk [vmem:[#allocation2 + $0x140] sm:$0xff] %vm474_vm1, %v4507_v2  ;;  %v900_v44 = vadd.f32 %v790_v39, %v622_v15  ;;  %v1036_v45 = vsel %vm1033_vm4, %v1034_v34, %v1035_v35  ;;  %v4818_v62 = vld [vmem:[%s6899_s1 + $0x5] ss:$0 sm:$0xff]  ;;  %v4834_v16 = vld [vmem:[%s6899_s1 + $0x6] ss:$0 sm:$0xff] }
  0x1c   : > { %518 = vst.msk [vmem:[#allocation2 + $0x150] sm:$0xff] %vm474_vm1, %v4507_v2  ;;  %519 = vst.msk [vmem:[#allocation2 + $0x158] sm:$0xff] %vm474_vm1, %v4507_v2 }
  0x1d   : > { %521 = vst.msk [vmem:[#allocation2 + $0x168] sm:$0xff] %vm474_vm1, %v4507_v2  ;;  %522 = vst.msk [vmem:[#allocation2 + $0x170] sm:$0xff] %vm474_vm1, %v4507_v2  ;;  %v1146_v61 = vadd.f32 %v1036_v45, %v900_v44  ;;  %v4855_v44 = vld [vmem:[%s6899_s1 + $0x8] ss:$0 sm:$0xff] }
  0x1e   : > { %524 = vst.msk [vmem:[#allocation2 + $0x180] sm:$0xff] %vm474_vm1, %v4507_v2  ;;  %525 = vst.msk [vmem:[#allocation2 + $0x188] sm:$0xff] %vm474_vm1, %v4507_v2 }
  0x1f   : > { %527 = vst.msk [vmem:[#allocation2 + $0x198] sm:$0xff] %vm474_vm1, %v4507_v2  ;;  %528 = vst.msk [vmem:[#allocation2 + $0x1a0] sm:$0xff] %vm474_vm1, %v4507_v2 }
  0x20   : > { %478 = vst.msk [vmem:[#allocation2 + $0x10] sm:$0x3] %vm477_vm2, %v4507_v2  ;;  %481 = vst.msk [vmem:[#allocation2 + $0x28] sm:$0x3] %vm477_vm2, %v4507_v2 }
  0x21   : > { %484 = vst.msk [vmem:[#allocation2 + $0x40] sm:$0x3] %vm477_vm2, %v4507_v2  ;;  %487 = vst.msk [vmem:[#allocation2 + $0x58] sm:$0x3] %vm477_vm2, %v4507_v2 }
  0x22   : > { %490 = vst.msk [vmem:[#allocation2 + $0x70] sm:$0x3] %vm477_vm2, %v4507_v2  ;;  %493 = vst.msk [vmem:[#allocation2 + $0x88] sm:$0x3] %vm477_vm2, %v4507_v2 }
  0x23   : > { %496 = vst.msk [vmem:[#allocation2 + $0xa0] sm:$0x3] %vm477_vm2, %v4507_v2  ;;  %499 = vst.msk [vmem:[#allocation2 + $0xb8] sm:$0x3] %vm477_vm2, %v4507_v2 }
  0x24   : > { %502 = vst.msk [vmem:[#allocation2 + $0xd0] sm:$0x3] %vm477_vm2, %v4507_v2  ;;  %505 = vst.msk [vmem:[#allocation2 + $0xe8] sm:$0x3] %vm477_vm2, %v4507_v2 }
  0x25   : > { %508 = vst.msk [vmem:[#allocation2 + $0x100] sm:$0x3] %vm477_vm2, %v4507_v2  ;;  %511 = vst.msk [vmem:[#allocation2 + $0x118] sm:$0x3] %vm477_vm2, %v4507_v2 }
  0x26   : > { %514 = vst.msk [vmem:[#allocation2 + $0x130] sm:$0x3] %vm477_vm2, %v4507_v2  ;;  %517 = vst.msk [vmem:[#allocation2 + $0x148] sm:$0x3] %vm477_vm2, %v4507_v2 }
  0x27   : > { %520 = vst.msk [vmem:[#allocation2 + $0x160] sm:$0x3] %vm477_vm2, %v4507_v2  ;;  %523 = vst.msk [vmem:[#allocation2 + $0x178] sm:$0x3] %vm477_vm2, %v4507_v2  ;;  %v565_v14 = vld [vmem:[#allocation2 + $0x10] sm:$0x3] }
  0x28   : > { %526 = vst.msk [vmem:[#allocation2 + $0x190] sm:$0x3] %vm477_vm2, %v4507_v2  ;;  %529 = vst.msk [vmem:[#allocation2 + $0x1a8] sm:$0x3] %vm477_vm2, %v4507_v2  ;;  %v693_v20 = vmul.f32 %v4671_v4, %v565_v14  ;;  %v939_v23 = vmul.f32 %v4694_v9, %v565_v14 }
  0x29   : > { %531 = vst.msk [vmem:[#allocation2 + $0x19] sm:$0xff] %vm474_vm1, %v4674_v5  ;;  %532 = vst.msk [vmem:[#allocation2 + $0x21] sm:$0xff] %vm474_vm1, %v4677_v6 }
  0x2a   : > { %533 = vst.msk [vmem:[#allocation2 + $0x31] sm:$0xff] %vm474_vm1, %v4680_v7  ;;  %534 = vst.msk [vmem:[#allocation2 + $0x39] sm:$0xff] %vm474_vm1, %v4683_v8  ;;  %v791_v33 = vrot.slane %v693_v20, 1  ;;  %v1037_v36 = vrot.slane %v939_v23, 2  ;;  %v4844_v23 = vld [vmem:[%s6899_s1 + $0x7] ss:$0 sm:$0xff] }
  0x2b   : > { %535 = vst.msk [vmem:[#allocation2 + $0x49] sm:$0xff] %vm474_vm1, %v4697_v10  ;;  %536 = vst.msk [vmem:[#allocation2 + $0x51] sm:$0xff] %vm474_vm1, %v4702_v13 }
  0x2c   : > { %537 = vst.msk [vmem:[#allocation2 + $0x61] sm:$0xff] %vm474_vm1, %v4712_v18  ;;  %538 = vst.msk [vmem:[#allocation2 + $0x69] sm:$0xff] %vm474_vm1, %v4715_v19  ;;  %v792_v43 = vsel %vm787_vm3, %v789_v29, %v791_v33  ;;  %v1038_v46 = vsel %vm1033_vm4, %v1035_v35, %v1037_v36 }
  0x2d   : > { %539 = vst.msk [vmem:[#allocation2 + $0x79] sm:$0xff] %vm474_vm1, %v4726_v24  ;;  %540 = vst.msk [vmem:[#allocation2 + $0x81] sm:$0xff] %vm474_vm1, %v4729_v25  ;;  %v901_v51 = vadd.f32 %v792_v43, %v623_v27 }
  0x2e   : > { %541 = vst.msk [vmem:[#allocation2 + $0x91] sm:$0xff] %vm474_vm1, %v4732_v26  ;;  %542 = vst.msk [vmem:[#allocation2 + $0x99] sm:$0xff] %vm474_vm1, %v4740_v30 }
  0x2f   : > { %543 = vst.msk [vmem:[#allocation2 + $0xa9] sm:$0xff] %vm474_vm1, %v4745_v31  ;;  %544 = vst.msk [vmem:[#allocation2 + $0xb1] sm:$0xff] %vm474_vm1, %v4748_v32  ;;  %v1147_v1 = vadd.f32 %v1038_v46, %v901_v51 }
  0x30   : > { %545 = vst.msk [vmem:[#allocation2 + $0xc1] sm:$0xff] %vm474_vm1, %v4757_v37  ;;  %546 = vst.msk [vmem:[#allocation2 + $0xc9] sm:$0xff] %vm474_vm1, %v4760_v38  ;;  %v4767_v40 = vld [vmem:[#allocation2 + $0x18] sm:$0xff]  ;;  %v4769_v41 = vld [vmem:[#allocation2 + $0x20] sm:$0xff] }
  0x31   : > { %v568_v42 = vld [vmem:[#allocation2 + $0x28] sm:$0x3]  ;;  %v4774_v47 = vld [vmem:[#allocation2 + $0x40] sm:$0x3]  ;;  %v4778_v48 = vmul.f32 %v4671_v4, %v4767_v40  ;;  %v4782_v49 = vmul.f32 %v4671_v4, %v4769_v41  ;;  %v4798_v54 = vmul.f32 %v4694_v9, %v4767_v40  ;;  %v4802_v55 = vmul.f32 %v4694_v9, %v4769_v41  ;;  %v4846_v27 = vld [vmem:[#allocation2 + $0x30] sm:$0xff] }
  0x32   : > { %v4785_v50 = vmul.f32 %v4671_v4, %v568_v42  ;;  %v4794_v53 = vmul.f32 %v4671_v4, %v4774_v47  ;;  %v4805_v56 = vmul.f32 %v4694_v9, %v568_v42  ;;  %v1183_v2 = vmul.f32 %v4790_v52, %v4767_v40  ;;  %v4848_v35 = vld [vmem:[#allocation2 + $0x38] sm:$0xff] }
  0x33   : > { %v793_v58 = vrot.slane %v4778_v48, 1  ;;  %v794_v59 = vrot.slane %v4782_v49, 1  ;;  %v1184_v11 = vmul.f32 %v4790_v52, %v4769_v41  ;;  %v1252_v12 = vmul.f32 %v4810_v57, %v4767_v40 }
  0x34   : > { %v796_v60 = vrot.slane %v4785_v50, 1  ;;  %v1042_v0 = vrot.slane %v4805_v56, 2  ;;  %v1253_v14 = vmul.f32 %v4810_v57, %v4769_v41  ;;  %v1254_v15 = vmul.f32 %v4810_v57, %v568_v42 }
  0x35   : > { %v1215_v17 = vadd.f32 %v1183_v2, %v1146_v61  ;;  %v1497_v20 = vmul.f32 %v4818_v62, %v4767_v40  ;;  %v1498_v21 = vmul.f32 %v4818_v62, %v4769_v41  ;;  %v1499_v22 = vmul.f32 %v4818_v62, %v568_v42 }
  0x36   : > { %v1216_v28 = vadd.f32 %v1184_v11, %v1147_v1  ;;  %v1348_v29 = vrot.slane %v1252_v12, 1  ;;  %v1349_v33 = vrot.slane %v1253_v14, 1  ;;  %v1351_v34 = vrot.slane %v1254_v15, 1 }
  0x37   : > { %v1593_v36 = vrot.slane %v1497_v20, 2  ;;  %v1594_v39 = vrot.slane %v1498_v21, 2  ;;  %v1596_v43 = vrot.slane %v1499_v22, 2  ;;  %v1742_v42 = vmul.f32 %v4834_v16, %v4846_v27  ;;  %v4872_v21 = vld [vmem:[%s4661_s16 + $0x80] sm:$0xff]  ;;  %v4875_v22 = vld [vmem:[%s4661_s16 + $0x88] sm:$0xff] }
  0x38   : > { %v1350_v45 = vsel %vm787_vm3, %v1348_v29, %v1349_v33  ;;  %v1352_v46 = vsel %vm787_vm3, %v1349_v33, %v1351_v34  ;;  %v1743_v48 = vmul.f32 %v4834_v16, %v4848_v35  ;;  %v1811_v51 = vmul.f32 %v4844_v23, %v4846_v27  ;;  %547 = vst.msk [vmem:[#allocation2 + $0xd9] sm:$0xff] %vm474_vm1, %v4872_v21 }
  0x39   : > { %v1460_v61 = vadd.f32 %v1350_v45, %v1215_v17  ;;  %v1461_v1 = vadd.f32 %v1352_v46, %v1216_v28  ;;  %v1595_v2 = vsel %vm1033_vm4, %v1593_v36, %v1594_v39  ;;  %v1597_v11 = vsel %vm1033_vm4, %v1594_v39, %v1596_v43  ;;  %548 = vst.msk [vmem:[#allocation2 + $0xe1] sm:$0xff] %vm474_vm1, %v4875_v22 }
  0x3a   : > { %v1812_v12 = vmul.f32 %v4844_v23, %v4848_v35  ;;  %v1813_v14 = vmul.f32 %v4844_v23, %v4774_v47  ;;  %v1907_v15 = vrot.slane %v1811_v51, 1  ;;  %v2056_v20 = vmul.f32 %v4855_v44, %v4846_v27 }
  0x3b   : > { %v1705_v17 = vadd.f32 %v1595_v2, %v1460_v61  ;;  %v1706_v28 = vadd.f32 %v1597_v11, %v1461_v1  ;;  %v2057_v29 = vmul.f32 %v4855_v44, %v4848_v35  ;;  %v2058_v33 = vmul.f32 %v4855_v44, %v4774_v47 }
  0x3c   : > { %v1908_v34 = vrot.slane %v1812_v12, 1  ;;  %v1910_v36 = vrot.slane %v1813_v14, 1  ;;  %v2152_v39 = vrot.slane %v2056_v20, 2  ;;  %v624_v43 = vmul.f32 %v4666_v3, %v4767_v40 }
  0x3d   : > { %v1774_v45 = vadd.f32 %v1742_v42, %v1705_v17  ;;  %v1775_v46 = vadd.f32 %v1743_v48, %v1706_v28  ;;  %v2153_v51 = vrot.slane %v2057_v29, 2  ;;  %v2155_v61 = vrot.slane %v2058_v33, 2  ;;  %v4899_v42 = vld [vmem:[%s6900_s2] ss:$0 sm:$0xff] }
  0x3e   : > { %v1909_v1 = vsel %vm787_vm3, %v1907_v15, %v1908_v34  ;;  %v1911_v2 = vsel %vm787_vm3, %v1908_v34, %v1910_v36  ;;  %v625_v11 = vmul.f32 %v4666_v3, %v4769_v41  ;;  %v795_v12 = vsel %vm787_vm3, %v793_v58, %v794_v59 }
  0x3f   : > { %v2019_v14 = vadd.f32 %v1909_v1, %v1774_v45  ;;  %v2020_v20 = vadd.f32 %v1911_v2, %v1775_v46  ;;  %v2154_v63 = vsel %vm1033_vm4, %v2152_v39, %v2153_v51  ;;  %v2156_v40 = vsel %vm1033_vm4, %v2153_v51, %v2155_v61 }
  0x40   : > { %v797_v41 = vsel %vm787_vm3, %v794_v59, %v796_v60  ;;  %v902_v48 = vadd.f32 %v795_v12, %v624_v43  ;;  %v1039_v58 = vrot.slane %v4798_v54, 2  ;;  %v1040_v15 = vrot.slane %v4802_v55, 2 }
  0x41   : > { %v2264_v17 = vadd.f32 %v2154_v63, %v2019_v14  ;;  %v2265_v28 = vadd.f32 %v2156_v40, %v2020_v20  ;;  %v903_v29 = vadd.f32 %v797_v41, %v625_v11  ;;  %v1185_v33 = vmul.f32 %v4790_v52, %v4846_v27  ;;  %v4930_v20 = vld [vmem:[#allocation2 + $0x48] sm:$0xff] }
  0x42   : > { %v1041_v34 = vsel %vm1033_vm4, %v1039_v58, %v1040_v15  ;;  %v1043_v50 = vsel %vm1033_vm4, %v1040_v15, %v1042_v0  ;;  %v1186_v49 = vmul.f32 %v4790_v52, %v4848_v35  ;;  %v1255_v54 = vmul.f32 %v4810_v57, %v4846_v27 }
  0x43   : > { %v2303_v55 = vadd.f32 %v4899_v42, %v2264_v17  ;;  %v2304_v59 = vadd.f32 %v4899_v42, %v2265_v28  ;;  %v1148_v60 = vadd.f32 %v1041_v34, %v902_v48  ;;  %v1149_v63 = vadd.f32 %v1043_v50, %v903_v29 }
  0x44   : > { %v1256_v36 = vmul.f32 %v4810_v57, %v4848_v35  ;;  %v1257_v56 = vmul.f32 %v4810_v57, %v4774_v47  ;;  %v1353_v39 = vrot.slane %v1255_v54, 1  ;;  %v1500_v0 = vmul.f32 %v4818_v62, %v4846_v27 }
  0x45   : > { %v4926_v43 = vmul.f32 0.5, %v2303_v55  ;;  %v4928_v45 = vmul.f32 0.5, %v2304_v59  ;;  %v2367_v46 = vmul.f32 0.044715, %v2303_v55  ;;  %v2368_v51 = vmul.f32 0.044715, %v2304_v59 }
  0x46   : > { %v1217_v61 = vadd.f32 %v1185_v33, %v1148_v60  ;;  %v1218_v1 = vadd.f32 %v1186_v49, %v1149_v63  ;;  %v1354_v2 = vrot.slane %v1256_v36, 1  ;;  %v1356_v11 = vrot.slane %v1257_v56, 1  ;;  %v4940_v33 = vld [vmem:[#allocation2 + $0x50] sm:$0xff]  ;;  %v4942_v49 = vld [vmem:[#allocation2 + $0x58] sm:$0x3] }
  0x47   : > { %v2399_v12 = vmul.f32 %v2367_v46, %v2303_v55  ;;  %v2400_v14 = vmul.f32 %v2368_v51, %v2304_v59  ;;  %v1501_v40 = vmul.f32 %v4818_v62, %v4848_v35  ;;  %v1502_v41 = vmul.f32 %v4818_v62, %v4774_v47 }
  0x48   : > { %v1355_v48 = vsel %vm787_vm3, %v1353_v39, %v1354_v2  ;;  %v1357_v58 = vsel %vm787_vm3, %v1354_v2, %v1356_v11  ;;  %v1598_v15 = vrot.slane %v1500_v0, 2  ;;  %v1744_v17 = vmul.f32 %v4834_v16, %v4930_v20 }
  0x49   : > { %v2431_v28 = vmul.f32 %v2399_v12, %v2303_v55  ;;  %v2432_v29 = vmul.f32 %v2400_v14, %v2304_v59  ;;  %v1462_v34 = vadd.f32 %v1355_v48, %v1217_v61  ;;  %v1463_v50 = vadd.f32 %v1357_v58, %v1218_v1 }
  0x4a   : > { %v1599_v54 = vrot.slane %v1501_v40, 2  ;;  %v1601_v60 = vrot.slane %v1502_v41, 2  ;;  %v1745_v63 = vmul.f32 %v4834_v16, %v4940_v33  ;;  %v1814_v36 = vmul.f32 %v4844_v23, %v4930_v20 }
  0x4b   : > { %v2463_v56 = vadd.f32 %v2431_v28, %v2303_v55  ;;  %v2464_v39 = vadd.f32 %v2432_v29, %v2304_v59  ;;  %v1815_v0 = vmul.f32 %v4844_v23, %v4940_v33  ;;  %v1816_v46 = vmul.f32 %v4844_v23, %v4942_v49 }
  0x4c   : > { %v1600_v51 = vsel %vm1033_vm4, %v1598_v15, %v1599_v54  ;;  %v1602_v61 = vsel %vm1033_vm4, %v1599_v54, %v1601_v60  ;;  %v1912_v1 = vrot.slane %v1814_v36, 1  ;;  %v2059_v2 = vmul.f32 %v4855_v44, %v4930_v20 }
  0x4d   : > { %v2495_v11 = vmul.f32 0.7978846, %v2463_v56  ;;  %v2496_v12 = vmul.f32 0.7978846, %v2464_v39  ;;  %v1707_v14 = vadd.f32 %v1600_v51, %v1462_v34  ;;  %v1708_v40 = vadd.f32 %v1602_v61, %v1463_v50 }
  0x4e   : > { %v1913_v55 = vrot.slane %v1815_v0, 1  ;;  %v1915_v59 = vrot.slane %v1816_v46, 1  ;;  %v2060_v41 = vmul.f32 %v4855_v44, %v4940_v33  ;;  %v2061_v48 = vmul.f32 %v4855_v44, %v4942_v49 }
  0x4f   : > { %4271 = vtanh.f32 %v2495_v11  ;;  %v1776_v58 = vadd.f32 %v1744_v17, %v1707_v14  ;;  %v1777_v15 = vadd.f32 %v1745_v63, %v1708_v40  ;;  %v2157_v28 = vrot.slane %v2059_v2, 2 }
  0x50   : > { %4273 = vtanh.f32 %v2496_v12  ;;  %v1914_v29 = vsel %vm787_vm3, %v1912_v1, %v1913_v55  ;;  %v1916_v54 = vsel %vm787_vm3, %v1913_v55, %v1915_v59  ;;  %v2158_v60 = vrot.slane %v2060_v41, 2 }
  0x51   : > { %v2021_v34 = vadd.f32 %v1914_v29, %v1776_v58  ;;  %v2022_v50 = vadd.f32 %v1916_v54, %v1777_v15  ;;  %v2160_v36 = vrot.slane %v2061_v48, 2  ;;  %v626_v56 = vmul.f32 %v4666_v3, %v4846_v27 }
  0x52   : > { %v2159_v39 = vsel %vm1033_vm4, %v2157_v28, %v2158_v60  ;;  %v627_v0 = vmul.f32 %v4666_v3, %v4848_v35  ;;  %v697_v17 = vmul.f32 %v4671_v4, %v4846_v27  ;;  %v698_v63 = vmul.f32 %v4671_v4, %v4848_v35 }
  0x53   : > { %v2161_v46 = vsel %vm1033_vm4, %v2158_v60, %v2160_v36  ;;  %v2266_v51 = vadd.f32 %v2159_v39, %v2021_v34  ;;  %v943_v61 = vmul.f32 %v4694_v9, %v4846_v27  ;;  %v944_v1 = vmul.f32 %v4694_v9, %v4848_v35  ;;  %v4989_v60 = vld [vmem:[%s4661_s16 + $0x90] sm:$0xff]  ;;  %v4992_v34 = vld [vmem:[%s4661_s16 + $0x98] sm:$0xff] }
  0x54   : > { %v2267_v2 = vadd.f32 %v2161_v46, %v2022_v50  ;;  %v798_v11 = vrot.slane %v697_v17, 1  ;;  %v799_v12 = vrot.slane %v698_v63, 1  ;;  %v945_v14 = vmul.f32 %v4694_v9, %v4774_v47  ;;  %549 = vst.msk [vmem:[#allocation2 + $0xf1] sm:$0xff] %vm474_vm1, %v4989_v60  ;;  %550 = vst.msk [vmem:[#allocation2 + $0xf9] sm:$0xff] %vm474_vm1, %v4992_v34 }
  0x55   : > { %v2305_v40 = vadd.f32 %v4899_v42, %v2266_v51  ;;  %v1044_v55 = vrot.slane %v943_v61, 2  ;;  %v1045_v59 = vrot.slane %v944_v1, 2  ;;  %v1187_v41 = vmul.f32 %v4790_v52, %v4930_v20 }
  0x56   : > { %v2306_v27 = vadd.f32 %v4899_v42, %v2267_v2  ;;  %v800_v48 = vsel %vm787_vm3, %v798_v11, %v799_v12  ;;  %v6914_v35 = vrot.slane %v4794_v53, 1  ;;  %v1047_v15 = vrot.slane %v945_v14, 2  ;;  %v5011_v14 = vld [vmem:[%s6901_s3] ss:$0 sm:$0xff] }
  0x57   : > { %v4986_v28 = vmul.f32 0.5, %v2305_v40  ;;  %v2369_v29 = vmul.f32 0.044715, %v2305_v40  ;;  %v904_v47 = vadd.f32 %v800_v48, %v626_v56  ;;  %v1046_v39 = vsel %vm1033_vm4, %v1044_v55, %v1045_v59 }
  0x58   : > { %v802_v58 = vsel %vm787_vm3, %v799_v12, %v6914_v35  ;;  %v4994_v50 = vmul.f32 0.5, %v2306_v27  ;;  %v2370_v36 = vmul.f32 0.044715, %v2306_v27  ;;  %v1048_v17 = vsel %vm1033_vm4, %v1045_v59, %v1047_v15 }
  0x59   : > { %v905_v54 = vadd.f32 %v802_v58, %v627_v0  ;;  %v4272_v53 = vpop.eup %4271  ;;  %v2401_v56 = vmul.f32 %v2369_v29, %v2305_v40  ;;  %v1150_v0 = vadd.f32 %v1046_v39, %v904_v47  ;;  %v1188_v46 = vmul.f32 %v4790_v52, %v4940_v33 }
  0x5a   : > { %v4274_v51 = vpop.eup %4273  ;;  %v2559_v61 = vadd.f32 1.0, %v4272_v53  ;;  %v2402_v1 = vmul.f32 %v2370_v36, %v2306_v27  ;;  %v1258_v2 = vmul.f32 %v4810_v57, %v4930_v20  ;;  %v1259_v11 = vmul.f32 %v4810_v57, %v4940_v33 }
  0x5b   : > { %v1151_v63 = vadd.f32 %v1048_v17, %v905_v54  ;;  %v2560_v12 = vadd.f32 1.0, %v4274_v51  ;;  %v2433_v55 = vmul.f32 %v2401_v56, %v2305_v40  ;;  %v1219_v59 = vadd.f32 %v1187_v41, %v1150_v0  ;;  %v5020_v54 = vld [vmem:[%s6902_s4] ss:$0 sm:$0xff] }
  0x5c   : > { %v2591_v35 = vmul.f32 %v2559_v61, %v4926_v43  ;;  %v2434_v58 = vmul.f32 %v2402_v1, %v2306_v27  ;;  %v1260_v15 = vmul.f32 %v4810_v57, %v4942_v49  ;;  %v1358_v29 = vrot.slane %v1258_v2, 1 }
  0x5d   : > { %v1220_v48 = vadd.f32 %v1188_v46, %v1151_v63  ;;  %v2592_v47 = vmul.f32 %v2560_v12, %v4928_v45  ;;  %v2465_v36 = vadd.f32 %v2433_v55, %v2305_v40  ;;  %v1359_v39 = vrot.slane %v1259_v11, 1  ;;  %v5035_v55 = vld [vmem:[#allocation2 + $0x60] sm:$0xff] }
  0x5e   : > { %v1503_v41 = vmul.f32 %v4818_v62, %v4930_v20  ;;  %v2630_v17 = vmul.f32 %v5011_v14, %v2591_v35  ;;  %v2466_v43 = vadd.f32 %v2434_v58, %v2306_v27  ;;  %v1361_v53 = vrot.slane %v1260_v15, 1  ;;  %v5037_v35 = vld [vmem:[#allocation2 + $0x68] sm:$0xff] }
  0x5f   : > { %v1504_v56 = vmul.f32 %v4818_v62, %v4940_v33  ;;  %v2631_v0 = vmul.f32 %v5011_v14, %v2592_v47  ;;  %v2497_v45 = vmul.f32 0.7978846, %v2465_v36  ;;  %v1360_v63 = vsel %vm787_vm3, %v1358_v29, %v1359_v39  ;;  %v5040_v47 = vld [vmem:[#allocation2 + $0x70] sm:$0x3] }
  0x60   : > { %v1505_v46 = vmul.f32 %v4818_v62, %v4942_v49  ;;  %v2669_v40 = vadd.f32 %v5020_v54, %v2630_v17  ;;  %v2498_v51 = vmul.f32 0.7978846, %v2466_v43  ;;  %v1362_v61 = vsel %vm787_vm3, %v1359_v39, %v1361_v53 }
  0x61   : > { %v1464_v1 = vadd.f32 %v1360_v63, %v1219_v59  ;;  %v2670_v27 = vadd.f32 %v5020_v54, %v2631_v0  ;;  %4275 = vtanh.f32 %v2497_v45  ;;  %v1465_v2 = vadd.f32 %v1362_v61, %v1220_v48 }
  0x62   : > { %v1603_v11 = vrot.slane %v1503_v41, 2  ;;  %v2701_v12 = vadd.f32 %v2669_v40, %v4674_v5  ;;  %4277 = vtanh.f32 %v2498_v51  ;;  %v1604_v58 = vrot.slane %v1504_v56, 2 }
  0x63   : > { %v1606_v15 = vrot.slane %v1505_v46, 2  ;;  %v2702_v29 = vadd.f32 %v2670_v27, %v4677_v6  ;;  %v1746_v59 = vmul.f32 %v4834_v16, %v5035_v55  ;;  %v1747_v48 = vmul.f32 %v4834_v16, %v5037_v35 }
  0x64   : > { %v1817_v5 = vmul.f32 %v4844_v23, %v5035_v55  ;;  %2733 = vst.msk [vmem:[#allocation3] sm:$0xff] %vm474_vm1, %v2701_v12  ;;  %v1605_v36 = vsel %vm1033_vm4, %v1603_v11, %v1604_v58  ;;  %v1818_v6 = vmul.f32 %v4844_v23, %v5037_v35  ;;  %v1819_v41 = vmul.f32 %v4844_v23, %v5040_v47 }
  0x65   : > { %v1607_v39 = vsel %vm1033_vm4, %v1604_v58, %v1606_v15  ;;  %2734 = vst.msk [vmem:[#allocation3 + $0x8] sm:$0xff] %vm474_vm1, %v2702_v29  ;;  %v1709_v17 = vadd.f32 %v1605_v36, %v1464_v1  ;;  %v2062_v56 = vmul.f32 %v4855_v44, %v5035_v55  ;;  %v2063_v63 = vmul.f32 %v4855_v44, %v5037_v35 }
  0x66   : > { %v1710_v43 = vadd.f32 %v1607_v39, %v1465_v2  ;;  %v1917_v53 = vrot.slane %v1817_v5, 1  ;;  %v1918_v0 = vrot.slane %v1818_v6, 1  ;;  %v1920_v45 = vrot.slane %v1819_v41, 1 }
  0x67   : > { %v2064_v46 = vmul.f32 %v4855_v44, %v5040_v47  ;;  %v1778_v40 = vadd.f32 %v1746_v59, %v1709_v17  ;;  %v2162_v61 = vrot.slane %v2062_v56, 2  ;;  %v628_v27 = vmul.f32 %v4666_v3, %v4930_v20 }
  0x68   : > { %v1779_v51 = vadd.f32 %v1747_v48, %v1710_v43  ;;  %v1919_v1 = vsel %vm787_vm3, %v1917_v53, %v1918_v0  ;;  %v1921_v2 = vsel %vm787_vm3, %v1918_v0, %v1920_v45  ;;  %v2163_v11 = vrot.slane %v2063_v63, 2  ;;  %v5079_v0 = vld [vmem:[%s4661_s16 + $0xa0] sm:$0xff]  ;;  %v5082_v45 = vld [vmem:[%s4661_s16 + $0xa8] sm:$0xff] }
  0x69   : > { %v2165_v12 = vrot.slane %v2064_v46, 2  ;;  %v2023_v58 = vadd.f32 %v1919_v1, %v1778_v40  ;;  %v629_v29 = vmul.f32 %v4666_v3, %v4940_v33  ;;  %v700_v59 = vmul.f32 %v4671_v4, %v4930_v20  ;;  %551 = vst.msk [vmem:[#allocation2 + $0x109] sm:$0xff] %vm474_vm1, %v5079_v0  ;;  %552 = vst.msk [vmem:[#allocation2 + $0x111] sm:$0xff] %vm474_vm1, %v5082_v45 }
  0x6a   : > { %v2024_v15 = vadd.f32 %v1921_v2, %v1779_v51  ;;  %v2164_v48 = vsel %vm1033_vm4, %v2162_v61, %v2163_v11  ;;  %v701_v36 = vmul.f32 %v4671_v4, %v4940_v33  ;;  %v702_v39 = vmul.f32 %v4671_v4, %v4942_v49 }
  0x6b   : > { %v2166_v5 = vsel %vm1033_vm4, %v2163_v11, %v2165_v12  ;;  %v4276_v6 = vpop.eup %4275  ;;  %v2765_v41 = vld [vmem:[#allocation3] sm:$0xff]  ;;  %v2268_v17 = vadd.f32 %v2164_v48, %v2023_v58  ;;  %v803_v53 = vrot.slane %v700_v59, 1  ;;  %v946_v56 = vmul.f32 %v4694_v9, %v4930_v20 }
  0x6c   : > { %v2269_v43 = vadd.f32 %v2166_v5, %v2024_v15  ;;  %v4278_v63 = vpop.eup %4277  ;;  %v2766_v46 = vld [vmem:[#allocation3 + $0x8] sm:$0xff]  ;;  %v2561_v40 = vadd.f32 1.0, %v4276_v6  ;;  %v804_v51 = vrot.slane %v701_v36, 1  ;;  %v806_v61 = vrot.slane %v702_v39, 1 }
  0x6d   : > { %v947_v1 = vmul.f32 %v4694_v9, %v4940_v33  ;;  %v2797_v2 = vpack.c.bf16 %v2766_v46, %v2765_v41  ;;  %v2562_v20 = vadd.f32 1.0, %v4278_v63  ;;  %v2307_v11 = vadd.f32 %v4899_v42, %v2268_v17 }
  0x6e   : > { %v2308_v12 = vadd.f32 %v4899_v42, %v2269_v43  ;;  %v2593_v58 = vmul.f32 %v2561_v40, %v4986_v28  ;;  %v805_v15 = vsel %vm787_vm3, %v803_v53, %v804_v51  ;;  %v807_v59 = vsel %vm787_vm3, %v804_v51, %v806_v61 }
  0x6f   : > { %v948_v33 = vmul.f32 %v4694_v9, %v4942_v49  ;;  %4194 = vmatprep.mubr.msk.bf16.mxu0 %vm474_vm1, %v2797_v2  ;;  %v2594_v48 = vmul.f32 %v2562_v20, %v4994_v50  ;;  %v5099_v5 = vmul.f32 0.5, %v2307_v11  ;;  %v2371_v39 = vmul.f32 0.044715, %v2307_v11 }
  0x70   : > { %v5101_v36 = vmul.f32 0.5, %v2308_v12  ;;  %v2632_v6 = vmul.f32 %v5011_v14, %v2593_v58  ;;  %v2372_v41 = vmul.f32 0.044715, %v2308_v12  ;;  %v906_v28 = vadd.f32 %v805_v15, %v628_v27 }
  0x71   : > { %v907_v17 = vadd.f32 %v807_v59, %v629_v29  ;;  %v2633_v43 = vmul.f32 %v5011_v14, %v2594_v48  ;;  %v2403_v53 = vmul.f32 %v2371_v39, %v2307_v11  ;;  %v1049_v63 = vrot.slane %v946_v56, 2 }
  0x72   : > { %v1050_v46 = vrot.slane %v947_v1, 2  ;;  %v2671_v49 = vadd.f32 %v5020_v54, %v2632_v6  ;;  %v2404_v40 = vmul.f32 %v2372_v41, %v2308_v12  ;;  %v1052_v51 = vrot.slane %v948_v33, 2 }
  0x73   : > { %v1189_v50 = vmul.f32 %v4790_v52, %v5035_v55  ;;  %v2672_v61 = vadd.f32 %v5020_v54, %v2633_v43  ;;  %v2435_v2 = vmul.f32 %v2403_v53, %v2307_v11  ;;  %v1190_v27 = vmul.f32 %v4790_v52, %v5037_v35  ;;  %v5125_v53 = vld [vmem:[#allocation2 + $0x78] sm:$0xff] }
  0x74   : > { %v1051_v20 = vsel %vm1033_vm4, %v1049_v63, %v1050_v46  ;;  %v2703_v29 = vadd.f32 %v2671_v49, %v4680_v7  ;;  %v2436_v58 = vmul.f32 %v2404_v40, %v2308_v12  ;;  %v1053_v56 = vsel %vm1033_vm4, %v1050_v46, %v1052_v51 }
  0x75   : > { %v1152_v1 = vadd.f32 %v1051_v20, %v906_v28  ;;  %v2704_v15 = vadd.f32 %v2672_v61, %v4683_v8  ;;  %v2467_v59 = vadd.f32 %v2435_v2, %v2307_v11  ;;  %v1153_v33 = vadd.f32 %v1053_v56, %v907_v17 }
  0x76   : > { %v1261_v48 = vmul.f32 %v4810_v57, %v5035_v55  ;;  %2735 = vst.msk [vmem:[#allocation3 + $0x10] sm:$0xff] %vm474_vm1, %v2703_v29  ;;  %v2468_v39 = vadd.f32 %v2436_v58, %v2308_v12  ;;  %v1262_v41 = vmul.f32 %v4810_v57, %v5037_v35  ;;  %v1263_v7 = vmul.f32 %v4810_v57, %v5040_v47 }
  0x77   : > { %v1221_v6 = vadd.f32 %v1189_v50, %v1152_v1  ;;  %2736 = vst.msk [vmem:[#allocation3 + $0x18] sm:$0xff] %vm474_vm1, %v2704_v15  ;;  %v2499_v28 = vmul.f32 0.7978846, %v2467_v59  ;;  %v1222_v43 = vadd.f32 %v1190_v27, %v1153_v33  ;;  %v1506_v11 = vmul.f32 %v4818_v62, %v5035_v55  ;;  %v5133_v50 = vld [vmem:[#allocation2 + $0x80] sm:$0xff]  ;;  %v5137_v27 = vld [vmem:[#allocation2 + $0x88] sm:$0x3] }
  0x78   : > { %v1363_v8 = vrot.slane %v1261_v48, 1  ;;  %v2500_v17 = vmul.f32 0.7978846, %v2468_v39  ;;  %v1364_v63 = vrot.slane %v1262_v41, 1  ;;  %v1366_v12 = vrot.slane %v1263_v7, 1 }
  0x79   : > { %v1507_v46 = vmul.f32 %v4818_v62, %v5037_v35  ;;  %4279 = vtanh.f32 %v2499_v28  ;;  %v1508_v49 = vmul.f32 %v4818_v62, %v5040_v47  ;;  %v1608_v40 = vrot.slane %v1506_v11, 2 }
  0x7a   : > { %v1748_v51 = vmul.f32 %v4834_v16, %v5125_v53  ;;  %4281 = vtanh.f32 %v2500_v17  ;;  %v1365_v61 = vsel %vm787_vm3, %v1363_v8, %v1364_v63  ;;  %v1367_v2 = vsel %vm787_vm3, %v1364_v63, %v1366_v12 }
  0x7b   : > { %v1609_v20 = vrot.slane %v1507_v46, 2  ;;  %v1466_v29 = vadd.f32 %v1365_v61, %v1221_v6  ;;  %v1467_v58 = vadd.f32 %v1367_v2, %v1222_v43  ;;  %v1611_v56 = vrot.slane %v1508_v49, 2 }
  0x7c   : > { %v1749_v1 = vmul.f32 %v4834_v16, %v5133_v50  ;;  %v1820_v59 = vmul.f32 %v4844_v23, %v5125_v53  ;;  %v1821_v33 = vmul.f32 %v4844_v23, %v5133_v50  ;;  %v1822_v48 = vmul.f32 %v4844_v23, %v5137_v27 }
  0x7d   : > { %v1610_v15 = vsel %vm1033_vm4, %v1608_v40, %v1609_v20  ;;  %v2767_v39 = vld [vmem:[#allocation3 + $0x10] sm:$0xff]  ;;  %v1612_v41 = vsel %vm1033_vm4, %v1609_v20, %v1611_v56  ;;  %v2065_v7 = vmul.f32 %v4855_v44, %v5125_v53  ;;  %v2066_v28 = vmul.f32 %v4855_v44, %v5133_v50 }
  0x7e   : > { %v1711_v6 = vadd.f32 %v1610_v15, %v1466_v29  ;;  %v2768_v43 = vld [vmem:[#allocation3 + $0x18] sm:$0xff]  ;;  %v1712_v8 = vadd.f32 %v1612_v41, %v1467_v58  ;;  %v1922_v11 = vrot.slane %v1820_v59, 1  ;;  %v1923_v17 = vrot.slane %v1821_v33, 1 }
  0x7f   : > { %v1925_v63 = vrot.slane %v1822_v48, 1  ;;  %v2798_v12 = vpack.c.bf16 %v2768_v43, %v2767_v39  ;;  %v2067_v49 = vmul.f32 %v4855_v44, %v5137_v27  ;;  %v2167_v40 = vrot.slane %v2065_v7, 2 }
  0x80   : > { %v1780_v46 = vadd.f32 %v1748_v51, %v1711_v6  ;;  %v1781_v61 = vadd.f32 %v1749_v1, %v1712_v8  ;;  %v1924_v2 = vsel %vm787_vm3, %v1922_v11, %v1923_v17  ;;  %v2168_v29 = vrot.slane %v2066_v28, 2 }
  0x81   : > { %v1926_v20 = vsel %vm787_vm3, %v1923_v17, %v1925_v63  ;;  %4195 = vmatmul.mubr.msk.bf16.vlgmr.msra.gmra.mrb[0].mxu0 %vm474_vm1, %v2798_v12  ;;  %v2170_v15 = vrot.slane %v2067_v49, 2  ;;  %v630_v58 = vmul.f32 %v4666_v3, %v5035_v55  ;;  %v631_v51 = vmul.f32 %v4666_v3, %v5037_v35 }
  0x82   : > { %v2025_v56 = vadd.f32 %v1924_v2, %v1780_v46  ;;  %v2026_v59 = vadd.f32 %v1926_v20, %v1781_v61  ;;  %v2169_v33 = vsel %vm1033_vm4, %v2167_v40, %v2168_v29  ;;  %v703_v1 = vmul.f32 %v4671_v4, %v5035_v55 }
  0x83   : > { %v704_v48 = vmul.f32 %v4671_v4, %v5037_v35  ;;  %v4280_v39 = vpop.eup %4279  ;;  %v2171_v41 = vsel %vm1033_vm4, %v2168_v29, %v2170_v15  ;;  %v705_v7 = vmul.f32 %v4671_v4, %v5040_v47  ;;  %v949_v28 = vmul.f32 %v4694_v9, %v5035_v55 }
  0x84   : > { %v2270_v6 = vadd.f32 %v2169_v33, %v2025_v56  ;;  %v4282_v3 = vpop.eup %4281  ;;  %v2563_v43 = vadd.f32 1.0, %v4280_v39  ;;  %v2271_v8 = vadd.f32 %v2171_v41, %v2026_v59  ;;  %v808_v11 = vrot.slane %v703_v1, 1  ;;  %v5188_v33 = vld [vmem:[%s4661_s16 + $0xb0] sm:$0xff]  ;;  %v5191_v1 = vld [vmem:[%s4661_s16 + $0xb8] sm:$0xff] }
  0x85   : > { %v809_v17 = vrot.slane %v704_v48, 1  ;;  %v2564_v63 = vadd.f32 1.0, %v4282_v3  ;;  %v811_v46 = vrot.slane %v705_v7, 1  ;;  %v950_v49 = vmul.f32 %v4694_v9, %v5037_v35  ;;  %553 = vst.msk [vmem:[#allocation2 + $0x121] sm:$0xff] %vm474_vm1, %v5188_v33  ;;  %554 = vst.msk [vmem:[#allocation2 + $0x129] sm:$0xff] %vm474_vm1, %v5191_v1 }
  0x86   : > { %v2309_v12 = vadd.f32 %v4899_v42, %v2270_v6  ;;  %v2595_v40 = vmul.f32 %v2563_v43, %v5099_v5  ;;  %v2310_v4 = vadd.f32 %v4899_v42, %v2271_v8  ;;  %v951_v61 = vmul.f32 %v4694_v9, %v5040_v47 }
  0x87   : > { %v810_v55 = vsel %vm787_vm3, %v808_v11, %v809_v17  ;;  %v2596_v2 = vmul.f32 %v2564_v63, %v5101_v36  ;;  %v812_v56 = vsel %vm787_vm3, %v809_v17, %v811_v46  ;;  %v1054_v36 = vrot.slane %v949_v28, 2 }
  0x88   : > { %v5181_v20 = vmul.f32 0.5, %v2309_v12  ;;  %v2373_v29 = vmul.f32 0.044715, %v2309_v12  ;;  %v2634_v15 = vmul.f32 %v5011_v14, %v2595_v40  ;;  %v5185_v59 = vmul.f32 0.5, %v2310_v4 }
  0x89   : > { %v2374_v35 = vmul.f32 0.044715, %v2310_v4  ;;  %v908_v5 = vadd.f32 %v810_v55, %v630_v58  ;;  %v2635_v48 = vmul.f32 %v5011_v14, %v2596_v2  ;;  %v909_v47 = vadd.f32 %v812_v56, %v631_v51 }
  0x8a   : > { %v2405_v9 = vmul.f32 %v2373_v29, %v2309_v12  ;;  %v2673_v39 = vadd.f32 %v5020_v54, %v2634_v15  ;;  %v1055_v6 = vrot.slane %v950_v49, 2  ;;  %v1057_v58 = vrot.slane %v951_v61, 2 }
  0x8b   : > { %v2406_v41 = vmul.f32 %v2374_v35, %v2310_v4  ;;  %v2674_v7 = vadd.f32 %v5020_v54, %v2635_v48  ;;  %v1191_v43 = vmul.f32 %v4790_v52, %v5125_v53  ;;  %v1192_v51 = vmul.f32 %v4790_v52, %v5133_v50 }
  0x8c   : > { %v2437_v3 = vmul.f32 %v2405_v9, %v2309_v12  ;;  %v2705_v28 = vadd.f32 %v2673_v39, %v4697_v10  ;;  %v1056_v11 = vsel %vm1033_vm4, %v1054_v36, %v1055_v6  ;;  %v1058_v17 = vsel %vm1033_vm4, %v1055_v6, %v1057_v58  ;;  %v5230_v6 = vld [vmem:[#allocation2 + $0xa0] sm:$0x3] }
  0x8d   : > { %v2438_v8 = vmul.f32 %v2406_v41, %v2310_v4  ;;  %v2706_v63 = vadd.f32 %v2674_v7, %v4702_v13  ;;  %v1154_v49 = vadd.f32 %v1056_v11, %v908_v5  ;;  %v1155_v40 = vadd.f32 %v1058_v17, %v909_v47  ;;  %v5218_v5 = vld [vmem:[#allocation2 + $0x90] sm:$0xff]  ;;  %v5228_v41 = vld [vmem:[#allocation2 + $0x98] sm:$0xff] }
  0x8e   : > { %v2469_v46 = vadd.f32 %v2437_v3, %v2309_v12  ;;  %2737 = vst.msk [vmem:[#allocation3 + $0x20] sm:$0xff] %vm474_vm1, %v2705_v28  ;;  %v1264_v61 = vmul.f32 %v4810_v57, %v5125_v53  ;;  %v1265_v52 = vmul.f32 %v4810_v57, %v5133_v50  ;;  %v1266_v10 = vmul.f32 %v4810_v57, %v5137_v27 }
  0x8f   : > { %v2470_v55 = vadd.f32 %v2438_v8, %v2310_v4  ;;  %2738 = vst.msk [vmem:[#allocation3 + $0x28] sm:$0xff] %vm474_vm1, %v2706_v63  ;;  %v1223_v29 = vadd.f32 %v1191_v43, %v1154_v49  ;;  %v1224_v13 = vadd.f32 %v1192_v51, %v1155_v40  ;;  %v1509_v12 = vmul.f32 %v4818_v62, %v5125_v53 }
  0x90   : > { %v2501_v2 = vmul.f32 0.7978846, %v2469_v46  ;;  %v1368_v15 = vrot.slane %v1264_v61, 1  ;;  %v1369_v4 = vrot.slane %v1265_v52, 1  ;;  %v1371_v35 = vrot.slane %v1266_v10, 1 }
  0x91   : > { %v2502_v56 = vmul.f32 0.7978846, %v2470_v55  ;;  %v1510_v48 = vmul.f32 %v4818_v62, %v5133_v50  ;;  %v1511_v57 = vmul.f32 %v4818_v62, %v5137_v27  ;;  %v1613_v9 = vrot.slane %v1509_v12, 2 }
  0x92   : > { %4283 = vtanh.f32 %v2501_v2  ;;  %v1370_v47 = vsel %vm787_vm3, %v1368_v15, %v1369_v4  ;;  %v1372_v36 = vsel %vm787_vm3, %v1369_v4, %v1371_v35  ;;  %v1750_v39 = vmul.f32 %v4834_v16, %v5218_v5 }
  0x93   : > { %4285 = vtanh.f32 %v2502_v56  ;;  %v1468_v58 = vadd.f32 %v1370_v47, %v1223_v29  ;;  %v1469_v7 = vadd.f32 %v1372_v36, %v1224_v13  ;;  %v1614_v3 = vrot.slane %v1510_v48, 2  ;;  %v5254_v48 = vld [vmem:[%s6899_s1] ss:$0 sm:$0xff] }
  0x94   : > { %v1616_v43 = vrot.slane %v1511_v57, 2  ;;  %v1751_v62 = vmul.f32 %v4834_v16, %v5228_v41  ;;  %v1823_v51 = vmul.f32 %v4844_v23, %v5218_v5  ;;  %v1824_v28 = vmul.f32 %v4844_v23, %v5228_v41 }
  0x95   : > { %v1825_v8 = vmul.f32 %v4844_v23, %v5230_v6  ;;  %v2769_v11 = vld [vmem:[#allocation3 + $0x20] sm:$0xff]  ;;  %v1615_v17 = vsel %vm1033_vm4, %v1613_v9, %v1614_v3  ;;  %v2068_v46 = vmul.f32 %v4855_v44, %v5218_v5  ;;  %v2069_v16 = vmul.f32 %v4855_v44, %v5228_v41 }
  0x96   : > { %v1617_v63 = vsel %vm1033_vm4, %v1614_v3, %v1616_v43  ;;  %v2770_v49 = vld [vmem:[#allocation3 + $0x28] sm:$0xff]  ;;  %v1713_v40 = vadd.f32 %v1615_v17, %v1468_v58  ;;  %v1927_v61 = vrot.slane %v1823_v51, 1  ;;  %v1928_v52 = vrot.slane %v1824_v28, 1  ;;  %v5276_v51 = vld [vmem:[%s6899_s1 + $0x2] ss:$0 sm:$0xff] }
  0x97   : > { %v1714_v55 = vadd.f32 %v1617_v63, %v1469_v7  ;;  %v2799_v10 = vpack.c.bf16 %v2770_v49, %v2769_v11  ;;  %v1930_v2 = vrot.slane %v1825_v8, 1  ;;  %v2070_v23 = vmul.f32 %v4855_v44, %v5230_v6  ;;  %v5281_v8 = vld [vmem:[%s4661_s16 + $0xc0] sm:$0xff]  ;;  %v5284_v11 = vld [vmem:[%s4661_s16 + $0xc8] sm:$0xff] }
  0x98   : > { %v2172_v29 = vrot.slane %v2068_v46, 2  ;;  %v1782_v13 = vadd.f32 %v1750_v39, %v1713_v40  ;;  %v1929_v56 = vsel %vm787_vm3, %v1927_v61, %v1928_v52  ;;  %v2173_v15 = vrot.slane %v2069_v16, 2  ;;  %v5264_v39 = vld [vmem:[%s6899_s1 + $0x1] ss:$0 sm:$0xff]  ;;  %6915 = vst [vmem:[#allocation4_spill] sm:$0xff] %v5284_v11  ;;  %555 = vst.msk [vmem:[#allocation2 + $0x139] sm:$0xff] %vm474_vm1, %v5281_v8 }
  0x99   : > { %v1783_v12 = vadd.f32 %v1751_v62, %v1714_v55  ;;  %4198 = vmatprep.mubr.msk.bf16.mxu0 %vm474_vm1, %v2799_v10  ;;  %v1931_v4 = vsel %vm787_vm3, %v1928_v52, %v1930_v2  ;;  %v2175_v35 = vrot.slane %v2070_v23, 2  ;;  %v632_v44 = vmul.f32 %v5254_v48, %v5125_v53  ;;  %556 = vst.msk [vmem:[#allocation2 + $0x141] sm:$0xff] %vm474_vm1, %v5284_v11 }
  0x9a   : > { %v633_v57 = vmul.f32 %v5254_v48, %v5133_v50  ;;  %v2027_v9 = vadd.f32 %v1929_v56, %v1782_v13  ;;  %v2174_v36 = vsel %vm1033_vm4, %v2172_v29, %v2173_v15  ;;  %v706_v58 = vmul.f32 %v5264_v39, %v5125_v53 }
  0x9b   : > { %v2028_v47 = vadd.f32 %v1931_v4, %v1783_v12  ;;  %v2176_v3 = vsel %vm1033_vm4, %v2173_v15, %v2175_v35  ;;  %v707_v43 = vmul.f32 %v5264_v39, %v5133_v50  ;;  %v708_v62 = vmul.f32 %v5264_v39, %v5137_v27 }
  0x9c   : > { %v4284_v7 = vpop.eup %4283  ;;  %v952_v28 = vmul.f32 %v5276_v51, %v5125_v53  ;;  %v2272_v46 = vadd.f32 %v2174_v36, %v2027_v9  ;;  %v813_v49 = vrot.slane %v706_v58, 1  ;;  %v953_v53 = vmul.f32 %v5276_v51, %v5133_v50 }
  0x9d   : > { %v4286_v17 = vpop.eup %4285  ;;  %v2565_v63 = vadd.f32 1.0, %v4284_v7  ;;  %v2273_v16 = vadd.f32 %v2176_v3, %v2028_v47  ;;  %v814_v55 = vrot.slane %v707_v43, 1  ;;  %v816_v61 = vrot.slane %v708_v62, 1  ;;  %v5311_v43 = vld [vmem:[%s6899_s1 + $0x3] ss:$0 sm:$0xff] }
  0x9e   : > { %v2566_v40 = vadd.f32 1.0, %v4286_v17  ;;  %v2311_v10 = vadd.f32 %v4899_v42, %v2272_v46  ;;  %v954_v23 = vmul.f32 %v5276_v51, %v5137_v27  ;;  %v1059_v56 = vrot.slane %v952_v28, 2 }
  0x9f   : > { %v2597_v52 = vmul.f32 %v2565_v63, %v5181_v20  ;;  %v2312_v2 = vadd.f32 %v4899_v42, %v2273_v16  ;;  %v815_v13 = vsel %vm787_vm3, %v813_v49, %v814_v55  ;;  %v817_v12 = vsel %vm787_vm3, %v814_v55, %v816_v61  ;;  %v5325_v61 = vld [vmem:[%s6899_s1 + $0x4] ss:$0 sm:$0xff] }
  0xa0   : > { %v2598_v29 = vmul.f32 %v2566_v40, %v5185_v59  ;;  %v5301_v4 = vmul.f32 0.5, %v2311_v10  ;;  %v2375_v20 = vmul.f32 0.044715, %v2311_v10  ;;  %v910_v9 = vadd.f32 %v815_v13, %v632_v44 }
  0xa1   : > { %v2636_v15 = vmul.f32 %v5011_v14, %v2597_v52  ;;  %v5303_v50 = vmul.f32 0.5, %v2312_v2  ;;  %v2376_v42 = vmul.f32 0.044715, %v2312_v2  ;;  %v911_v47 = vadd.f32 %v817_v12, %v633_v57 }
  0xa2   : > { %v2637_v35 = vmul.f32 %v5011_v14, %v2598_v29  ;;  %v2407_v59 = vmul.f32 %v2375_v20, %v2311_v10  ;;  %v1060_v36 = vrot.slane %v953_v53, 2  ;;  %v1062_v58 = vrot.slane %v954_v23, 2 }
  0xa3   : > { %v2675_v27 = vadd.f32 %v5020_v54, %v2636_v15  ;;  %v2408_v3 = vmul.f32 %v2376_v42, %v2312_v2  ;;  %v1193_v62 = vmul.f32 %v5311_v43, %v5218_v5  ;;  %v1194_v44 = vmul.f32 %v5311_v43, %v5228_v41  ;;  %v5341_v42 = vld [vmem:[#allocation2 + $0xa8] sm:$0xff] }
  0xa4   : > { %v2676_v7 = vadd.f32 %v5020_v54, %v2637_v35  ;;  %v2439_v28 = vmul.f32 %v2407_v59, %v2311_v10  ;;  %v1061_v17 = vsel %vm1033_vm4, %v1059_v56, %v1060_v36  ;;  %v1063_v63 = vsel %vm1033_vm4, %v1060_v36, %v1062_v58  ;;  %v5352_v36 = vld [vmem:[%s6899_s1 + $0x6] ss:$0 sm:$0xff] }
  0xa5   : > { %v2707_v57 = vadd.f32 %v2675_v27, %v4712_v18  ;;  %v2440_v16 = vmul.f32 %v2408_v3, %v2312_v2  ;;  %v1156_v49 = vadd.f32 %v1061_v17, %v910_v9  ;;  %v1157_v40 = vadd.f32 %v1063_v63, %v911_v47  ;;  %v5365_v63 = vld [vmem:[%s6899_s1 + $0x7] ss:$0 sm:$0xff] }
  0xa6   : > { %v2708_v46 = vadd.f32 %v2676_v7, %v4715_v19  ;;  %v2471_v55 = vadd.f32 %v2439_v28, %v2311_v10  ;;  %v1267_v18 = vmul.f32 %v5325_v61, %v5218_v5  ;;  %v1268_v53 = vmul.f32 %v5325_v61, %v5228_v41  ;;  %v5337_v10 = vld [vmem:[%s6899_s1 + $0x5] ss:$0 sm:$0xff]  ;;  %v5356_v7 = vld [vmem:[#allocation2 + $0xb0] sm:$0xff] }
  0xa7   : > { %2739 = vst.msk [vmem:[#allocation3 + $0x30] sm:$0xff] %vm474_vm1, %v2707_v57  ;;  %v1269_v19 = vmul.f32 %v5325_v61, %v5230_v6  ;;  %v2472_v52 = vadd.f32 %v2440_v16, %v2312_v2  ;;  %v1225_v23 = vadd.f32 %v1193_v62, %v1156_v49  ;;  %v1226_v29 = vadd.f32 %v1194_v44, %v1157_v40  ;;  %v5358_v57 = vld [vmem:[#allocation2 + $0xb8] sm:$0x3] }
  0xa8   : > { %2740 = vst.msk [vmem:[#allocation3 + $0x38] sm:$0xff] %vm474_vm1, %v2708_v46  ;;  %v1512_v13 = vmul.f32 %v5337_v10, %v5218_v5  ;;  %v2503_v12 = vmul.f32 0.7978846, %v2471_v55  ;;  %v1373_v56 = vrot.slane %v1267_v18, 1  ;;  %v1374_v15 = vrot.slane %v1268_v53, 1 }
  0xa9   : > { %v1376_v20 = vrot.slane %v1269_v19, 1  ;;  %v2504_v35 = vmul.f32 0.7978846, %v2472_v52  ;;  %v1513_v2 = vmul.f32 %v5337_v10, %v5228_v41  ;;  %v1514_v9 = vmul.f32 %v5337_v10, %v5230_v6  ;;  %v5377_v18 = vld [vmem:[%s6899_s1 + $0x8] ss:$0 sm:$0xff] }
  0xaa   : > { %v1618_v47 = vrot.slane %v1512_v13, 2  ;;  %4287 = vtanh.f32 %v2503_v12  ;;  %v1375_v27 = vsel %vm787_vm3, %v1373_v56, %v1374_v15  ;;  %v1752_v58 = vmul.f32 %v5352_v36, %v5341_v42 }
  0xab   : > { %v1377_v59 = vsel %vm787_vm3, %v1374_v15, %v1376_v20  ;;  %4289 = vtanh.f32 %v2504_v35  ;;  %v1470_v3 = vadd.f32 %v1375_v27, %v1225_v23  ;;  %v1619_v44 = vrot.slane %v1513_v2, 2 }
  0xac   : > { %v1471_v62 = vadd.f32 %v1377_v59, %v1226_v29  ;;  %v1621_v28 = vrot.slane %v1514_v9, 2  ;;  %v1753_v17 = vmul.f32 %v5352_v36, %v5356_v7  ;;  %v1826_v46 = vmul.f32 %v5365_v63, %v5341_v42 }
  0xad   : > { %v1827_v16 = vmul.f32 %v5365_v63, %v5356_v7  ;;  %v1620_v40 = vsel %vm1033_vm4, %v1618_v47, %v1619_v44  ;;  %v1828_v55 = vmul.f32 %v5365_v63, %v5358_v57  ;;  %v2071_v53 = vmul.f32 %v5377_v18, %v5341_v42 }
  0xae   : > { %v2771_v49 = vld [vmem:[#allocation3 + $0x30] sm:$0xff]  ;;  %v2072_v19 = vmul.f32 %v5377_v18, %v5356_v7  ;;  %v1622_v23 = vsel %vm1033_vm4, %v1619_v44, %v1621_v28  ;;  %v1715_v29 = vadd.f32 %v1620_v40, %v1470_v3  ;;  %v1932_v13 = vrot.slane %v1826_v46, 1 }
  0xaf   : > { %v2772_v52 = vld [vmem:[#allocation3 + $0x38] sm:$0xff]  ;;  %v1933_v12 = vrot.slane %v1827_v16, 1  ;;  %v1716_v15 = vadd.f32 %v1622_v23, %v1471_v62  ;;  %v1935_v20 = vrot.slane %v1828_v55, 1  ;;  %v2073_v35 = vmul.f32 %v5377_v18, %v5358_v57 }
  0xb0   : > { %v2800_v56 = vpack.c.bf16 %v2772_v52, %v2771_v49  ;;  %v1784_v2 = vadd.f32 %v1752_v58, %v1715_v29  ;;  %v2177_v47 = vrot.slane %v2071_v53, 2  ;;  %v2178_v27 = vrot.slane %v2072_v19, 2 }
  0xb1   : > { %v1934_v9 = vsel %vm787_vm3, %v1932_v13, %v1933_v12  ;;  %v1785_v59 = vadd.f32 %v1753_v17, %v1716_v15  ;;  %v1936_v11 = vsel %vm787_vm3, %v1933_v12, %v1935_v20  ;;  %v2180_v44 = vrot.slane %v2073_v35, 2  ;;  %v5408_v20 = vld [vmem:[%s6900_s2] ss:$0 sm:$0xff] }
  0xb2   : > { %4199 = vmatmul.mubr.msk.bf16.gmra.mrb[4].mxu0 %vm474_vm1, %v2800_v56  ;;  %v634_v3 = vmul.f32 %v5254_v48, %v5218_v5  ;;  %v2029_v28 = vadd.f32 %v1934_v9, %v1784_v2  ;;  %v2179_v62 = vsel %vm1033_vm4, %v2177_v47, %v2178_v27  ;;  %v635_v46 = vmul.f32 %v5254_v48, %v5228_v41 }
  0xb3   : > { %v709_v58 = vmul.f32 %v5264_v39, %v5218_v5  ;;  %v2030_v16 = vadd.f32 %v1936_v11, %v1785_v59  ;;  %v2181_v49 = vsel %vm1033_vm4, %v2178_v27, %v2180_v44  ;;  %v710_v17 = vmul.f32 %v5264_v39, %v5228_v41 }
  0xb4   : > { %v711_v40 = vmul.f32 %v5264_v39, %v5230_v6  ;;  %v4288_v55 = vpop.eup %4287  ;;  %v2274_v53 = vadd.f32 %v2179_v62, %v2029_v28  ;;  %v955_v52 = vmul.f32 %v5276_v51, %v5218_v5  ;;  %v956_v23 = vmul.f32 %v5276_v51, %v5228_v41 }
  0xb5   : > { %v818_v19 = vrot.slane %v709_v58, 1  ;;  %v4290_v29 = vpop.eup %4289  ;;  %v2567_v13 = vadd.f32 1.0, %v4288_v55  ;;  %v2275_v11 = vadd.f32 %v2181_v49, %v2030_v16  ;;  %v819_v12 = vrot.slane %v710_v17, 1  ;;  %v5421_v58 = vld [vmem:[%s4661_s16 + $0xd0] sm:$0xff]  ;;  %v5424_v16 = vld [vmem:[%s4661_s16 + $0xd8] sm:$0xff] }
  0xb6   : > { %v821_v56 = vrot.slane %v711_v40, 1  ;;  %v2568_v15 = vadd.f32 1.0, %v4290_v29  ;;  %v2313_v35 = vadd.f32 %v5408_v20, %v2274_v53  ;;  %v957_v5 = vmul.f32 %v5276_v51, %v5230_v6  ;;  %557 = vst.msk [vmem:[#allocation2 + $0x151] sm:$0xff] %vm474_vm1, %v5421_v58  ;;  %558 = vst.msk [vmem:[#allocation2 + $0x159] sm:$0xff] %vm474_vm1, %v5424_v16 }
  0xb7   : > { %v1064_v2 = vrot.slane %v955_v52, 2  ;;  %v2599_v41 = vmul.f32 %v2567_v13, %v5301_v4  ;;  %v2314_v9 = vadd.f32 %v5408_v20, %v2275_v11  ;;  %v820_v47 = vsel %vm787_vm3, %v818_v19, %v819_v12 }
  0xb8   : > { %v822_v27 = vsel %vm787_vm3, %v819_v12, %v821_v56  ;;  %v2600_v59 = vmul.f32 %v2568_v15, %v5303_v50  ;;  %v5418_v44 = vmul.f32 0.5, %v2313_v35  ;;  %v2377_v28 = vmul.f32 0.044715, %v2313_v35 }
  0xb9   : > { %v912_v62 = vadd.f32 %v820_v47, %v634_v3  ;;  %v2638_v6 = vmul.f32 %v5011_v14, %v2599_v41  ;;  %v5427_v49 = vmul.f32 0.5, %v2314_v9  ;;  %v2378_v4 = vmul.f32 0.044715, %v2314_v9 }
  0xba   : > { %v913_v17 = vadd.f32 %v822_v27, %v635_v46  ;;  %v2639_v50 = vmul.f32 %v5011_v14, %v2600_v59  ;;  %v2409_v40 = vmul.f32 %v2377_v28, %v2313_v35  ;;  %v1065_v3 = vrot.slane %v956_v23, 2 }
  0xbb   : > { %v1067_v55 = vrot.slane %v957_v5, 2  ;;  %v2677_v53 = vadd.f32 %v5020_v54, %v2638_v6  ;;  %v2410_v19 = vmul.f32 %v2378_v4, %v2314_v9  ;;  %v1195_v52 = vmul.f32 %v5311_v43, %v5341_v42  ;;  %v5454_v4 = vld [vmem:[#allocation2 + $0xc0] sm:$0xff] }
  0xbc   : > { %v1196_v46 = vmul.f32 %v5311_v43, %v5356_v7  ;;  %v2678_v29 = vadd.f32 %v5020_v54, %v2639_v50  ;;  %v2441_v13 = vmul.f32 %v2409_v40, %v2313_v35  ;;  %v1066_v11 = vsel %vm1033_vm4, %v1064_v2, %v1065_v3 }
  0xbd   : > { %v1068_v12 = vsel %vm1033_vm4, %v1065_v3, %v1067_v55  ;;  %v2709_v14 = vadd.f32 %v2677_v53, %v4726_v24  ;;  %v2442_v23 = vmul.f32 %v2410_v19, %v2314_v9  ;;  %v1158_v56 = vadd.f32 %v1066_v11, %v912_v62  ;;  %v5463_v53 = vld [vmem:[#allocation2 + $0xc8] sm:$0xff] }
  0xbe   : > { %v1159_v15 = vadd.f32 %v1068_v12, %v913_v17  ;;  %v2710_v5 = vadd.f32 %v2678_v29, %v4729_v25  ;;  %v2473_v41 = vadd.f32 %v2441_v13, %v2313_v35  ;;  %v1270_v47 = vmul.f32 %v5325_v61, %v5341_v42  ;;  %v5466_v29 = vld [vmem:[#allocation2 + $0xd0] sm:$0x3] }
  0xbf   : > { %v1271_v27 = vmul.f32 %v5325_v61, %v5356_v7  ;;  %2741 = vst.msk [vmem:[#allocation3 + $0x40] sm:$0xff] %vm474_vm1, %v2709_v14  ;;  %v2474_v54 = vadd.f32 %v2442_v23, %v2314_v9  ;;  %v1227_v2 = vadd.f32 %v1195_v52, %v1158_v56  ;;  %v1272_v24 = vmul.f32 %v5325_v61, %v5358_v57 }
  0xc0   : > { %v1228_v59 = vadd.f32 %v1196_v46, %v1159_v15  ;;  %2742 = vst.msk [vmem:[#allocation3 + $0x48] sm:$0xff] %vm474_vm1, %v2710_v5  ;;  %v2505_v28 = vmul.f32 0.7978846, %v2473_v41  ;;  %v1378_v62 = vrot.slane %v1270_v47, 1  ;;  %v1515_v35 = vmul.f32 %v5337_v10, %v5341_v42 }
  0xc1   : > { %v1379_v25 = vrot.slane %v1271_v27, 1  ;;  %v2506_v6 = vmul.f32 0.7978846, %v2474_v54  ;;  %v1381_v17 = vrot.slane %v1272_v24, 1  ;;  %v1516_v9 = vmul.f32 %v5337_v10, %v5356_v7 }
  0xc2   : > { %v1517_v50 = vmul.f32 %v5337_v10, %v5358_v57  ;;  %4291 = vtanh.f32 %v2505_v28  ;;  %v1623_v3 = vrot.slane %v1515_v35, 2  ;;  %v1754_v55 = vmul.f32 %v5352_v36, %v5454_v4 }
  0xc3   : > { %v1380_v40 = vsel %vm787_vm3, %v1378_v62, %v1379_v25  ;;  %4293 = vtanh.f32 %v2506_v6  ;;  %v1382_v19 = vsel %vm787_vm3, %v1379_v25, %v1381_v17  ;;  %v1624_v46 = vrot.slane %v1516_v9, 2 }
  0xc4   : > { %v1472_v52 = vadd.f32 %v1380_v40, %v1227_v2  ;;  %v1473_v13 = vadd.f32 %v1382_v19, %v1228_v59  ;;  %v1626_v11 = vrot.slane %v1517_v50, 2  ;;  %v1755_v12 = vmul.f32 %v5352_v36, %v5463_v53 }
  0xc5   : > { %v1829_v14 = vmul.f32 %v5365_v63, %v5454_v4  ;;  %v1625_v23 = vsel %vm1033_vm4, %v1623_v3, %v1624_v46  ;;  %v1830_v56 = vmul.f32 %v5365_v63, %v5463_v53  ;;  %v1831_v15 = vmul.f32 %v5365_v63, %v5466_v29 }
  0xc6   : > { %v2074_v5 = vmul.f32 %v5377_v18, %v5454_v4  ;;  %v2773_v41 = vld [vmem:[#allocation3 + $0x40] sm:$0xff]  ;;  %v1627_v47 = vsel %vm1033_vm4, %v1624_v46, %v1626_v11  ;;  %v1717_v27 = vadd.f32 %v1625_v23, %v1472_v52  ;;  %v2075_v2 = vmul.f32 %v5377_v18, %v5463_v53 }
  0xc7   : > { %v1937_v54 = vrot.slane %v1829_v14, 1  ;;  %v2774_v59 = vld [vmem:[#allocation3 + $0x48] sm:$0xff]  ;;  %v1718_v24 = vadd.f32 %v1627_v47, %v1473_v13  ;;  %v1938_v28 = vrot.slane %v1830_v56, 1  ;;  %v1940_v62 = vrot.slane %v1831_v15, 1 }
  0xc8   : > { %v2076_v25 = vmul.f32 %v5377_v18, %v5466_v29  ;;  %v2801_v35 = vpack.c.bf16 %v2774_v59, %v2773_v41  ;;  %v1786_v6 = vadd.f32 %v1754_v55, %v1717_v27  ;;  %v2182_v17 = vrot.slane %v2074_v5, 2  ;;  %v5504_v27 = vld [vmem:[%s4661_s16 + $0xe0] sm:$0xff] }
  0xc9   : > { %v2183_v9 = vrot.slane %v2075_v2, 2  ;;  %v1787_v50 = vadd.f32 %v1755_v12, %v1718_v24  ;;  %v1939_v40 = vsel %vm787_vm3, %v1937_v54, %v1938_v28  ;;  %v1941_v3 = vsel %vm787_vm3, %v1938_v28, %v1940_v62  ;;  %v5507_v54 = vld [vmem:[%s4661_s16 + $0xe8] sm:$0xff]  ;;  %559 = vst.msk [vmem:[#allocation2 + $0x169] sm:$0xff] %vm474_vm1, %v5504_v27 }
  0xca   : > { %v2185_v19 = vrot.slane %v2076_v25, 2  ;;  %4202 = vmatprep.mubr.msk.bf16.mxu0 %vm474_vm1, %v2801_v35  ;;  %v2031_v52 = vadd.f32 %v1939_v40, %v1786_v6  ;;  %v636_v13 = vmul.f32 %v5254_v48, %v5341_v42  ;;  %v637_v55 = vmul.f32 %v5254_v48, %v5356_v7  ;;  %560 = vst.msk [vmem:[#allocation2 + $0x171] sm:$0xff] %vm474_vm1, %v5507_v54 }
  0xcb   : > { %v2184_v46 = vsel %vm1033_vm4, %v2182_v17, %v2183_v9  ;;  %v2032_v11 = vadd.f32 %v1941_v3, %v1787_v50  ;;  %v712_v14 = vmul.f32 %v5264_v39, %v5341_v42  ;;  %v713_v23 = vmul.f32 %v5264_v39, %v5356_v7 }
  0xcc   : > { %v2186_v12 = vsel %vm1033_vm4, %v2183_v9, %v2185_v19  ;;  %v4292_v56 = vpop.eup %4291  ;;  %v2276_v15 = vadd.f32 %v2184_v46, %v2031_v52  ;;  %v714_v5 = vmul.f32 %v5264_v39, %v5358_v57  ;;  %v958_v41 = vmul.f32 %v5276_v51, %v5341_v42  ;;  %v5526_v46 = vld [vmem:[%s6901_s3] ss:$0 sm:$0xff] }
  0xcd   : > { %v959_v47 = vmul.f32 %v5276_v51, %v5356_v7  ;;  %v4294_v2 = vpop.eup %4293  ;;  %v2569_v59 = vadd.f32 1.0, %v4292_v56  ;;  %v2277_v24 = vadd.f32 %v2186_v12, %v2032_v11  ;;  %v823_v28 = vrot.slane %v712_v14, 1 }
  0xce   : > { %v824_v62 = vrot.slane %v713_v23, 1  ;;  %v2570_v25 = vadd.f32 1.0, %v4294_v2  ;;  %v2315_v42 = vadd.f32 %v5408_v20, %v2276_v15  ;;  %v826_v35 = vrot.slane %v714_v5, 1  ;;  %v5535_v15 = vld [vmem:[%s6902_s4] ss:$0 sm:$0xff] }
  0xcf   : > { %v960_v7 = vmul.f32 %v5276_v51, %v5358_v57  ;;  %v2601_v6 = vmul.f32 %v2569_v59, %v5418_v44  ;;  %v2316_v17 = vadd.f32 %v5408_v20, %v2277_v24  ;;  %v1069_v50 = vrot.slane %v958_v41, 2 }
  0xd0   : > { %v825_v9 = vsel %vm787_vm3, %v823_v28, %v824_v62  ;;  %v2602_v40 = vmul.f32 %v2570_v25, %v5427_v49  ;;  %v5520_v3 = vmul.f32 0.5, %v2315_v42  ;;  %v2379_v19 = vmul.f32 0.044715, %v2315_v42 }
  0xd1   : > { %v827_v52 = vsel %vm787_vm3, %v824_v62, %v826_v35  ;;  %v2640_v57 = vmul.f32 %v5526_v46, %v2601_v6  ;;  %v5529_v44 = vmul.f32 0.5, %v2316_v17  ;;  %v2380_v11 = vmul.f32 0.044715, %v2316_v17 }
  0xd2   : > { %v914_v12 = vadd.f32 %v825_v9, %v636_v13  ;;  %v2641_v14 = vmul.f32 %v5526_v46, %v2602_v40  ;;  %v2411_v23 = vmul.f32 %v2379_v19, %v2315_v42  ;;  %v915_v49 = vadd.f32 %v827_v52, %v637_v55 }
  0xd3   : > { %v1070_v56 = vrot.slane %v959_v47, 2  ;;  %v2679_v5 = vadd.f32 %v5535_v15, %v2640_v57  ;;  %v2412_v41 = vmul.f32 %v2380_v11, %v2316_v17  ;;  %v1072_v2 = vrot.slane %v960_v7, 2 }
  0xd4   : > { %v1197_v59 = vmul.f32 %v5311_v43, %v5454_v4  ;;  %v2680_v24 = vadd.f32 %v5535_v15, %v2641_v14  ;;  %v2443_v13 = vmul.f32 %v2411_v23, %v2315_v42  ;;  %v1198_v55 = vmul.f32 %v5311_v43, %v5463_v53  ;;  %v5557_v14 = vld [vmem:[#allocation2 + $0xd8] sm:$0xff] }
  0xd5   : > { %v1071_v28 = vsel %vm1033_vm4, %v1069_v50, %v1070_v56  ;;  %v2711_v47 = vadd.f32 %v2679_v5, %v4732_v26  ;;  %v2444_v62 = vmul.f32 %v2412_v41, %v2316_v17  ;;  %v1073_v25 = vsel %vm1033_vm4, %v1070_v56, %v1072_v2  ;;  %v5565_v2 = vld [vmem:[#allocation2 + $0xe0] sm:$0xff] }
  0xd6   : > { %v1160_v35 = vadd.f32 %v1071_v28, %v914_v12  ;;  %v2712_v6 = vadd.f32 %v2680_v24, %v4740_v30  ;;  %v2475_v7 = vadd.f32 %v2443_v13, %v2315_v42  ;;  %v1161_v9 = vadd.f32 %v1073_v25, %v915_v49  ;;  %v5569_v28 = vld [vmem:[#allocation2 + $0xe8] sm:$0x3] }
  0xd7   : > { %v1273_v40 = vmul.f32 %v5325_v61, %v5454_v4  ;;  %2743 = vst.msk [vmem:[#allocation3 + $0x50] sm:$0xff] %vm474_vm1, %v2711_v47  ;;  %v2476_v19 = vadd.f32 %v2444_v62, %v2316_v17  ;;  %v1274_v52 = vmul.f32 %v5325_v61, %v5463_v53  ;;  %v1275_v26 = vmul.f32 %v5325_v61, %v5466_v29 }
  0xd8   : > { %v1229_v50 = vadd.f32 %v1197_v59, %v1160_v35  ;;  %2744 = vst.msk [vmem:[#allocation3 + $0x58] sm:$0xff] %vm474_vm1, %v2712_v6  ;;  %v2507_v57 = vmul.f32 0.7978846, %v2475_v7  ;;  %v1230_v11 = vadd.f32 %v1198_v55, %v1161_v9  ;;  %v1518_v42 = vmul.f32 %v5337_v10, %v5454_v4 }
  0xd9   : > { %v1383_v30 = vrot.slane %v1273_v40, 1  ;;  %v2508_v12 = vmul.f32 0.7978846, %v2476_v19  ;;  %v1384_v23 = vrot.slane %v1274_v52, 1  ;;  %v1386_v17 = vrot.slane %v1275_v26, 1 }
  0xda   : > { %v1519_v49 = vmul.f32 %v5337_v10, %v5463_v53  ;;  %4295 = vtanh.f32 %v2507_v57  ;;  %v1520_v56 = vmul.f32 %v5337_v10, %v5466_v29  ;;  %v1628_v5 = vrot.slane %v1518_v42, 2 }
  0xdb   : > { %v1756_v41 = vmul.f32 %v5352_v36, %v5557_v14  ;;  %4297 = vtanh.f32 %v2508_v12  ;;  %v1385_v59 = vsel %vm787_vm3, %v1383_v30, %v1384_v23  ;;  %v1387_v24 = vsel %vm787_vm3, %v1384_v23, %v1386_v17 }
  0xdc   : > { %v1629_v13 = vrot.slane %v1519_v49, 2  ;;  %v1474_v55 = vadd.f32 %v1385_v59, %v1229_v50  ;;  %v1475_v47 = vadd.f32 %v1387_v24, %v1230_v11  ;;  %v1631_v62 = vrot.slane %v1520_v56, 2 }
  0xdd   : > { %v1757_v25 = vmul.f32 %v5352_v36, %v5565_v2  ;;  %v1832_v6 = vmul.f32 %v5365_v63, %v5557_v14  ;;  %v1833_v7 = vmul.f32 %v5365_v63, %v5565_v2  ;;  %v1834_v9 = vmul.f32 %v5365_v63, %v5569_v28 }
  0xde   : > { %v1630_v35 = vsel %vm1033_vm4, %v1628_v5, %v1629_v13  ;;  %v2775_v40 = vld [vmem:[#allocation3 + $0x50] sm:$0xff]  ;;  %v1632_v19 = vsel %vm1033_vm4, %v1629_v13, %v1631_v62  ;;  %v2077_v52 = vmul.f32 %v5377_v18, %v5557_v14  ;;  %v2078_v26 = vmul.f32 %v5377_v18, %v5565_v2 }
  0xdf   : > { %v1719_v50 = vadd.f32 %v1630_v35, %v1474_v55  ;;  %v2776_v57 = vld [vmem:[#allocation3 + $0x58] sm:$0xff]  ;;  %v1720_v11 = vadd.f32 %v1632_v19, %v1475_v47  ;;  %v1942_v30 = vrot.slane %v1832_v6, 1  ;;  %v1943_v42 = vrot.slane %v1833_v7, 1 }
  0xe0   : > { %v1945_v12 = vrot.slane %v1834_v9, 1  ;;  %v2802_v23 = vpack.c.bf16 %v2776_v57, %v2775_v40  ;;  %v2079_v49 = vmul.f32 %v5377_v18, %v5569_v28  ;;  %v2187_v56 = vrot.slane %v2077_v52, 2 }
  0xe1   : > { %v1788_v17 = vadd.f32 %v1756_v41, %v1719_v50  ;;  %v1789_v5 = vadd.f32 %v1757_v25, %v1720_v11  ;;  %v1944_v59 = vsel %vm787_vm3, %v1942_v30, %v1943_v42  ;;  %v2188_v13 = vrot.slane %v2078_v26, 2 }
  0xe2   : > { %v1946_v24 = vsel %vm787_vm3, %v1943_v42, %v1945_v12  ;;  %4203 = vmatmul.mubr.msk.bf16.gmra.mrb[8].mxu0 %vm474_vm1, %v2802_v23  ;;  %v2190_v62 = vrot.slane %v2079_v49, 2  ;;  %v638_v47 = vmul.f32 %v5254_v48, %v5454_v4  ;;  %v639_v41 = vmul.f32 %v5254_v48, %v5463_v53 }
  0xe3   : > { %v2033_v55 = vadd.f32 %v1944_v59, %v1788_v17  ;;  %v2034_v35 = vadd.f32 %v1946_v24, %v1789_v5  ;;  %v2189_v6 = vsel %vm1033_vm4, %v2187_v56, %v2188_v13  ;;  %v715_v25 = vmul.f32 %v5264_v39, %v5454_v4 }
  0xe4   : > { %v716_v7 = vmul.f32 %v5264_v39, %v5463_v53  ;;  %v4296_v9 = vpop.eup %4295  ;;  %v2191_v40 = vsel %vm1033_vm4, %v2188_v13, %v2190_v62  ;;  %v717_v50 = vmul.f32 %v5264_v39, %v5466_v29  ;;  %v961_v52 = vmul.f32 %v5276_v51, %v5454_v4 }
  0xe5   : > { %v2278_v19 = vadd.f32 %v2189_v6, %v2033_v55  ;;  %v4298_v26 = vpop.eup %4297  ;;  %v2571_v57 = vadd.f32 1.0, %v4296_v9  ;;  %v2279_v11 = vadd.f32 %v2191_v40, %v2034_v35  ;;  %v828_v30 = vrot.slane %v715_v25, 1  ;;  %v5620_v25 = vld [vmem:[%s4661_s16 + $0xf0] sm:$0xff] }
  0xe6   : > { %v829_v42 = vrot.slane %v716_v7, 1  ;;  %v2572_v12 = vadd.f32 1.0, %v4298_v26  ;;  %v831_v17 = vrot.slane %v717_v50, 1  ;;  %v962_v49 = vmul.f32 %v5276_v51, %v5463_v53  ;;  %v5623_v7 = vld [vmem:[%s4661_s16 + $0xf8] sm:$0xff]  ;;  %561 = vst.msk [vmem:[#allocation2 + $0x181] sm:$0xff] %vm474_vm1, %v5620_v25 }
  0xe7   : > { %v2317_v23 = vadd.f32 %v5408_v20, %v2278_v19  ;;  %v2603_v56 = vmul.f32 %v2571_v57, %v5520_v3  ;;  %v2318_v5 = vadd.f32 %v5408_v20, %v2279_v11  ;;  %v963_v59 = vmul.f32 %v5276_v51, %v5466_v29  ;;  %562 = vst.msk [vmem:[#allocation2 + $0x189] sm:$0xff] %vm474_vm1, %v5623_v7 }
  0xe8   : > { %v830_v4 = vsel %vm787_vm3, %v828_v30, %v829_v42  ;;  %v2604_v24 = vmul.f32 %v2572_v12, %v5529_v44  ;;  %v832_v62 = vsel %vm787_vm3, %v829_v42, %v831_v17  ;;  %v1074_v44 = vrot.slane %v961_v52, 2 }
  0xe9   : > { %v5613_v13 = vmul.f32 0.5, %v2317_v23  ;;  %v2381_v55 = vmul.f32 0.044715, %v2317_v23  ;;  %v2642_v35 = vmul.f32 %v5526_v46, %v2603_v56  ;;  %v5617_v6 = vmul.f32 0.5, %v2318_v5 }
  0xea   : > { %v2382_v53 = vmul.f32 0.044715, %v2318_v5  ;;  %v916_v3 = vadd.f32 %v830_v4, %v638_v47  ;;  %v2643_v9 = vmul.f32 %v5526_v46, %v2604_v24  ;;  %v917_v40 = vadd.f32 %v832_v62, %v639_v41 }
  0xeb   : > { %v2413_v29 = vmul.f32 %v2381_v55, %v2317_v23  ;;  %v2681_v19 = vadd.f32 %v5535_v15, %v2642_v35  ;;  %v1075_v26 = vrot.slane %v962_v49, 2  ;;  %v1077_v47 = vrot.slane %v963_v59, 2 }
  0xec   : > { %v2414_v50 = vmul.f32 %v2382_v53, %v2318_v5  ;;  %v2682_v57 = vadd.f32 %v5535_v15, %v2643_v9  ;;  %v1199_v30 = vmul.f32 %v5311_v43, %v5557_v14  ;;  %v1200_v41 = vmul.f32 %v5311_v43, %v5565_v2 }
  0xed   : > { %v2445_v11 = vmul.f32 %v2413_v29, %v2317_v23  ;;  %v2713_v52 = vadd.f32 %v2681_v19, %v4745_v31  ;;  %v1076_v12 = vsel %vm1033_vm4, %v1074_v44, %v1075_v26  ;;  %v1078_v17 = vsel %vm1033_vm4, %v1075_v26, %v1077_v47 }
  0xee   : > { %v2446_v42 = vmul.f32 %v2414_v50, %v2318_v5  ;;  %v2714_v56 = vadd.f32 %v2682_v57, %v4748_v32  ;;  %v1162_v4 = vadd.f32 %v1076_v12, %v916_v3  ;;  %v1163_v59 = vadd.f32 %v1078_v17, %v917_v40  ;;  %v5650_v40 = vld [vmem:[#allocation2 + $0xf0] sm:$0xff] }
  0xef   : > { %v2477_v49 = vadd.f32 %v2445_v11, %v2317_v23  ;;  %2745 = vst.msk [vmem:[#allocation3 + $0x60] sm:$0xff] %vm474_vm1, %v2713_v52  ;;  %v1276_v55 = vmul.f32 %v5325_v61, %v5557_v14  ;;  %v1277_v62 = vmul.f32 %v5325_v61, %v5565_v2  ;;  %v1278_v31 = vmul.f32 %v5325_v61, %v5569_v28  ;;  %v5660_v11 = vld [vmem:[#allocation2 + $0xf8] sm:$0xff] }
  0xf0   : > { %v2478_v24 = vadd.f32 %v2446_v42, %v2318_v5  ;;  %2746 = vst.msk [vmem:[#allocation3 + $0x68] sm:$0xff] %vm474_vm1, %v2714_v56  ;;  %v1231_v53 = vadd.f32 %v1199_v30, %v1162_v4  ;;  %v1232_v32 = vadd.f32 %v1200_v41, %v1163_v59  ;;  %v1521_v23 = vmul.f32 %v5337_v10, %v5557_v14  ;;  %v5662_v30 = vld [vmem:[#allocation2 + $0x100] sm:$0x3] }
  0xf1   : > { %v2509_v35 = vmul.f32 0.7978846, %v2477_v49  ;;  %v1388_v9 = vrot.slane %v1276_v55, 1  ;;  %v1389_v5 = vrot.slane %v1277_v62, 1  ;;  %v1391_v29 = vrot.slane %v1278_v31, 1 }
  0xf2   : > { %v2510_v3 = vmul.f32 0.7978846, %v2478_v24  ;;  %v1522_v44 = vmul.f32 %v5337_v10, %v5565_v2  ;;  %v1523_v19 = vmul.f32 %v5337_v10, %v5569_v28  ;;  %v1633_v50 = vrot.slane %v1521_v23, 2 }
  0xf3   : > { %4299 = vtanh.f32 %v2509_v35  ;;  %v1390_v26 = vsel %vm787_vm3, %v1388_v9, %v1389_v5  ;;  %v1392_v47 = vsel %vm787_vm3, %v1389_v5, %v1391_v29  ;;  %v1758_v57 = vmul.f32 %v5352_v36, %v5650_v40 }
  0xf4   : > { %4301 = vtanh.f32 %v2510_v3  ;;  %v1476_v41 = vadd.f32 %v1390_v26, %v1231_v53  ;;  %v1477_v52 = vadd.f32 %v1392_v47, %v1232_v32  ;;  %v1634_v42 = vrot.slane %v1522_v44, 2 }
  0xf5   : > { %v1636_v12 = vrot.slane %v1523_v19, 2  ;;  %v1759_v17 = vmul.f32 %v5352_v36, %v5660_v11  ;;  %v1835_v56 = vmul.f32 %v5365_v63, %v5650_v40  ;;  %v1836_v49 = vmul.f32 %v5365_v63, %v5660_v11 }
  0xf6   : > { %v1837_v4 = vmul.f32 %v5365_v63, %v5662_v30  ;;  %v2777_v59 = vld [vmem:[#allocation3 + $0x60] sm:$0xff]  ;;  %v1635_v24 = vsel %vm1033_vm4, %v1633_v50, %v1634_v42  ;;  %v2080_v62 = vmul.f32 %v5377_v18, %v5650_v40  ;;  %v2081_v31 = vmul.f32 %v5377_v18, %v5660_v11 }
  0xf7   : > { %v1637_v55 = vsel %vm1033_vm4, %v1634_v42, %v1636_v12  ;;  %v2778_v35 = vld [vmem:[#allocation3 + $0x68] sm:$0xff]  ;;  %v1721_v53 = vadd.f32 %v1635_v24, %v1476_v41  ;;  %v1947_v23 = vrot.slane %v1835_v56, 1  ;;  %v1948_v3 = vrot.slane %v1836_v49, 1 }
  0xf8   : > { %v1722_v32 = vadd.f32 %v1637_v55, %v1477_v52  ;;  %v2803_v9 = vpack.c.bf16 %v2778_v35, %v2777_v59  ;;  %v1950_v5 = vrot.slane %v1837_v4, 1  ;;  %v2082_v29 = vmul.f32 %v5377_v18, %v5662_v30 }
  0xf9   : > { %v2192_v44 = vrot.slane %v2080_v62, 2  ;;  %v1790_v19 = vadd.f32 %v1758_v57, %v1721_v53  ;;  %v1949_v26 = vsel %vm787_vm3, %v1947_v23, %v1948_v3  ;;  %v2193_v47 = vrot.slane %v2081_v31, 2 }
  0xfa   : > { %v1791_v50 = vadd.f32 %v1759_v17, %v1722_v32  ;;  %4206 = vmatprep.mubr.msk.bf16.mxu0 %vm474_vm1, %v2803_v9  ;;  %v1951_v42 = vsel %vm787_vm3, %v1948_v3, %v1950_v5  ;;  %v2195_v12 = vrot.slane %v2082_v29, 2  ;;  %v640_v41 = vmul.f32 %v5254_v48, %v5557_v14 }
  0xfb   : > { %v641_v52 = vmul.f32 %v5254_v48, %v5565_v2  ;;  %v2035_v56 = vadd.f32 %v1949_v26, %v1790_v19  ;;  %v2194_v4 = vsel %vm1033_vm4, %v2192_v44, %v2193_v47  ;;  %v718_v57 = vmul.f32 %v5264_v39, %v5557_v14 }
  0xfc   : > { %v2036_v49 = vadd.f32 %v1951_v42, %v1791_v50  ;;  %v2196_v59 = vsel %vm1033_vm4, %v2193_v47, %v2195_v12  ;;  %v719_v24 = vmul.f32 %v5264_v39, %v5565_v2  ;;  %v720_v55 = vmul.f32 %v5264_v39, %v5569_v28 }
  0xfd   : > { %v4300_v17 = vpop.eup %4299  ;;  %v964_v62 = vmul.f32 %v5276_v51, %v5557_v14  ;;  %v2280_v35 = vadd.f32 %v2194_v4, %v2035_v56  ;;  %v833_v32 = vrot.slane %v718_v57, 1  ;;  %v965_v5 = vmul.f32 %v5276_v51, %v5565_v2 }
  0xfe   : > { %v4302_v48 = vpop.eup %4301  ;;  %v2573_v31 = vadd.f32 1.0, %v4300_v17  ;;  %v2281_v53 = vadd.f32 %v2196_v59, %v2036_v49  ;;  %v834_v3 = vrot.slane %v719_v24, 1  ;;  %v836_v9 = vrot.slane %v720_v55, 1 }
  0xff   : > { %v2574_v23 = vadd.f32 1.0, %v4302_v48  ;;  %v2319_v44 = vadd.f32 %v5408_v20, %v2280_v35  ;;  %v966_v14 = vmul.f32 %v5276_v51, %v5569_v28  ;;  %v1079_v47 = vrot.slane %v964_v62, 2 }
 0x100   : > { %v2605_v29 = vmul.f32 %v2573_v31, %v5613_v13  ;;  %v2320_v39 = vadd.f32 %v5408_v20, %v2281_v53  ;;  %v835_v50 = vsel %vm787_vm3, %v833_v32, %v834_v3  ;;  %v837_v26 = vsel %vm787_vm3, %v834_v3, %v836_v9 }
 0x101   : > { %v2606_v19 = vmul.f32 %v2574_v23, %v5617_v6  ;;  %v5708_v12 = vmul.f32 0.5, %v2319_v44  ;;  %v2383_v13 = vmul.f32 0.044715, %v2319_v44  ;;  %v918_v4 = vadd.f32 %v835_v50, %v640_v41 }
 0x102   : > { %v2644_v42 = vmul.f32 %v5526_v46, %v2605_v29  ;;  %v5710_v2 = vmul.f32 0.5, %v2320_v39  ;;  %v2384_v49 = vmul.f32 0.044715, %v2320_v39  ;;  %v919_v57 = vadd.f32 %v837_v26, %v641_v52 }
 0x103   : > { %v2645_v56 = vmul.f32 %v5526_v46, %v2606_v19  ;;  %v2415_v28 = vmul.f32 %v2383_v13, %v2319_v44  ;;  %v1080_v6 = vrot.slane %v965_v5, 2  ;;  %v1082_v17 = vrot.slane %v966_v14, 2 }
 0x104   : > { %v2683_v51 = vadd.f32 %v5535_v15, %v2644_v42  ;;  %v2416_v24 = vmul.f32 %v2384_v49, %v2320_v39  ;;  %v1201_v55 = vmul.f32 %v5311_v43, %v5650_v40  ;;  %v1202_v62 = vmul.f32 %v5311_v43, %v5660_v11  ;;  %v5733_v42 = vld [vmem:[#allocation2 + $0x108] sm:$0xff] }
 0x105   : > { %v2684_v59 = vadd.f32 %v5535_v15, %v2645_v56  ;;  %v2447_v31 = vmul.f32 %v2415_v28, %v2319_v44  ;;  %v1081_v41 = vsel %vm1033_vm4, %v1079_v47, %v1080_v6  ;;  %v1083_v52 = vsel %vm1033_vm4, %v1080_v6, %v1082_v17  ;;  %v5745_v17 = vld [vmem:[#allocation2 + $0x118] sm:$0x3] }
 0x106   : > { %v2715_v48 = vadd.f32 %v2683_v51, %v4757_v37  ;;  %v2448_v53 = vmul.f32 %v2416_v24, %v2320_v39  ;;  %v1164_v32 = vadd.f32 %v1081_v41, %v918_v4  ;;  %v1165_v23 = vadd.f32 %v1083_v52, %v919_v57  ;;  %v5743_v57 = vld [vmem:[#allocation2 + $0x110] sm:$0xff] }
 0x107   : > { %v2716_v35 = vadd.f32 %v2684_v59, %v4760_v38  ;;  %v2479_v3 = vadd.f32 %v2447_v31, %v2319_v44  ;;  %v1279_v9 = vmul.f32 %v5325_v61, %v5650_v40  ;;  %v1280_v43 = vmul.f32 %v5325_v61, %v5660_v11 }
 0x108   : > { %2747 = vst.msk [vmem:[#allocation3 + $0x70] sm:$0xff] %vm474_vm1, %v2715_v48  ;;  %v1281_v37 = vmul.f32 %v5325_v61, %v5662_v30  ;;  %v2480_v5 = vadd.f32 %v2448_v53, %v2320_v39  ;;  %v1233_v29 = vadd.f32 %v1201_v55, %v1164_v32  ;;  %v1234_v38 = vadd.f32 %v1202_v62, %v1165_v23 }
 0x109   : > { %2748 = vst.msk [vmem:[#allocation3 + $0x78] sm:$0xff] %vm474_vm1, %v2716_v35  ;;  %v1524_v14 = vmul.f32 %v5337_v10, %v5650_v40  ;;  %v2511_v19 = vmul.f32 0.7978846, %v2479_v3  ;;  %v1393_v50 = vrot.slane %v1279_v9, 1  ;;  %v1394_v44 = vrot.slane %v1280_v43, 1 }
 0x10a   : > { %v1396_v26 = vrot.slane %v1281_v37, 1  ;;  %v2512_v47 = vmul.f32 0.7978846, %v2480_v5  ;;  %v1525_v13 = vmul.f32 %v5337_v10, %v5660_v11  ;;  %v1526_v61 = vmul.f32 %v5337_v10, %v5662_v30 }
 0x10b   : > { %v1638_v56 = vrot.slane %v1524_v14, 2  ;;  %4303 = vtanh.f32 %v2511_v19  ;;  %v1395_v39 = vsel %vm787_vm3, %v1393_v50, %v1394_v44  ;;  %v1760_v4 = vmul.f32 %v5352_v36, %v5733_v42 }
 0x10c   : > { %v1397_v49 = vsel %vm787_vm3, %v1394_v44, %v1396_v26  ;;  %4305 = vtanh.f32 %v2512_v47  ;;  %v1478_v51 = vadd.f32 %v1395_v39, %v1233_v29  ;;  %v1639_v6 = vrot.slane %v1525_v13, 2  ;;  %v5769_v44 = vld [vmem:[%s6899_s1] ss:$0 sm:$0xff] }
 0x10d   : > { %v1479_v28 = vadd.f32 %v1397_v49, %v1234_v38  ;;  %v1641_v59 = vrot.slane %v1526_v61, 2  ;;  %v1761_v10 = vmul.f32 %v5352_v36, %v5743_v57  ;;  %v1838_v24 = vmul.f32 %v5365_v63, %v5733_v42  ;;  %v5779_v61 = vld [vmem:[%s6899_s1 + $0x1] ss:$0 sm:$0xff] }
 0x10e   : > { %v1839_v55 = vmul.f32 %v5365_v63, %v5743_v57  ;;  %v1640_v48 = vsel %vm1033_vm4, %v1638_v56, %v1639_v6  ;;  %v1840_v31 = vmul.f32 %v5365_v63, %v5745_v17  ;;  %v2083_v41 = vmul.f32 %v5377_v18, %v5733_v42 }
 0x10f   : > { %v2779_v62 = vld [vmem:[#allocation3 + $0x70] sm:$0xff]  ;;  %v2084_v52 = vmul.f32 %v5377_v18, %v5743_v57  ;;  %v1642_v36 = vsel %vm1033_vm4, %v1639_v6, %v1641_v59  ;;  %v1723_v53 = vadd.f32 %v1640_v48, %v1478_v51  ;;  %v1952_v32 = vrot.slane %v1838_v24, 1 }
 0x110   : > { %v2780_v35 = vld [vmem:[#allocation3 + $0x78] sm:$0xff]  ;;  %v1953_v23 = vrot.slane %v1839_v55, 1  ;;  %v1724_v9 = vadd.f32 %v1642_v36, %v1479_v28  ;;  %v1955_v43 = vrot.slane %v1840_v31, 1  ;;  %v2085_v37 = vmul.f32 %v5377_v18, %v5745_v17 }
 0x111   : > { %v2804_v3 = vpack.c.bf16 %v2780_v35, %v2779_v62  ;;  %v1792_v5 = vadd.f32 %v1760_v4, %v1723_v53  ;;  %v2197_v29 = vrot.slane %v2083_v41, 2  ;;  %v2198_v38 = vrot.slane %v2084_v52, 2 }
 0x112   : > { %v1954_v63 = vsel %vm787_vm3, %v1952_v32, %v1953_v23  ;;  %v1793_v14 = vadd.f32 %v1761_v10, %v1724_v9  ;;  %v1956_v19 = vsel %vm787_vm3, %v1953_v23, %v1955_v43  ;;  %v2200_v50 = vrot.slane %v2085_v37, 2  ;;  %v5791_v10 = vld [vmem:[%s6899_s1 + $0x2] ss:$0 sm:$0xff] }
 0x113   : > { %4207 = vmatmul.mubr.msk.bf16.gmra.mrb[12].mxu0 %vm474_vm1, %v2804_v3  ;;  %v642_v26 = vmul.f32 %v5769_v44, %v5650_v40  ;;  %v2037_v18 = vadd.f32 %v1954_v63, %v1792_v5  ;;  %v2199_v47 = vsel %vm1033_vm4, %v2197_v29, %v2198_v38  ;;  %v643_v13 = vmul.f32 %v5769_v44, %v5660_v11 }
 0x114   : > { %v721_v56 = vmul.f32 %v5779_v61, %v5650_v40  ;;  %v2038_v39 = vadd.f32 %v1956_v19, %v1793_v14  ;;  %v2201_v49 = vsel %vm1033_vm4, %v2198_v38, %v2200_v50  ;;  %v722_v4 = vmul.f32 %v5779_v61, %v5660_v11 }
 0x115   : > { %v723_v51 = vmul.f32 %v5779_v61, %v5662_v30  ;;  %v4304_v28 = vpop.eup %4303  ;;  %v2282_v6 = vadd.f32 %v2199_v47, %v2037_v18  ;;  %v967_v24 = vmul.f32 %v5791_v10, %v5650_v40  ;;  %v968_v55 = vmul.f32 %v5791_v10, %v5660_v11 }
 0x116   : > { %v838_v59 = vrot.slane %v721_v56, 1  ;;  %v4306_v62 = vpop.eup %4305  ;;  %v2575_v48 = vadd.f32 1.0, %v4304_v28  ;;  %v2283_v31 = vadd.f32 %v2201_v49, %v2038_v39  ;;  %v839_v41 = vrot.slane %v722_v4, 1 }
 0x117   : > { %v841_v52 = vrot.slane %v723_v51, 1  ;;  %v2576_v35 = vadd.f32 1.0, %v4306_v62  ;;  %v2321_v36 = vadd.f32 %v5408_v20, %v2282_v6  ;;  %v969_v53 = vmul.f32 %v5791_v10, %v5662_v30 }
 0x118   : > { %v1084_v32 = vrot.slane %v967_v24, 2  ;;  %v2607_v23 = vmul.f32 %v2575_v48, %v5708_v12  ;;  %v2322_v3 = vadd.f32 %v5408_v20, %v2283_v31  ;;  %v840_v40 = vsel %vm787_vm3, %v838_v59, %v839_v41 }
 0x119   : > { %v842_v11 = vsel %vm787_vm3, %v839_v41, %v841_v52  ;;  %v2608_v9 = vmul.f32 %v2576_v35, %v5710_v2  ;;  %v5805_v43 = vmul.f32 0.5, %v2321_v36  ;;  %v2385_v37 = vmul.f32 0.044715, %v2321_v36  ;;  %v5815_v2 = vld [vmem:[%s6899_s1 + $0x3] ss:$0 sm:$0xff] }
 0x11a   : > { %v920_v5 = vadd.f32 %v840_v40, %v642_v26  ;;  %v2646_v63 = vmul.f32 %v5526_v46, %v2607_v23  ;;  %v5808_v29 = vmul.f32 0.5, %v2322_v3  ;;  %v2386_v30 = vmul.f32 0.044715, %v2322_v3 }
 0x11b   : > { %v921_v38 = vadd.f32 %v842_v11, %v643_v13  ;;  %v2647_v12 = vmul.f32 %v5526_v46, %v2608_v9  ;;  %v2417_v14 = vmul.f32 %v2385_v37, %v2321_v36  ;;  %v1085_v20 = vrot.slane %v968_v55, 2  ;;  %v5829_v55 = vld [vmem:[%s6899_s1 + $0x4] ss:$0 sm:$0xff] }
 0x11c   : > { %v1087_v19 = vrot.slane %v969_v53, 2  ;;  %v2685_v50 = vadd.f32 %v5535_v15, %v2646_v63  ;;  %v2418_v18 = vmul.f32 %v2386_v30, %v2322_v3  ;;  %v1203_v26 = vmul.f32 %v5815_v2, %v5733_v42  ;;  %v5842_v53 = vld [vmem:[%s6899_s1 + $0x5] ss:$0 sm:$0xff]  ;;  %v5856_v63 = vld [vmem:[%s6899_s1 + $0x6] ss:$0 sm:$0xff] }
 0x11d   : > { %v1204_v47 = vmul.f32 %v5815_v2, %v5743_v57  ;;  %v2686_v13 = vadd.f32 %v5535_v15, %v2647_v12  ;;  %v2449_v56 = vmul.f32 %v2417_v14, %v2321_v36  ;;  %v1086_v39 = vsel %vm1033_vm4, %v1084_v32, %v1085_v20 }
 0x11e   : > { %v1088_v49 = vsel %vm1033_vm4, %v1085_v20, %v1087_v19  ;;  %v2717_v4 = vadd.f32 %v2685_v50, %v4872_v21  ;;  %v2450_v51 = vmul.f32 %v2418_v18, %v2322_v3  ;;  %v1166_v28 = vadd.f32 %v1086_v39, %v920_v5  ;;  %v5863_v19 = vld [vmem:[#allocation2 + $0x130] sm:$0x3] }
 0x11f   : > { %v1167_v6 = vadd.f32 %v1088_v49, %v921_v38  ;;  %v2718_v59 = vadd.f32 %v2686_v13, %v4875_v22  ;;  %v2481_v24 = vadd.f32 %v2449_v56, %v2321_v36  ;;  %v1282_v62 = vmul.f32 %v5829_v55, %v5733_v42  ;;  %v5860_v38 = vld [vmem:[#allocation2 + $0x128] sm:$0xff] }
 0x120   : > { %v1283_v48 = vmul.f32 %v5829_v55, %v5743_v57  ;;  %2749 = vst.msk [vmem:[#allocation3 + $0x80] sm:$0xff] %vm474_vm1, %v2717_v4  ;;  %v2482_v21 = vadd.f32 %v2450_v51, %v2322_v3  ;;  %v1235_v31 = vadd.f32 %v1203_v26, %v1166_v28  ;;  %v1284_v22 = vmul.f32 %v5829_v55, %v5745_v17  ;;  %v5846_v3 = vld [vmem:[#allocation2 + $0x120] sm:$0xff]  ;;  %v5882_v4 = vld [vmem:[%s6899_s1 + $0x8] ss:$0 sm:$0xff] }
 0x121   : > { %v1236_v41 = vadd.f32 %v1204_v47, %v1167_v6  ;;  %2750 = vst.msk [vmem:[#allocation3 + $0x88] sm:$0xff] %vm474_vm1, %v2718_v59  ;;  %v2513_v52 = vmul.f32 0.7978846, %v2481_v24  ;;  %v1398_v35 = vrot.slane %v1282_v62, 1  ;;  %v1527_v32 = vmul.f32 %v5842_v53, %v5733_v42  ;;  %v5870_v47 = vld [vmem:[%s6899_s1 + $0x7] ss:$0 sm:$0xff] }
 0x122   : > { %v1399_v36 = vrot.slane %v1283_v48, 1  ;;  %v2514_v23 = vmul.f32 0.7978846, %v2482_v21  ;;  %v1401_v40 = vrot.slane %v1284_v22, 1  ;;  %v1528_v11 = vmul.f32 %v5842_v53, %v5743_v57 }
 0x123   : > { %v1529_v9 = vmul.f32 %v5842_v53, %v5745_v17  ;;  %4307 = vtanh.f32 %v2513_v52  ;;  %v1643_v5 = vrot.slane %v1527_v32, 2  ;;  %v1762_v30 = vmul.f32 %v5856_v63, %v5846_v3 }
 0x124   : > { %v1400_v37 = vsel %vm787_vm3, %v1398_v35, %v1399_v36  ;;  %4309 = vtanh.f32 %v2514_v23  ;;  %v1402_v12 = vsel %vm787_vm3, %v1399_v36, %v1401_v40  ;;  %v1644_v20 = vrot.slane %v1528_v11, 2 }
 0x125   : > { %v1480_v14 = vadd.f32 %v1400_v37, %v1235_v31  ;;  %v1481_v50 = vadd.f32 %v1402_v12, %v1236_v41  ;;  %v1646_v18 = vrot.slane %v1529_v9, 2  ;;  %v1763_v26 = vmul.f32 %v5856_v63, %v5860_v38 }
 0x126   : > { %v1841_v13 = vmul.f32 %v5870_v47, %v5846_v3  ;;  %v1645_v56 = vsel %vm1033_vm4, %v1643_v5, %v1644_v20  ;;  %v1842_v39 = vmul.f32 %v5870_v47, %v5860_v38  ;;  %v1843_v49 = vmul.f32 %v5870_v47, %v5863_v19 }
 0x127   : > { %v2086_v51 = vmul.f32 %v5882_v4, %v5846_v3  ;;  %v2781_v28 = vld [vmem:[#allocation3 + $0x80] sm:$0xff]  ;;  %v1647_v6 = vsel %vm1033_vm4, %v1644_v20, %v1646_v18  ;;  %v1725_v59 = vadd.f32 %v1645_v56, %v1480_v14  ;;  %v2087_v62 = vmul.f32 %v5882_v4, %v5860_v38 }
 0x128   : > { %v1957_v24 = vrot.slane %v1841_v13, 1  ;;  %v2782_v48 = vld [vmem:[#allocation3 + $0x88] sm:$0xff]  ;;  %v1726_v21 = vadd.f32 %v1647_v6, %v1481_v50  ;;  %v1958_v31 = vrot.slane %v1842_v39, 1  ;;  %v1960_v41 = vrot.slane %v1843_v49, 1 }
 0x129   : > { %v2088_v22 = vmul.f32 %v5882_v4, %v5863_v19  ;;  %v2805_v52 = vpack.c.bf16 %v2782_v48, %v2781_v28  ;;  %v1794_v35 = vadd.f32 %v1762_v30, %v1725_v59  ;;  %v2202_v36 = vrot.slane %v2086_v51, 2  ;;  %v5913_v48 = vld [vmem:[%s6900_s2] ss:$0 sm:$0xff] }
 0x12a   : > { %v2203_v32 = vrot.slane %v2087_v62, 2  ;;  %v1795_v23 = vadd.f32 %v1763_v26, %v1726_v21  ;;  %v1959_v40 = vsel %vm787_vm3, %v1957_v24, %v1958_v31  ;;  %v1961_v11 = vsel %vm787_vm3, %v1958_v31, %v1960_v41 }
 0x12b   : > { %v2205_v9 = vrot.slane %v2088_v22, 2  ;;  %4210 = vmatprep.mubr.msk.bf16.mxu0 %vm474_vm1, %v2805_v52  ;;  %v2039_v37 = vadd.f32 %v1959_v40, %v1794_v35  ;;  %v644_v12 = vmul.f32 %v5769_v44, %v5733_v42  ;;  %v645_v14 = vmul.f32 %v5769_v44, %v5743_v57 }
 0x12c   : > { %v2204_v5 = vsel %vm1033_vm4, %v2202_v36, %v2203_v32  ;;  %v2040_v30 = vadd.f32 %v1961_v11, %v1795_v23  ;;  %v724_v50 = vmul.f32 %v5779_v61, %v5733_v42  ;;  %v725_v18 = vmul.f32 %v5779_v61, %v5743_v57 }
 0x12d   : > { %v2206_v20 = vsel %vm1033_vm4, %v2203_v32, %v2205_v9  ;;  %v4308_v26 = vpop.eup %4307  ;;  %v2284_v13 = vadd.f32 %v2204_v5, %v2039_v37  ;;  %v726_v56 = vmul.f32 %v5779_v61, %v5745_v17  ;;  %v970_v39 = vmul.f32 %v5791_v10, %v5733_v42 }
 0x12e   : > { %v971_v49 = vmul.f32 %v5791_v10, %v5743_v57  ;;  %v4310_v51 = vpop.eup %4309  ;;  %v2577_v28 = vadd.f32 1.0, %v4308_v26  ;;  %v2285_v6 = vadd.f32 %v2206_v20, %v2040_v30  ;;  %v843_v59 = vrot.slane %v724_v50, 1 }
 0x12f   : > { %v844_v24 = vrot.slane %v725_v18, 1  ;;  %v2578_v62 = vadd.f32 1.0, %v4310_v51  ;;  %v2323_v21 = vadd.f32 %v5913_v48, %v2284_v13  ;;  %v846_v31 = vrot.slane %v726_v56, 1 }
 0x130   : > { %v972_v42 = vmul.f32 %v5791_v10, %v5745_v17  ;;  %v2609_v41 = vmul.f32 %v2577_v28, %v5805_v43  ;;  %v2324_v57 = vadd.f32 %v5913_v48, %v2285_v6  ;;  %v1089_v52 = vrot.slane %v970_v39, 2 }
 0x131   : > { %v845_v22 = vsel %vm787_vm3, %v843_v59, %v844_v24  ;;  %v2610_v35 = vmul.f32 %v2578_v62, %v5808_v29  ;;  %v5922_v36 = vmul.f32 0.5, %v2323_v21  ;;  %v2387_v32 = vmul.f32 0.044715, %v2323_v21 }
 0x132   : > { %v847_v23 = vsel %vm787_vm3, %v844_v24, %v846_v31  ;;  %v2648_v40 = vmul.f32 %v5526_v46, %v2609_v41  ;;  %v5926_v11 = vmul.f32 0.5, %v2324_v57  ;;  %v2388_v9 = vmul.f32 0.044715, %v2324_v57 }
 0x133   : > { %v922_v17 = vadd.f32 %v845_v22, %v644_v12  ;;  %v2649_v43 = vmul.f32 %v5526_v46, %v2610_v35  ;;  %v2419_v37 = vmul.f32 %v2387_v32, %v2323_v21  ;;  %v923_v5 = vadd.f32 %v847_v23, %v645_v14  ;;  %v5949_v22 = vld [vmem:[#allocation2 + $0x138] sm:$0xff] }
 0x134   : > { %v1090_v30 = vrot.slane %v971_v49, 2  ;;  %v2687_v20 = vadd.f32 %v5535_v15, %v2648_v40  ;;  %v2420_v50 = vmul.f32 %v2388_v9, %v2324_v57  ;;  %v1092_v29 = vrot.slane %v972_v42, 2  ;;  %v5957_v9 = vld [vmem:[#allocation2 + $0x140] sm:$0xff] }
 0x135   : > { %v1205_v18 = vmul.f32 %v5815_v2, %v5846_v3  ;;  %v2688_v26 = vadd.f32 %v5535_v15, %v2649_v43  ;;  %v2451_v13 = vmul.f32 %v2419_v37, %v2323_v21  ;;  %v1206_v12 = vmul.f32 %v5815_v2, %v5860_v38 }
 0x136   : > { %v1091_v56 = vsel %vm1033_vm4, %v1089_v52, %v1090_v30  ;;  %v2719_v46 = vadd.f32 %v2687_v20, %v4989_v60  ;;  %v2452_v39 = vmul.f32 %v2420_v50, %v2324_v57  ;;  %v1093_v14 = vsel %vm1033_vm4, %v1090_v30, %v1092_v29 }
 0x137   : > { %v1168_v49 = vadd.f32 %v1091_v56, %v922_v17  ;;  %v2720_v51 = vadd.f32 %v2688_v26, %v4992_v34  ;;  %v2483_v28 = vadd.f32 %v2451_v13, %v2323_v21  ;;  %v1169_v6 = vadd.f32 %v1093_v14, %v923_v5  ;;  %v5961_v5 = vld [vmem:[#allocation2 + $0x148] sm:$0x3] }
 0x138   : > { %v1285_v59 = vmul.f32 %v5829_v55, %v5846_v3  ;;  %2751 = vst.msk [vmem:[#allocation3 + $0x90] sm:$0xff] %vm474_vm1, %v2719_v46  ;;  %v2484_v15 = vadd.f32 %v2452_v39, %v2324_v57  ;;  %v1286_v62 = vmul.f32 %v5829_v55, %v5860_v38  ;;  %v1287_v60 = vmul.f32 %v5829_v55, %v5863_v19 }
 0x139   : > { %v1237_v24 = vadd.f32 %v1205_v18, %v1168_v49  ;;  %2752 = vst.msk [vmem:[#allocation3 + $0x98] sm:$0xff] %vm474_vm1, %v2720_v51  ;;  %v2515_v31 = vmul.f32 0.7978846, %v2483_v28  ;;  %v1238_v42 = vadd.f32 %v1206_v12, %v1169_v6  ;;  %v1530_v21 = vmul.f32 %v5842_v53, %v5846_v3 }
 0x13a   : > { %v1403_v34 = vrot.slane %v1285_v59, 1  ;;  %v2516_v41 = vmul.f32 0.7978846, %v2484_v15  ;;  %v1404_v52 = vrot.slane %v1286_v62, 1  ;;  %v1406_v57 = vrot.slane %v1287_v60, 1 }
 0x13b   : > { %v1531_v35 = vmul.f32 %v5842_v53, %v5860_v38  ;;  %4311 = vtanh.f32 %v2515_v31  ;;  %v1532_v32 = vmul.f32 %v5842_v53, %v5863_v19  ;;  %v1648_v23 = vrot.slane %v1530_v21, 2 }
 0x13c   : > { %v1764_v40 = vmul.f32 %v5856_v63, %v5949_v22  ;;  %4313 = vtanh.f32 %v2516_v41  ;;  %v1405_v17 = vsel %vm787_vm3, %v1403_v34, %v1404_v52  ;;  %v1407_v43 = vsel %vm787_vm3, %v1404_v52, %v1406_v57 }
 0x13d   : > { %v1649_v37 = vrot.slane %v1531_v35, 2  ;;  %v1482_v30 = vadd.f32 %v1405_v17, %v1237_v24  ;;  %v1483_v20 = vadd.f32 %v1407_v43, %v1238_v42  ;;  %v1651_v50 = vrot.slane %v1532_v32, 2 }
 0x13e   : > { %v1765_v29 = vmul.f32 %v5856_v63, %v5957_v9  ;;  %v1844_v26 = vmul.f32 %v5870_v47, %v5949_v22  ;;  %v1845_v13 = vmul.f32 %v5870_v47, %v5957_v9  ;;  %v1846_v56 = vmul.f32 %v5870_v47, %v5961_v5 }
 0x13f   : > { %v1650_v18 = vsel %vm1033_vm4, %v1648_v23, %v1649_v37  ;;  %v2783_v12 = vld [vmem:[#allocation3 + $0x90] sm:$0xff]  ;;  %v1652_v46 = vsel %vm1033_vm4, %v1649_v37, %v1651_v50  ;;  %v2089_v14 = vmul.f32 %v5882_v4, %v5949_v22  ;;  %v2090_v49 = vmul.f32 %v5882_v4, %v5957_v9 }
 0x140   : > { %v1727_v39 = vadd.f32 %v1650_v18, %v1482_v30  ;;  %v2784_v51 = vld [vmem:[#allocation3 + $0x98] sm:$0xff]  ;;  %v1728_v28 = vadd.f32 %v1652_v46, %v1483_v20  ;;  %v1962_v6 = vrot.slane %v1844_v26, 1  ;;  %v1963_v59 = vrot.slane %v1845_v13, 1 }
 0x141   : > { %v1965_v15 = vrot.slane %v1846_v56, 1  ;;  %v2806_v24 = vpack.c.bf16 %v2784_v51, %v2783_v12  ;;  %v2091_v60 = vmul.f32 %v5882_v4, %v5961_v5  ;;  %v2207_v31 = vrot.slane %v2089_v14, 2 }
 0x142   : > { %v1796_v62 = vadd.f32 %v1764_v40, %v1727_v39  ;;  %v1797_v42 = vadd.f32 %v1765_v29, %v1728_v28  ;;  %v1964_v34 = vsel %vm787_vm3, %v1962_v6, %v1963_v59  ;;  %v2208_v41 = vrot.slane %v2090_v49, 2 }
 0x143   : > { %v1966_v21 = vsel %vm787_vm3, %v1963_v59, %v1965_v15  ;;  %4211 = vmatmul.mubr.msk.bf16.gmra.mrb[16].mxu0 %vm474_vm1, %v2806_v24  ;;  %v2210_v57 = vrot.slane %v2091_v60, 2  ;;  %v646_v35 = vmul.f32 %v5769_v44, %v5846_v3  ;;  %v647_v32 = vmul.f32 %v5769_v44, %v5860_v38 }
 0x144   : > { %v2041_v52 = vadd.f32 %v1964_v34, %v1796_v62  ;;  %v2042_v23 = vadd.f32 %v1966_v21, %v1797_v42  ;;  %v2209_v40 = vsel %vm1033_vm4, %v2207_v31, %v2208_v41  ;;  %v727_v17 = vmul.f32 %v5779_v61, %v5846_v3 }
 0x145   : > { %v728_v43 = vmul.f32 %v5779_v61, %v5860_v38  ;;  %v4312_v37 = vpop.eup %4311  ;;  %v2211_v30 = vsel %vm1033_vm4, %v2208_v41, %v2210_v57  ;;  %v729_v50 = vmul.f32 %v5779_v61, %v5863_v19  ;;  %v973_v29 = vmul.f32 %v5791_v10, %v5846_v3  ;;  %v6020_v41 = vld [vmem:[%s6902_s4] ss:$0 sm:$0xff] }
 0x146   : > { %v2286_v20 = vadd.f32 %v2209_v40, %v2041_v52  ;;  %v4314_v18 = vpop.eup %4313  ;;  %v2579_v26 = vadd.f32 1.0, %v4312_v37  ;;  %v2287_v13 = vadd.f32 %v2211_v30, %v2042_v23  ;;  %v848_v56 = vrot.slane %v727_v17, 1 }
 0x147   : > { %v849_v12 = vrot.slane %v728_v43, 1  ;;  %v2580_v46 = vadd.f32 1.0, %v4314_v18  ;;  %v851_v14 = vrot.slane %v729_v50, 1  ;;  %v974_v49 = vmul.f32 %v5791_v10, %v5860_v38  ;;  %v6011_v38 = vld [vmem:[%s6901_s3] ss:$0 sm:$0xff] }
 0x148   : > { %v2325_v39 = vadd.f32 %v5913_v48, %v2286_v20  ;;  %v2611_v51 = vmul.f32 %v2579_v26, %v5922_v36  ;;  %v2326_v28 = vadd.f32 %v5913_v48, %v2287_v13  ;;  %v975_v3 = vmul.f32 %v5791_v10, %v5863_v19 }
 0x149   : > { %v850_v6 = vsel %vm787_vm3, %v848_v56, %v849_v12  ;;  %v2612_v59 = vmul.f32 %v2580_v46, %v5926_v11  ;;  %v852_v62 = vsel %vm787_vm3, %v849_v12, %v851_v14  ;;  %v1094_v21 = vrot.slane %v973_v29, 2 }
 0x14a   : > { %v6005_v15 = vmul.f32 0.5, %v2325_v39  ;;  %v2389_v24 = vmul.f32 0.044715, %v2325_v39  ;;  %v2650_v36 = vmul.f32 %v6011_v38, %v2611_v51  ;;  %v6014_v60 = vmul.f32 0.5, %v2326_v28 }
 0x14b   : > { %v2390_v31 = vmul.f32 0.044715, %v2326_v28  ;;  %v924_v42 = vadd.f32 %v850_v6, %v646_v35  ;;  %v2651_v19 = vmul.f32 %v6011_v38, %v2612_v59  ;;  %v925_v11 = vadd.f32 %v852_v62, %v647_v32  ;;  %v6042_v59 = vld [vmem:[#allocation2 + $0x150] sm:$0xff] }
 0x14c   : > { %v2421_v34 = vmul.f32 %v2389_v24, %v2325_v39  ;;  %v2689_v52 = vadd.f32 %v6020_v41, %v2650_v36  ;;  %v1095_v23 = vrot.slane %v974_v49, 2  ;;  %v1097_v40 = vrot.slane %v975_v3, 2 }
 0x14d   : > { %v2422_v57 = vmul.f32 %v2390_v31, %v2326_v28  ;;  %v2690_v17 = vadd.f32 %v6020_v41, %v2651_v19  ;;  %v1207_v35 = vmul.f32 %v5815_v2, %v5949_v22  ;;  %v1208_v32 = vmul.f32 %v5815_v2, %v5957_v9 }
 0x14e   : > { %v2453_v43 = vmul.f32 %v2421_v34, %v2325_v39  ;;  %v2721_v37 = vadd.f32 %v2689_v52, %v5079_v0  ;;  %v1096_v20 = vsel %vm1033_vm4, %v1094_v21, %v1095_v23  ;;  %v1098_v50 = vsel %vm1033_vm4, %v1095_v23, %v1097_v40  ;;  %v6056_v21 = vld [vmem:[#allocation2 + $0x160] sm:$0x3] }
 0x14f   : > { %v2454_v30 = vmul.f32 %v2422_v57, %v2326_v28  ;;  %v2722_v29 = vadd.f32 %v2690_v17, %v5082_v45  ;;  %v1170_v26 = vadd.f32 %v1096_v20, %v924_v42  ;;  %v1171_v13 = vadd.f32 %v1098_v50, %v925_v11  ;;  %v6054_v11 = vld [vmem:[#allocation2 + $0x158] sm:$0xff] }
 0x150   : > { %v2485_v18 = vadd.f32 %v2453_v43, %v2325_v39  ;;  %2753 = vst.msk [vmem:[#allocation3 + $0xa0] sm:$0xff] %vm474_vm1, %v2721_v37  ;;  %v1288_v12 = vmul.f32 %v5829_v55, %v5949_v22  ;;  %v1289_v46 = vmul.f32 %v5829_v55, %v5957_v9  ;;  %v1290_v0 = vmul.f32 %v5829_v55, %v5961_v5 }
 0x151   : > { %v2486_v56 = vadd.f32 %v2454_v30, %v2326_v28  ;;  %2754 = vst.msk [vmem:[#allocation3 + $0xa8] sm:$0xff] %vm474_vm1, %v2722_v29  ;;  %v1239_v49 = vadd.f32 %v1207_v35, %v1170_v26  ;;  %v1240_v45 = vadd.f32 %v1208_v32, %v1171_v13  ;;  %v1533_v39 = vmul.f32 %v5842_v53, %v5949_v22 }
 0x152   : > { %v2517_v14 = vmul.f32 0.7978846, %v2485_v18  ;;  %v1408_v6 = vrot.slane %v1288_v12, 1  ;;  %v1409_v28 = vrot.slane %v1289_v46, 1  ;;  %v1411_v3 = vrot.slane %v1290_v0, 1 }
 0x153   : > { %v2518_v51 = vmul.f32 0.7978846, %v2486_v56  ;;  %v1534_v24 = vmul.f32 %v5842_v53, %v5957_v9  ;;  %v1535_v62 = vmul.f32 %v5842_v53, %v5961_v5  ;;  %v1653_v36 = vrot.slane %v1533_v39, 2 }
 0x154   : > { %4315 = vtanh.f32 %v2517_v14  ;;  %v1410_v31 = vsel %vm787_vm3, %v1408_v6, %v1409_v28  ;;  %v1412_v42 = vsel %vm787_vm3, %v1409_v28, %v1411_v3  ;;  %v1766_v19 = vmul.f32 %v5856_v63, %v6042_v59  ;;  %v6052_v34 = vpop.f32.mrb[0].mxu0 }
 0x155   : > { %4317 = vtanh.f32 %v2518_v51  ;;  %v1484_v52 = vadd.f32 %v1410_v31, %v1239_v49  ;;  %v1485_v57 = vadd.f32 %v1412_v42, %v1240_v45  ;;  %v1654_v23 = vrot.slane %v1534_v24, 2  ;;  %v6058_v17 = vpop.f32.mrb[1].mxu0 }
 0x156   : > { %v1656_v40 = vrot.slane %v1535_v62, 2  ;;  %v1767_v43 = vmul.f32 %v5856_v63, %v6054_v11  ;;  %v1847_v35 = vmul.f32 %v5870_v47, %v6042_v59  ;;  %v1848_v32 = vmul.f32 %v5870_v47, %v6054_v11  ;;  %v6068_v30 = vpop.f32.mrb[2].mxu0 }
 0x157   : > { %v1849_v37 = vmul.f32 %v5870_v47, %v6056_v21  ;;  %v2785_v20 = vld [vmem:[#allocation3 + $0xa0] sm:$0xff]  ;;  %v1655_v50 = vsel %vm1033_vm4, %v1653_v36, %v1654_v23  ;;  %v2092_v18 = vmul.f32 %v5882_v4, %v6042_v59  ;;  %v2093_v26 = vmul.f32 %v5882_v4, %v6054_v11  ;;  %v6076_v13 = vpop.f32.mrb[3].mxu0 }
 0x158   : > { %v1657_v29 = vsel %vm1033_vm4, %v1654_v23, %v1656_v40  ;;  %v2786_v56 = vld [vmem:[#allocation3 + $0xa8] sm:$0xff]  ;;  %v1729_v12 = vadd.f32 %v1655_v50, %v1484_v52  ;;  %v1967_v0 = vrot.slane %v1847_v35, 1  ;;  %v1968_v14 = vrot.slane %v1848_v32, 1 }
 0x159   : > { %v1730_v46 = vadd.f32 %v1657_v29, %v1485_v57  ;;  %v2807_v49 = vpack.c.bf16 %v2786_v56, %v2785_v20  ;;  %v1970_v45 = vrot.slane %v1849_v37, 1  ;;  %v2094_v39 = vmul.f32 %v5882_v4, %v6056_v21 }
 0x15a   : > { %v2212_v51 = vrot.slane %v2092_v18, 2  ;;  %v1798_v6 = vadd.f32 %v1766_v19, %v1729_v12  ;;  %v1969_v3 = vsel %vm787_vm3, %v1967_v0, %v1968_v14  ;;  %v2213_v24 = vrot.slane %v2093_v26, 2 }
 0x15b   : > { %v1799_v28 = vadd.f32 %v1767_v43, %v1730_v46  ;;  %4214 = vmatprep.mubr.msk.bf16.mxu0 %vm474_vm1, %v2807_v49  ;;  %v1971_v62 = vsel %vm787_vm3, %v1968_v14, %v1970_v45  ;;  %v2215_v36 = vrot.slane %v2094_v39, 2  ;;  %v648_v31 = vmul.f32 %v5769_v44, %v5949_v22 }
 0x15c   : > { %v649_v42 = vmul.f32 %v5769_v44, %v5957_v9  ;;  %v2043_v52 = vadd.f32 %v1969_v3, %v1798_v6  ;;  %v2214_v23 = vsel %vm1033_vm4, %v2212_v51, %v2213_v24  ;;  %v730_v19 = vmul.f32 %v5779_v61, %v5949_v22 }
 0x15d   : > { %v2044_v57 = vadd.f32 %v1971_v62, %v1799_v28  ;;  %v2216_v43 = vsel %vm1033_vm4, %v2213_v24, %v2215_v36  ;;  %v731_v35 = vmul.f32 %v5779_v61, %v5957_v9  ;;  %v732_v32 = vmul.f32 %v5779_v61, %v5961_v5 }
 0x15e   : > { %v4316_v40 = vpop.eup %4315  ;;  %v976_v37 = vmul.f32 %v5791_v10, %v5949_v22  ;;  %v2288_v29 = vadd.f32 %v2214_v23, %v2043_v52  ;;  %v853_v26 = vrot.slane %v730_v19, 1  ;;  %v977_v0 = vmul.f32 %v5791_v10, %v5957_v9 }
 0x15f   : > { %v4318_v20 = vpop.eup %4317  ;;  %v2581_v50 = vadd.f32 1.0, %v4316_v40  ;;  %v2289_v18 = vadd.f32 %v2216_v43, %v2044_v57  ;;  %v854_v12 = vrot.slane %v731_v35, 1  ;;  %v856_v46 = vrot.slane %v732_v32, 1 }
 0x160   : > { %v2582_v56 = vadd.f32 1.0, %v4318_v20  ;;  %v2327_v49 = vadd.f32 %v5913_v48, %v2288_v29  ;;  %v978_v22 = vmul.f32 %v5791_v10, %v5961_v5  ;;  %v1209_v43 = vmul.f32 %v5815_v2, %v6042_v59 }
 0x161   : > { %v2613_v14 = vmul.f32 %v2581_v50, %v6005_v15  ;;  %v6102_v45 = vadd.f32 %v5913_v48, %v2289_v18  ;;  %v855_v51 = vsel %vm787_vm3, %v853_v26, %v854_v12  ;;  %v857_v6 = vsel %vm787_vm3, %v854_v12, %v856_v46 }
 0x162   : > { %v2614_v39 = vmul.f32 %v2582_v56, %v6014_v60  ;;  %v6110_v3 = vmul.f32 0.5, %v2327_v49  ;;  %v2391_v9 = vmul.f32 0.044715, %v2327_v49  ;;  %v1099_v15 = vrot.slane %v976_v37, 2 }
 0x163   : > { %v2652_v28 = vmul.f32 %v6011_v38, %v2613_v14  ;;  %v2392_v62 = vmul.f32 0.044715, %v6102_v45  ;;  %v926_v36 = vadd.f32 %v855_v51, %v648_v31  ;;  %v927_v52 = vadd.f32 %v857_v6, %v649_v42 }
 0x164   : > { %v2653_v24 = vmul.f32 %v6011_v38, %v2614_v39  ;;  %v2423_v57 = vmul.f32 %v2391_v9, %v2327_v49  ;;  %v1100_v60 = vrot.slane %v977_v0, 2  ;;  %v1102_v23 = vrot.slane %v978_v22, 2 }
 0x165   : > { %v2691_v5 = vadd.f32 %v6020_v41, %v2652_v28  ;;  %v2424_v40 = vmul.f32 %v2392_v62, %v6102_v45  ;;  %v1210_v35 = vmul.f32 %v5815_v2, %v6054_v11  ;;  %v1291_v56 = vmul.f32 %v5829_v55, %v6042_v59  ;;  %v6137_v28 = vld [vmem:[#allocation2 + $0x168] sm:$0xff] }
 0x166   : > { %v2692_v19 = vadd.f32 %v6020_v41, %v2653_v24  ;;  %v2455_v37 = vmul.f32 %v2423_v57, %v2327_v49  ;;  %v1101_v31 = vsel %vm1033_vm4, %v1099_v15, %v1100_v60  ;;  %v1103_v42 = vsel %vm1033_vm4, %v1100_v60, %v1102_v23 }
 0x167   : > { %v2723_v32 = vadd.f32 %v2691_v5, %v5188_v33  ;;  %v2456_v50 = vmul.f32 %v2424_v40, %v6102_v45  ;;  %v1172_v29 = vadd.f32 %v1101_v31, %v926_v36  ;;  %v1173_v18 = vadd.f32 %v1103_v42, %v927_v52  ;;  %v6147_v5 = vld [vmem:[#allocation2 + $0x170] sm:$0xff] }
 0x168   : > { %v2724_v20 = vadd.f32 %v2692_v19, %v5191_v1  ;;  %v2487_v26 = vadd.f32 %v2455_v37, %v2327_v49  ;;  %v1292_v33 = vmul.f32 %v5829_v55, %v6054_v11  ;;  %v1293_v12 = vmul.f32 %v5829_v55, %v6056_v21  ;;  %v6149_v19 = vld [vmem:[#allocation2 + $0x178] sm:$0x3] }
 0x169   : > { %2755 = vst.msk [vmem:[#allocation3 + $0xb0] sm:$0xff] %vm474_vm1, %v2723_v32  ;;  %v2488_v1 = vadd.f32 %v2456_v50, %v6102_v45  ;;  %v1241_v46 = vadd.f32 %v1209_v43, %v1172_v29  ;;  %v1242_v0 = vadd.f32 %v1210_v35, %v1173_v18  ;;  %v1536_v14 = vmul.f32 %v5842_v53, %v6042_v59 }
 0x16a   : > { %2756 = vst.msk [vmem:[#allocation3 + $0xb8] sm:$0xff] %vm474_vm1, %v2724_v20  ;;  %v2519_v22 = vmul.f32 0.7978846, %v2487_v26  ;;  %v1413_v49 = vrot.slane %v1291_v56, 1  ;;  %v1414_v39 = vrot.slane %v1292_v33, 1  ;;  %v1416_v51 = vrot.slane %v1293_v12, 1 }
 0x16b   : > { %v2520_v6 = vmul.f32 0.7978846, %v2488_v1  ;;  %v1537_v9 = vmul.f32 %v5842_v53, %v6054_v11  ;;  %v1538_v15 = vmul.f32 %v5842_v53, %v6056_v21  ;;  %v1658_v24 = vrot.slane %v1536_v14, 2 }
 0x16c   : > { %4319 = vtanh.f32 %v2519_v22  ;;  %v1415_v62 = vsel %vm787_vm3, %v1413_v49, %v1414_v39  ;;  %v1417_v36 = vsel %vm787_vm3, %v1414_v39, %v1416_v51  ;;  %v1768_v52 = vmul.f32 %v5856_v63, %v6137_v28 }
 0x16d   : > { %4321 = vtanh.f32 %v2520_v6  ;;  %v1486_v57 = vadd.f32 %v1415_v62, %v1241_v46  ;;  %v1487_v60 = vadd.f32 %v1417_v36, %v1242_v0  ;;  %v1659_v23 = vrot.slane %v1537_v9, 2 }
 0x16e   : > { %v1661_v40 = vrot.slane %v1538_v15, 2  ;;  %v1769_v43 = vmul.f32 %v5856_v63, %v6147_v5  ;;  %v1850_v35 = vmul.f32 %v5870_v47, %v6137_v28  ;;  %v1851_v32 = vmul.f32 %v5870_v47, %v6147_v5 }
 0x16f   : > { %v1660_v31 = vsel %vm1033_vm4, %v1658_v24, %v1659_v23  ;;  %v1852_v42 = vmul.f32 %v5870_v47, %v6149_v19  ;;  %v2095_v20 = vmul.f32 %v5882_v4, %v6137_v28  ;;  %v2096_v50 = vmul.f32 %v5882_v4, %v6147_v5 }
 0x170   : > { %v2787_v37 = vld [vmem:[#allocation3 + $0xb0] sm:$0xff]  ;;  %v1662_v18 = vsel %vm1033_vm4, %v1659_v23, %v1661_v40  ;;  %v1731_v26 = vadd.f32 %v1660_v31, %v1486_v57  ;;  %v1972_v56 = vrot.slane %v1850_v35, 1  ;;  %v1973_v33 = vrot.slane %v1851_v32, 1 }
 0x171   : > { %v2788_v29 = vld [vmem:[#allocation3 + $0xb8] sm:$0xff]  ;;  %v1732_v1 = vadd.f32 %v1662_v18, %v1487_v60  ;;  %v1975_v46 = vrot.slane %v1852_v42, 1  ;;  %v2097_v0 = vmul.f32 %v5882_v4, %v6149_v19  ;;  %v2217_v49 = vrot.slane %v2095_v20, 2 }
 0x172   : > { %v2808_v12 = vpack.c.bf16 %v2788_v29, %v2787_v37  ;;  %v1800_v14 = vadd.f32 %v1768_v52, %v1731_v26  ;;  %v1974_v22 = vsel %vm787_vm3, %v1972_v56, %v1973_v33  ;;  %v2218_v39 = vrot.slane %v2096_v50, 2 }
 0x173   : > { %v2360_v51 = vmul.f32 0.5, %v6102_v45  ;;  %v1801_v6 = vadd.f32 %v1769_v43, %v1732_v1  ;;  %v1976_v9 = vsel %vm787_vm3, %v1973_v33, %v1975_v46  ;;  %v2220_v15 = vrot.slane %v2097_v0, 2 }
 0x174   : > { %4215 = vmatmul.mubr.msk.bf16.gmra.mrb[20].mxu0 %vm474_vm1, %v2808_v12  ;;  %v2045_v24 = vadd.f32 %v1974_v22, %v1800_v14  ;;  %v2219_v62 = vsel %vm1033_vm4, %v2217_v49, %v2218_v39  ;;  %v650_v36 = vmul.f32 %v5769_v44, %v6042_v59  ;;  %v733_v52 = vmul.f32 %v5779_v61, %v6042_v59 }
 0x175   : > { %v2046_v57 = vadd.f32 %v1976_v9, %v1801_v6  ;;  %v2221_v60 = vsel %vm1033_vm4, %v2218_v39, %v2220_v15  ;;  %v734_v23 = vmul.f32 %v5779_v61, %v6054_v11  ;;  %v735_v45 = vmul.f32 %v5779_v61, %v6056_v21 }
 0x176   : > { %v4320_v40 = vpop.eup %4319  ;;  %v2290_v43 = vadd.f32 %v2219_v62, %v2045_v24  ;;  %v651_v35 = vmul.f32 %v5769_v44, %v6054_v11  ;;  %v858_v32 = vrot.slane %v733_v52, 1  ;;  %v979_v37 = vmul.f32 %v5791_v10, %v6042_v59 }
 0x177   : > { %v4322_v31 = vpop.eup %4321  ;;  %v2583_v42 = vadd.f32 1.0, %v4320_v40  ;;  %v2291_v20 = vadd.f32 %v2221_v60, %v2046_v57  ;;  %v859_v50 = vrot.slane %v734_v23, 1  ;;  %v861_v29 = vrot.slane %v735_v45, 1 }
 0x178   : > { %v2584_v18 = vadd.f32 1.0, %v4322_v31  ;;  %v2329_v26 = vadd.f32 %v5913_v48, %v2290_v43  ;;  %v980_v61 = vmul.f32 %v5791_v10, %v6054_v11  ;;  %v981_v56 = vmul.f32 %v5791_v10, %v6056_v21  ;;  %v6916_v43 = vld [vmem:[#allocation4_spill] sm:$0xff] }
 0x179   : > { %v2615_v44 = vmul.f32 %v2583_v42, %v6110_v3  ;;  %v6192_v33 = vadd.f32 %v5913_v48, %v2291_v20  ;;  %v860_v59 = vsel %vm787_vm3, %v858_v32, %v859_v50  ;;  %v862_v12 = vsel %vm787_vm3, %v859_v50, %v861_v29 }
 0x17a   : > { %v2616_v1 = vmul.f32 %v2584_v18, %v2360_v51  ;;  %v6196_v46 = vmul.f32 0.5, %v2329_v26  ;;  %v2393_v0 = vmul.f32 0.044715, %v2329_v26  ;;  %v1104_v14 = vrot.slane %v979_v37, 2 }
 0x17b   : > { %v2654_v22 = vmul.f32 %v6011_v38, %v2615_v44  ;;  %v2394_v11 = vmul.f32 0.044715, %v6192_v33  ;;  %v928_v49 = vadd.f32 %v860_v59, %v650_v36  ;;  %v929_v10 = vadd.f32 %v862_v12, %v651_v35 }
 0x17c   : > { %v2655_v21 = vmul.f32 %v6011_v38, %v2616_v1  ;;  %v2425_v3 = vmul.f32 %v2393_v0, %v2329_v26  ;;  %v1105_v39 = vrot.slane %v980_v61, 2  ;;  %v1107_v6 = vrot.slane %v981_v56, 2  ;;  %v6224_v56 = vld [vmem:[#allocation2 + $0x180] sm:$0xff] }
 0x17d   : > { %v2693_v9 = vadd.f32 %v6020_v41, %v2654_v22  ;;  %v2426_v15 = vmul.f32 %v2394_v11, %v6192_v33  ;;  %v1211_v51 = vmul.f32 %v5815_v2, %v6137_v28  ;;  %v1212_v24 = vmul.f32 %v5815_v2, %v6147_v5  ;;  %v6235_v22 = vld [vmem:[#allocation2 + $0x188] sm:$0xff] }
 0x17e   : > { %v2694_v62 = vadd.f32 %v6020_v41, %v2655_v21  ;;  %v2457_v52 = vmul.f32 %v2425_v3, %v2329_v26  ;;  %v1106_v36 = vsel %vm1033_vm4, %v1104_v14, %v1105_v39  ;;  %v1108_v57 = vsel %vm1033_vm4, %v1105_v39, %v1107_v6  ;;  %v6240_v3 = vld [vmem:[#allocation2 + $0x190] sm:$0x3] }
 0x17f   : > { %v2725_v60 = vadd.f32 %v2693_v9, %v5281_v8  ;;  %v2458_v23 = vmul.f32 %v2426_v15, %v6192_v33  ;;  %v1174_v45 = vadd.f32 %v1106_v36, %v928_v49  ;;  %v1175_v40 = vadd.f32 %v1108_v57, %v929_v10 }
 0x180   : > { %v2726_v35 = vadd.f32 %v2694_v62, %v6916_v43  ;;  %v2489_v32 = vadd.f32 %v2457_v52, %v2329_v26  ;;  %v1294_v37 = vmul.f32 %v5829_v55, %v6137_v28  ;;  %v1295_v2 = vmul.f32 %v5829_v55, %v6147_v5 }
 0x181   : > { %2757 = vst.msk [vmem:[#allocation3 + $0xc0] sm:$0xff] %vm474_vm1, %v2725_v60  ;;  %v2490_v31 = vadd.f32 %v2458_v23, %v6192_v33  ;;  %v1243_v42 = vadd.f32 %v1211_v51, %v1174_v45  ;;  %v1244_v20 = vadd.f32 %v1212_v24, %v1175_v40  ;;  %v1296_v8 = vmul.f32 %v5829_v55, %v6149_v19 }
 0x182   : > { %2758 = vst.msk [vmem:[#allocation3 + $0xc8] sm:$0xff] %vm474_vm1, %v2726_v35  ;;  %v2521_v50 = vmul.f32 0.7978846, %v2489_v32  ;;  %v1418_v29 = vrot.slane %v1294_v37, 1  ;;  %v1419_v18 = vrot.slane %v1295_v2, 1  ;;  %v1539_v26 = vmul.f32 %v5842_v53, %v6137_v28 }
 0x183   : > { %v2522_v61 = vmul.f32 0.7978846, %v2490_v31  ;;  %v1421_v44 = vrot.slane %v1296_v8, 1  ;;  %v1540_v59 = vmul.f32 %v5842_v53, %v6147_v5  ;;  %v1541_v12 = vmul.f32 %v5842_v53, %v6149_v19 }
 0x184   : > { %4323 = vtanh.f32 %v2521_v50  ;;  %v1420_v55 = vsel %vm787_vm3, %v1418_v29, %v1419_v18  ;;  %v1663_v1 = vrot.slane %v1539_v26, 2  ;;  %v1770_v0 = vmul.f32 %v5856_v63, %v6224_v56 }
 0x185   : > { %v6233_v14 = vpop.f32.mrb[4].mxu0  ;;  %4325 = vtanh.f32 %v2522_v61  ;;  %v1422_v11 = vsel %vm787_vm3, %v1419_v18, %v1421_v44  ;;  %v1488_v49 = vadd.f32 %v1420_v55, %v1243_v42  ;;  %v1664_v10 = vrot.slane %v1540_v59, 2  ;;  %v4488_v55 = vld [vmem:[%s6899_s1 + $0x1] ss:$0 sm:$0xff] }
 0x186   : > { %v6238_v21 = vpop.f32.mrb[5].mxu0  ;;  %v1489_v53 = vadd.f32 %v1422_v11, %v1244_v20  ;;  %v1666_v39 = vrot.slane %v1541_v12, 2  ;;  %v1771_v6 = vmul.f32 %v5856_v63, %v6235_v22  ;;  %v1853_v9 = vmul.f32 %v5870_v47, %v6224_v56 }
 0x187   : > { %v6246_v15 = vpop.f32.mrb[6].mxu0  ;;  %v1665_v51 = vsel %vm1033_vm4, %v1663_v1, %v1664_v10  ;;  %v1854_v24 = vmul.f32 %v5870_v47, %v6235_v22  ;;  %v1855_v62 = vmul.f32 %v5870_v47, %v6240_v3  ;;  %v2098_v52 = vmul.f32 %v5882_v4, %v6224_v56 }
 0x188   : > { %v6255_v36 = vpop.f32.mrb[7].mxu0  ;;  %v2789_v57 = vld [vmem:[#allocation3 + $0xc0] sm:$0xff]  ;;  %v1667_v63 = vsel %vm1033_vm4, %v1664_v10, %v1666_v39  ;;  %v1733_v60 = vadd.f32 %v1665_v51, %v1488_v49  ;;  %v1977_v23 = vrot.slane %v1853_v9, 1  ;;  %v2099_v45 = vmul.f32 %v5882_v4, %v6235_v22 }
 0x189   : > { %v2790_v40 = vld [vmem:[#allocation3 + $0xc8] sm:$0xff]  ;;  %v1734_v43 = vadd.f32 %v1667_v63, %v1489_v53  ;;  %v1978_v35 = vrot.slane %v1854_v24, 1  ;;  %v1980_v32 = vrot.slane %v1855_v62, 1  ;;  %v2100_v47 = vmul.f32 %v5882_v4, %v6240_v3  ;;  %v4487_v4 = vld [vmem:[%s6899_s1] ss:$0 sm:$0xff] }
 0x18a   : > { %v2809_v37 = vpack.c.bf16 %v2790_v40, %v2789_v57  ;;  %v1802_v2 = vadd.f32 %v1770_v0, %v1733_v60  ;;  %v2222_v31 = vrot.slane %v2098_v52, 2  ;;  %v2223_v42 = vrot.slane %v2099_v45, 2  ;;  %v4489_v53 = vld [vmem:[%s6899_s1 + $0x2] ss:$0 sm:$0xff] }
 0x18b   : > { %v1803_v20 = vadd.f32 %v1771_v6, %v1734_v43  ;;  %v1979_v8 = vsel %vm787_vm3, %v1977_v23, %v1978_v35  ;;  %v1981_v50 = vsel %vm787_vm3, %v1978_v35, %v1980_v32  ;;  %v2225_v29 = vrot.slane %v2100_v47, 2 }
 0x18c   : > { %4218 = vmatprep.mubr.msk.bf16.mxu0 %vm474_vm1, %v2809_v37  ;;  %v2362_v18 = vmul.f32 0.5, %v6192_v33  ;;  %v2047_v26 = vadd.f32 %v1979_v8, %v1802_v2  ;;  %v2224_v61 = vsel %vm1033_vm4, %v2222_v31, %v2223_v42  ;;  %v652_v44 = vmul.f32 %v4487_v4, %v6137_v28 }
 0x18d   : > { %v2048_v59 = vadd.f32 %v1981_v50, %v1803_v20  ;;  %v2226_v12 = vsel %vm1033_vm4, %v2223_v42, %v2225_v29  ;;  %v736_v1 = vmul.f32 %v4488_v55, %v6137_v28  ;;  %v737_v33 = vmul.f32 %v4488_v55, %v6147_v5  ;;  %v4490_v50 = vld [vmem:[%s6899_s1 + $0x3] ss:$0 sm:$0xff] }
 0x18e   : > { %v4324_v0 = vpop.eup %4323  ;;  %v2292_v11 = vadd.f32 %v2224_v61, %v2047_v26  ;;  %v653_v49 = vmul.f32 %v4487_v4, %v6147_v5  ;;  %v738_v10 = vmul.f32 %v4488_v55, %v6149_v19  ;;  %v982_v39 = vmul.f32 %v4489_v53, %v6137_v28 }
 0x18f   : > { %v4326_v6 = vpop.eup %4325  ;;  %v2585_v9 = vadd.f32 1.0, %v4324_v0  ;;  %v2293_v51 = vadd.f32 %v2226_v12, %v2048_v59  ;;  %v863_v24 = vrot.slane %v736_v1, 1  ;;  %v864_v62 = vrot.slane %v737_v33, 1 }
 0x190   : > { %v2586_v52 = vadd.f32 1.0, %v4326_v6  ;;  %v6284_v57 = vadd.f32 %v5913_v48, %v2292_v11  ;;  %v866_v63 = vrot.slane %v738_v10, 1  ;;  %v983_v60 = vmul.f32 %v4489_v53, %v6147_v5  ;;  %v4491_v11 = vld [vmem:[%s6899_s1 + $0x4] ss:$0 sm:$0xff]  ;;  %v614_v10 = vld [vmem:[#allocation2 + $0x198] sm:$0xff] }
 0x191   : > { %v2617_v23 = vmul.f32 %v2585_v9, %v6196_v46  ;;  %v6289_v45 = vadd.f32 %v5913_v48, %v2293_v51  ;;  %v865_v40 = vsel %vm787_vm3, %v863_v24, %v864_v62  ;;  %v984_v28 = vmul.f32 %v4489_v53, %v6149_v19  ;;  %v4492_v24 = vld [vmem:[%s6899_s1 + $0x5] ss:$0 sm:$0xff] }
 0x192   : > { %v2618_v43 = vmul.f32 %v2586_v52, %v2362_v18  ;;  %v2395_v35 = vmul.f32 0.044715, %v6284_v57  ;;  %v867_v32 = vsel %vm787_vm3, %v864_v62, %v866_v63  ;;  %v1109_v47 = vrot.slane %v982_v39, 2  ;;  %v615_v63 = vld [vmem:[#allocation2 + $0x1a0] sm:$0xff] }
 0x193   : > { %v2656_v37 = vmul.f32 %v6011_v38, %v2617_v23  ;;  %v2396_v2 = vmul.f32 0.044715, %v6289_v45  ;;  %v930_v5 = vadd.f32 %v865_v40, %v652_v44  ;;  %v931_v31 = vadd.f32 %v867_v32, %v653_v49  ;;  %v4493_v32 = vld [vmem:[%s6899_s1 + $0x6] ss:$0 sm:$0xff] }
 0x194   : > { %v2657_v46 = vmul.f32 %v6011_v38, %v2618_v43  ;;  %v2427_v48 = vmul.f32 %v2395_v35, %v6284_v57  ;;  %v1110_v42 = vrot.slane %v983_v60, 2  ;;  %v1112_v8 = vrot.slane %v984_v28, 2  ;;  %v616_v28 = vld [vmem:[#allocation2 + $0x1a8] sm:$0x3] }
 0x195   : > { %v2695_v20 = vadd.f32 %v6020_v41, %v2656_v37  ;;  %v2428_v19 = vmul.f32 %v2396_v2, %v6289_v45  ;;  %v1213_v29 = vmul.f32 %v4490_v50, %v6224_v56  ;;  %v1214_v4 = vmul.f32 %v4490_v50, %v6235_v22 }
 0x196   : > { %v2696_v18 = vadd.f32 %v6020_v41, %v2657_v46  ;;  %v2459_v26 = vmul.f32 %v2427_v48, %v6284_v57  ;;  %v1111_v61 = vsel %vm1033_vm4, %v1109_v47, %v1110_v42  ;;  %v1113_v12 = vsel %vm1033_vm4, %v1110_v42, %v1112_v8 }
 0x197   : > { %v2727_v44 = vadd.f32 %v2695_v20, %v5421_v58  ;;  %v2460_v59 = vmul.f32 %v2428_v19, %v6289_v45  ;;  %v1176_v55 = vadd.f32 %v1111_v61, %v930_v5  ;;  %v1177_v0 = vadd.f32 %v1113_v12, %v931_v31 }
 0x198   : > { %v2728_v1 = vadd.f32 %v2696_v18, %v5424_v16  ;;  %v2491_v33 = vadd.f32 %v2459_v26, %v6284_v57  ;;  %v1297_v49 = vmul.f32 %v4491_v11, %v6224_v56  ;;  %v1298_v39 = vmul.f32 %v4491_v11, %v6235_v22  ;;  %v4495_v18 = vld [vmem:[%s6899_s1 + $0x8] ss:$0 sm:$0xff] }
 0x199   : > { %2759 = vst.msk [vmem:[#allocation3 + $0xd0] sm:$0xff] %vm474_vm1, %v2727_v44  ;;  %v2492_v58 = vadd.f32 %v2460_v59, %v6289_v45  ;;  %v1245_v53 = vadd.f32 %v1213_v29, %v1176_v55  ;;  %v1299_v6 = vmul.f32 %v4491_v11, %v6240_v3  ;;  %v1246_v9 = vadd.f32 %v1214_v4, %v1177_v0 }
 0x19a   : > { %2760 = vst.msk [vmem:[#allocation3 + $0xd8] sm:$0xff] %vm474_vm1, %v2728_v1  ;;  %v2523_v16 = vmul.f32 0.7978846, %v2491_v33  ;;  %v1423_v51 = vrot.slane %v1297_v49, 1  ;;  %v1542_v62 = vmul.f32 %v4492_v24, %v6224_v56  ;;  %v1424_v60 = vrot.slane %v1298_v39, 1 }
 0x19b   : > { %v2524_v52 = vmul.f32 0.7978846, %v2492_v58  ;;  %v1426_v23 = vrot.slane %v1299_v6, 1  ;;  %v1543_v40 = vmul.f32 %v4492_v24, %v6235_v22  ;;  %v1544_v43 = vmul.f32 %v4492_v24, %v6240_v3  ;;  %v4494_v3 = vld [vmem:[%s6899_s1 + $0x7] ss:$0 sm:$0xff] }
 0x19c   : > { %4327 = vtanh.f32 %v2523_v16  ;;  %v1668_v35 = vrot.slane %v1542_v62, 2  ;;  %v1772_v47 = vmul.f32 %v4493_v32, %v614_v10  ;;  %v1425_v37 = vsel %vm787_vm3, %v1423_v51, %v1424_v60  ;;  %v6345_v1 = vld [vmem:[%s6904_s6] ss:$0 sm:$0xff] }
 0x19d   : > { %4329 = vtanh.f32 %v2524_v52  ;;  %v1427_v56 = vsel %vm787_vm3, %v1424_v60, %v1426_v23  ;;  %v1669_v2 = vrot.slane %v1543_v40, 2  ;;  %v1490_v5 = vadd.f32 %v1425_v37, %v1245_v53 }
 0x19e   : > { %v1491_v46 = vadd.f32 %v1427_v56, %v1246_v9  ;;  %v1671_v48 = vrot.slane %v1544_v43, 2  ;;  %v1773_v22 = vmul.f32 %v4493_v32, %v615_v63  ;;  %v1856_v42 = vmul.f32 %v4494_v3, %v614_v10 }
 0x19f   : > { %v1670_v31 = vsel %vm1033_vm4, %v1668_v35, %v1669_v2  ;;  %v1857_v20 = vmul.f32 %v4494_v3, %v615_v63  ;;  %v1858_v19 = vmul.f32 %v4494_v3, %v616_v28  ;;  %v2101_v26 = vmul.f32 %v4495_v18, %v614_v10 }
 0x1a0   : > { %v2791_v8 = vld [vmem:[#allocation3 + $0xd0] sm:$0xff]  ;;  %v1672_v50 = vsel %vm1033_vm4, %v1669_v2, %v1671_v48  ;;  %v1735_v29 = vadd.f32 %v1670_v31, %v1490_v5  ;;  %v2102_v61 = vmul.f32 %v4495_v18, %v615_v63  ;;  %v1982_v59 = vrot.slane %v1856_v42, 1 }
 0x1a1   : > { %v2792_v4 = vld [vmem:[#allocation3 + $0xd8] sm:$0xff]  ;;  %v1736_v44 = vadd.f32 %v1672_v50, %v1491_v46  ;;  %v1983_v12 = vrot.slane %v1857_v20, 1  ;;  %v1985_v55 = vrot.slane %v1858_v19, 1  ;;  %v2103_v11 = vmul.f32 %v4495_v18, %v616_v28  ;;  %v4270_v63 = vld [vmem:[%s6907_s9] sm:$0xff]  }
 0x1a2   : > { %v2810_v33 = vpack.c.bf16 %v2792_v4, %v2791_v8  ;;  %v1804_v0 = vadd.f32 %v1772_v47, %v1735_v29  ;;  %v2227_v49 = vrot.slane %v2101_v26, 2  ;;  %v2228_v39 = vrot.slane %v2102_v61, 2  ;;  %4226 = vmatprep.subr.bf16.mxu1 %v4270_v63 }
 0x1a3   : > { %v1805_v58 = vadd.f32 %v1773_v22, %v1736_v44  ;;  %v1984_v53 = vsel %vm787_vm3, %v1982_v59, %v1983_v12  ;;  %v1986_v10 = vsel %vm787_vm3, %v1983_v12, %v1985_v55  ;;  %v2230_v16 = vrot.slane %v2103_v11, 2  ;;  %4227 = vmatpush3.bf16.msra.mxu1 %v4270_v63 }
 0x1a4   : > { %4219 = vmatmul.mubr.msk.bf16.gmra.mrb[24].mxu0 %vm474_vm1, %v2810_v33  ;;  %v2049_v6 = vadd.f32 %v1984_v53, %v1804_v0  ;;  %v6352_v9 = vadd.f32 %v6052_v34, %v6345_v1  ;;  %v2363_v51 = vmul.f32 0.5, %v6284_v57  ;;  %v2229_v62 = vsel %vm1033_vm4, %v2227_v49, %v2228_v39 }
 0x1a5   : > { %v2050_v24 = vadd.f32 %v1986_v10, %v1805_v58  ;;  %v6358_v52 = vadd.f32 %v6068_v30, %v6345_v1  ;;  %v2364_v23 = vmul.f32 0.5, %v6289_v45  ;;  %v2231_v40 = vsel %vm1033_vm4, %v2228_v39, %v2230_v16  ;;  %v4496_v30 = vld [vmem:[%s6900_s2] ss:$0 sm:$0xff] }
 0x1a6   : > { %v4328_v60 = vpop.eup %4327  ;;  %v2294_v34 = vadd.f32 %v2229_v62, %v2049_v6  ;;  %v3068_v28 = vmul.f32 0.044715, %v6352_v9  ;;  %v6386_v50 = vadd.f32 %v6345_v1, %v6058_v17  ;;  %v6393_v61 = vadd.f32 %v6345_v1, %v6076_v13 }
 0x1a7   : > { %v4330_v57 = vpop.eup %4329  ;;  %v2587_v43 = vadd.f32 1.0, %v4328_v60  ;;  %v2295_v35 = vadd.f32 %v2231_v40, %v2050_v24  ;;  %v3069_v45 = vmul.f32 0.044715, %v6358_v52  ;;  %v6400_v17 = vadd.f32 %v6233_v14, %v6345_v1 }
 0x1a8   : > { %v2588_v32 = vadd.f32 1.0, %v4330_v57  ;;  %v6369_v47 = vadd.f32 %v4496_v30, %v2294_v34  ;;  %v3100_v37 = vmul.f32 %v3068_v28, %v6352_v9  ;;  %v3067_v11 = vmul.f32 0.044715, %v6393_v61 }
 0x1a9   : > { %v2619_v56 = vmul.f32 %v2587_v43, %v2363_v51  ;;  %v6373_v2 = vadd.f32 %v4496_v30, %v2295_v35  ;;  %v3101_v20 = vmul.f32 %v3069_v45, %v6358_v52  ;;  %v6412_v14 = vadd.f32 %v6345_v1, %v6238_v21 }
 0x1aa   : > { %v2620_v5 = vmul.f32 %v2588_v32, %v2364_v23  ;;  %v2397_v46 = vmul.f32 0.044715, %v6369_v47  ;;  %v3132_v31 = vmul.f32 %v3100_v37, %v6352_v9  ;;  %v3072_v53 = vmul.f32 0.044715, %v6400_v17 }
 0x1ab   : > { %v2658_v48 = vmul.f32 %v6011_v38, %v2619_v56  ;;  %v2398_v22 = vmul.f32 0.044715, %v6373_v2  ;;  %v3133_v26 = vmul.f32 %v3101_v20, %v6358_v52  ;;  %v6421_v10 = vadd.f32 %v6345_v1, %v6255_v36 }
 0x1ac   : > { %v2659_v3 = vmul.f32 %v6011_v38, %v2620_v5  ;;  %v2429_v42 = vmul.f32 %v2397_v46, %v6369_v47  ;;  %v3164_v59 = vadd.f32 %v3132_v31, %v6352_v9  ;;  %v3070_v6 = vmul.f32 0.044715, %v6412_v14 }
 0x1ad   : > { %v2697_v19 = vadd.f32 %v6020_v41, %v2658_v48  ;;  %v2430_v8 = vmul.f32 %v2398_v22, %v6373_v2  ;;  %v3165_v33 = vadd.f32 %v3133_v26, %v6358_v52  ;;  %v3071_v24 = vmul.f32 0.044715, %v6421_v10 }
 0x1ae   : > { %v2698_v29 = vadd.f32 %v6020_v41, %v2659_v3  ;;  %v2461_v18 = vmul.f32 %v2429_v42, %v6369_v47  ;;  %v3196_v58 = vmul.f32 0.7978846, %v3164_v59  ;;  %v3104_v36 = vmul.f32 %v3072_v53, %v6400_v17 }
 0x1af   : > { %v2729_v4 = vadd.f32 %v2697_v19, %v5504_v27  ;;  %v2462_v44 = vmul.f32 %v2430_v8, %v6373_v2  ;;  %v3066_v27 = vmul.f32 0.044715, %v6386_v50  ;;  %v3197_v39 = vmul.f32 0.7978846, %v3165_v33 }
 0x1b0   : > { %v2730_v12 = vadd.f32 %v2698_v29, %v5507_v54  ;;  %v2493_v55 = vadd.f32 %v2461_v18, %v6369_v47  ;;  %v6416_v54 = vadd.f32 %v6246_v15, %v6345_v1  ;;  %v3099_v15 = vmul.f32 %v3067_v11, %v6393_v61 }
 0x1b1   : > { %2761 = vst.msk [vmem:[#allocation3 + $0xe0] sm:$0xff] %vm474_vm1, %v2729_v4  ;;  %v2494_v13 = vadd.f32 %v2462_v44, %v6373_v2  ;;  %v3098_v21 = vmul.f32 %v3066_v27, %v6386_v50  ;;  %v3102_v23 = vmul.f32 %v3070_v6, %v6412_v14  ;;  %v3103_v57 = vmul.f32 %v3071_v24, %v6421_v10  ;;  %v4497_v27 = vld [vmem:[%s6901_s3] ss:$0 sm:$0xff] }
 0x1b2   : > { %2762 = vst.msk [vmem:[#allocation3 + $0xe8] sm:$0xff] %vm474_vm1, %v2730_v12  ;;  %v2525_v0 = vmul.f32 0.7978846, %v2493_v55  ;;  %v3073_v51 = vmul.f32 0.044715, %v6416_v54  ;;  %v3131_v35 = vmul.f32 %v3099_v15, %v6393_v61  ;;  %v3136_v30 = vmul.f32 %v3104_v36, %v6400_v17 }
 0x1b3   : > { %v2526_v49 = vmul.f32 0.7978846, %v2494_v13  ;;  %v3130_v28 = vmul.f32 %v3098_v21, %v6386_v50  ;;  %v3134_v37 = vmul.f32 %v3102_v23, %v6412_v14  ;;  %v2365_v45 = vmul.f32 0.5, %v6369_v47  ;;  %v6475_v24 = vld [vmem:[%s6906_s8] ss:$0 sm:$0xff] }
 0x1b4   : > { %4331 = vtanh.f32 %v2525_v0  ;;  %v3105_v32 = vmul.f32 %v3073_v51, %v6416_v54  ;;  %v3135_v5 = vmul.f32 %v3103_v57, %v6421_v10  ;;  %v2366_v48 = vmul.f32 0.5, %v6373_v2 }
 0x1b5   : > { %4333 = vtanh.f32 %v2526_v49  ;;  %v6425_v16 = vpop.f32.mrb[8].mxu0  ;;  %v3162_v56 = vadd.f32 %v3130_v28, %v6386_v50  ;;  %v3163_v22 = vadd.f32 %v3131_v35, %v6393_v61  ;;  %v3168_v20 = vadd.f32 %v3136_v30, %v6400_v17 }
 0x1b6   : > { %v6430_v62 = vpop.f32.mrb[9].mxu0  ;;  %4335 = vtanh.f32 %v3196_v58  ;;  %v3137_v31 = vmul.f32 %v3105_v32, %v6416_v54  ;;  %v3166_v8 = vadd.f32 %v3134_v37, %v6412_v14  ;;  %v3167_v18 = vadd.f32 %v3135_v5, %v6421_v10 }
 0x1b7   : > { %v6433_v63 = vpop.f32.mrb[10].mxu0  ;;  %4337 = vtanh.f32 %v3197_v39  ;;  %v3194_v26 = vmul.f32 0.7978846, %v3162_v56  ;;  %v3195_v59 = vmul.f32 0.7978846, %v3163_v22  ;;  %v3036_v55 = vmul.f32 0.5, %v6352_v9 }
 0x1b8   : > { %v2793_v60 = vld [vmem:[#allocation3 + $0xe0] sm:$0xff]  ;;  %v6436_v40 = vpop.f32.mrb[11].mxu0  ;;  %v3169_v2 = vadd.f32 %v3137_v31, %v6416_v54  ;;  %v3037_v33 = vmul.f32 0.5, %v6358_v52  ;;  %v3200_v13 = vmul.f32 0.7978846, %v3168_v20  ;;  %v3034_v57 = vmul.f32 0.5, %v6386_v50 }
 0x1b9   : > { %v2794_v34 = vld [vmem:[#allocation3 + $0xe8] sm:$0xff]  ;;  %v3198_v11 = vmul.f32 0.7978846, %v3166_v8  ;;  %4339 = vtanh.f32 %v3194_v26  ;;  %v3199_v53 = vmul.f32 0.7978846, %v3167_v18  ;;  %v3035_v32 = vmul.f32 0.5, %v6393_v61 }
 0x1ba   : > { %v2811_v43 = vpack.c.bf16 %v2794_v34, %v2793_v60  ;;  %4341 = vtanh.f32 %v3195_v59  ;;  %v4498_v52 = vld [vmem:[%s6902_s4] ss:$0 sm:$0xff]  ;;  %v3201_v6 = vmul.f32 0.7978846, %v3169_v2  ;;  %v3040_v50 = vmul.f32 0.5, %v6400_v17 }
 0x1bb   : > { %4343 = vtanh.f32 %v3200_v13  ;;  %v3038_v20 = vmul.f32 0.5, %v6412_v14  ;;  %v3039_v61 = vmul.f32 0.5, %v6421_v10  ;;  %v3041_v26 = vmul.f32 0.5, %v6416_v54 }
 0x1bc   : > { %4222 = vmatprep.mubr.msk.bf16.mxu0 %vm474_vm1, %v2811_v43  ;;  %4345 = vtanh.f32 %v3198_v11 }
 0x1bd   : > { %4347 = vtanh.f32 %v3199_v53  ;;  %v2940_v53 = vadd.f32 %v6345_v1, %v6430_v62 }
 0x1be   : > { %v4332_v46 = vpop.eup %4331  ;;  %4349 = vtanh.f32 %v3201_v6 }
 0x1bf   : > { %v4334_v3 = vpop.eup %4333  ;;  %v2589_v42 = vadd.f32 1.0, %v4332_v46  ;;  %v3074_v6 = vmul.f32 0.044715, %v2940_v53 }
 0x1c0   : > { %v2590_v19 = vadd.f32 1.0, %v4334_v3  ;;  %v4336_v29 = vpop.eup %4335 }
 0x1c1   : > { %v2621_v47 = vmul.f32 %v2589_v42, %v2365_v45  ;;  %v4338_v4 = vpop.eup %4337  ;;  %v3260_v49 = vadd.f32 1.0, %v4336_v29 }
 0x1c2   : > { %v2622_v44 = vmul.f32 %v2590_v19, %v2366_v48  ;;  %v3261_v9 = vadd.f32 1.0, %v4338_v4 }
 0x1c3   : > { %v2660_v12 = vmul.f32 %v6011_v38, %v2621_v47  ;;  %v6465_v38 = vld [vmem:[%s6905_s7] ss:$0 sm:$0xff]  ;;  %v3292_v21 = vmul.f32 %v3260_v49, %v3036_v55  ;;  %v4340_v34 = vpop.eup %4339  ;;  %v2948_v49 = vadd.f32 %v6425_v16, %v6345_v1 }
 0x1c4   : > { %v2661_v0 = vmul.f32 %v4497_v27, %v2622_v44  ;;  %v3293_v51 = vmul.f32 %v3261_v9, %v3037_v33  ;;  %v4342_v28 = vpop.eup %4341  ;;  %v3258_v43 = vadd.f32 1.0, %v4340_v34  ;;  %v2951_v9 = vadd.f32 %v6433_v63, %v6345_v1 }
 0x1c5   : > { %v2699_v58 = vadd.f32 %v6020_v41, %v2660_v12  ;;  %v3331_v36 = vmul.f32 %v6465_v38, %v3292_v21  ;;  %v3259_v30 = vadd.f32 1.0, %v4342_v28  ;;  %v4344_v37 = vpop.eup %4343 }
 0x1c6   : > { %v2700_v39 = vadd.f32 %v4498_v52, %v2661_v0  ;;  %v3332_v60 = vmul.f32 %v6465_v38, %v3293_v51  ;;  %v3290_v56 = vmul.f32 %v3258_v43, %v3034_v57  ;;  %v4346_v5 = vpop.eup %4345  ;;  %v3264_v18 = vadd.f32 1.0, %v4344_v37 }
 0x1c7   : > { %v2731_v15 = vadd.f32 %v2699_v58, %v5620_v25  ;;  %v3370_v25 = vadd.f32 %v6475_v24, %v3331_v36  ;;  %v3291_v48 = vmul.f32 %v3259_v30, %v3035_v32  ;;  %v4348_v22 = vpop.eup %4347  ;;  %v3262_v29 = vadd.f32 1.0, %v4346_v5 }
 0x1c8   : > { %v2732_v41 = vadd.f32 %v2700_v39, %v5623_v7  ;;  %v3371_v7 = vadd.f32 %v6475_v24, %v3332_v60  ;;  %v3329_v31 = vmul.f32 %v6465_v38, %v3290_v56  ;;  %v4350_v3 = vpop.eup %4349  ;;  %v3263_v47 = vadd.f32 1.0, %v4348_v22 }
 0x1c9   : > { %2763 = vst.msk [vmem:[#allocation3 + $0xf0] sm:$0xff] %vm474_vm1, %v2731_v15  ;;  %v3330_v42 = vmul.f32 %v6465_v38, %v3291_v48  ;;  %v3265_v4 = vadd.f32 1.0, %v4350_v3  ;;  %v3294_v2 = vmul.f32 %v3262_v29, %v3038_v20  ;;  %v3296_v12 = vmul.f32 %v3264_v18, %v3040_v50 }
 0x1ca   : > { %2764 = vst.msk [vmem:[#allocation3 + $0xf8] sm:$0xff] %vm474_vm1, %v2732_v41  ;;  %v3401_v23 = vpack.c.bf16 %v3371_v7, %v3370_v25  ;;  %v3368_v19 = vadd.f32 %v6475_v24, %v3329_v31  ;;  %v3295_v59 = vmul.f32 %v3263_v47, %v3039_v61  ;;  %v2943_v52 = vadd.f32 %v6345_v1, %v6436_v40 }
 0x1cb   : > { %v3369_v8 = vadd.f32 %v6475_v24, %v3330_v42  ;;  %v3297_v17 = vmul.f32 %v3265_v4, %v3041_v26  ;;  %v3333_v14 = vmul.f32 %v6465_v38, %v3294_v2  ;;  %v3335_v55 = vmul.f32 %v6465_v38, %v3296_v12 }
 0x1cc   : > { %v3334_v10 = vmul.f32 %v6465_v38, %v3295_v59  ;;  %v3076_v39 = vmul.f32 0.044715, %v2948_v49  ;;  %v3077_v21 = vmul.f32 0.044715, %v2951_v9  ;;  %v3075_v51 = vmul.f32 0.044715, %v2943_v52 }
 0x1cd   : > { %v3400_v44 = vpack.c.bf16 %v3369_v8, %v3368_v19  ;;  %v3336_v33 = vmul.f32 %v6465_v38, %v3297_v17  ;;  %v3372_v54 = vadd.f32 %v6475_v24, %v3333_v14  ;;  %v3374_v27 = vadd.f32 %v6475_v24, %v3335_v55 }
 0x1ce   : > { %v3373_v13 = vadd.f32 %v6475_v24, %v3334_v10  ;;  %v3108_v41 = vmul.f32 %v3076_v39, %v2948_v49  ;;  %v3106_v60 = vmul.f32 %v3074_v6, %v2940_v53  ;;  %v3109_v25 = vmul.f32 %v3077_v21, %v2951_v9 }
 0x1cf   : > { %4228 = vmatprep.mubr.msk.bf16.mxu1 %vm3431_vm5, %v3400_v44  ;;  %v3375_v0 = vadd.f32 %v6475_v24, %v3336_v33  ;;  %v3107_v7 = vmul.f32 %v3075_v51, %v2943_v52  ;;  %v3044_v26 = vmul.f32 0.5, %v2948_v49  ;;  %v3042_v4 = vmul.f32 0.5, %v2940_v53 }
 0x1d0   : > { %v2795_v35 = vld [vmem:[#allocation3 + $0xf0] sm:$0xff]  ;;  %4229 = vmatmul.mubr.msk.bf16.vlgmr.msra.gmra.mrb[0].mxu1 %vm3431_vm5, %v3401_v23  ;;  %v3402_v11 = vpack.c.bf16 %v3373_v13, %v3372_v54  ;;  %v3140_v23 = vmul.f32 %v3108_v41, %v2948_v49  ;;  %v3138_v34 = vmul.f32 %v3106_v60, %v2940_v53  ;;  %v3141_v63 = vmul.f32 %v3109_v25, %v2951_v9 }
 0x1d1   : > { %v2796_v45 = vld [vmem:[#allocation3 + $0xf8] sm:$0xff]  ;;  %v3403_v58 = vpack.c.bf16 %v3375_v0, %v3374_v27  ;;  %v3139_v28 = vmul.f32 %v3107_v7, %v2943_v52  ;;  %v3045_v44 = vmul.f32 0.5, %v2951_v9  ;;  %v3043_v2 = vmul.f32 0.5, %v2943_v52 }
 0x1d2   : > { %v2812_v46 = vpack.c.bf16 %v2796_v45, %v2795_v35  ;;  %4232 = vmatprep.mubr.msk.bf16.mxu1 %vm3431_vm5, %v3402_v11  ;;  %v3172_v57 = vadd.f32 %v3140_v23, %v2948_v49  ;;  %v3170_v40 = vadd.f32 %v3138_v34, %v2940_v53  ;;  %v3173_v43 = vadd.f32 %v3141_v63, %v2951_v9 }
 0x1d3   : > { %v3171_v35 = vadd.f32 %v3139_v28, %v2943_v52 }
 0x1d4   : > { %4223 = vmatmul.mubr.msk.bf16.gmra.mrb[28].mxu0 %vm474_vm1, %v2812_v46  ;;  %v3204_v32 = vmul.f32 0.7978846, %v3172_v57  ;;  %v3202_v30 = vmul.f32 0.7978846, %v3170_v40  ;;  %v3205_v37 = vmul.f32 0.7978846, %v3173_v43 }
 0x1d5   : > { %v3203_v45 = vmul.f32 0.7978846, %v3171_v35 }
 0x1d6   : > { %4351 = vtanh.f32 %v3204_v32 }
 0x1d7   : > { %4353 = vtanh.f32 %v3202_v30 }
 0x1d8   : > { %4233 = vmatmul.mubr.msk.bf16.gmra.mrb[4].mxu1 %vm3431_vm5, %v3403_v58  ;;  %4355 = vtanh.f32 %v3205_v37 }
 0x1d9   : > { %4357 = vtanh.f32 %v3203_v45 }
 0x1e0   : > { %v4352_v50 = vpop.eup %4351 }
 0x1e1   : > { %v4354_v20 = vpop.eup %4353  ;;  %v3268_v10 = vadd.f32 1.0, %v4352_v50 }
 0x1e2   : > { %v4356_v8 = vpop.eup %4355  ;;  %v3266_v17 = vadd.f32 1.0, %v4354_v20 }
 0x1e3   : > { %v4358_v29 = vpop.eup %4357  ;;  %v3269_v55 = vadd.f32 1.0, %v4356_v8  ;;  %v3300_v0 = vmul.f32 %v3268_v10, %v3044_v26 }
 0x1e4   : > { %v3267_v14 = vadd.f32 1.0, %v4358_v29  ;;  %v3298_v13 = vmul.f32 %v3266_v17, %v3042_v4 }
 0x1e5   : > { %v3301_v11 = vmul.f32 %v3269_v55, %v3045_v44  ;;  %v3339_v52 = vmul.f32 %v6465_v38, %v3300_v0 }
 0x1e6   : > { %v4208_v15 = vpop.f32.mrb[12].mxu0  ;;  %v3299_v27 = vmul.f32 %v3267_v14, %v3043_v2  ;;  %v3337_v53 = vmul.f32 %v6465_v38, %v3298_v13 }
 0x1e7   : > { %v2955_v16 = vpop.f32.mrb[13].mxu0  ;;  %v6515_v56 = vadd.f32 %v4208_v15, %v6345_v1  ;;  %v3340_v39 = vmul.f32 %v6465_v38, %v3301_v11 }
 0x1e8   : > { %v4209_v36 = vpop.f32.mrb[14].mxu0  ;;  %v6518_v5 = vadd.f32 %v6345_v1, %v2955_v16  ;;  %v3338_v9 = vmul.f32 %v6465_v38, %v3299_v27  ;;  %v3376_v15 = vadd.f32 %v6475_v24, %v3337_v53  ;;  %v3378_v16 = vadd.f32 %v6475_v24, %v3339_v52 }
 0x1e9   : > { %v2958_v62 = vpop.f32.mrb[15].mxu0  ;;  %v6521_v46 = vadd.f32 %v4209_v36, %v6345_v1  ;;  %v3080_v22 = vmul.f32 0.044715, %v6515_v56  ;;  %v3379_v41 = vadd.f32 %v6475_v24, %v3340_v39  ;;  %v3048_v8 = vmul.f32 0.5, %v6515_v56 }
 0x1ea   : > { %v6524_v48 = vadd.f32 %v6345_v1, %v2958_v62  ;;  %v3078_v31 = vmul.f32 0.044715, %v6518_v5  ;;  %v3377_v51 = vadd.f32 %v6475_v24, %v3338_v9  ;;  %v3046_v29 = vmul.f32 0.5, %v6518_v5 }
 0x1eb   : > { %v3081_v3 = vmul.f32 0.044715, %v6521_v46  ;;  %v3112_v61 = vmul.f32 %v3080_v22, %v6515_v56  ;;  %v3405_v25 = vpack.c.bf16 %v3379_v41, %v3378_v16  ;;  %v3049_v4 = vmul.f32 0.5, %v6521_v46 }
 0x1ec   : > { %v3079_v42 = vmul.f32 0.044715, %v6524_v48  ;;  %v3110_v19 = vmul.f32 %v3078_v31, %v6518_v5  ;;  %v3404_v62 = vpack.c.bf16 %v3377_v51, %v3376_v15 }
 0x1ed   : > { %v3113_v47 = vmul.f32 %v3081_v3, %v6521_v46  ;;  %v3144_v59 = vmul.f32 %v3112_v61, %v6515_v56 }
 0x1ee   : > { %v3111_v18 = vmul.f32 %v3079_v42, %v6524_v48  ;;  %v3142_v12 = vmul.f32 %v3110_v19, %v6518_v5  ;;  %4236 = vmatprep.mubr.msk.bf16.mxu1 %vm3431_vm5, %v3404_v62 }
 0x1ef   : > { %v3145_v33 = vmul.f32 %v3113_v47, %v6521_v46  ;;  %v3176_v49 = vadd.f32 %v3144_v59, %v6515_v56  ;;  %4237 = vmatmul.mubr.msk.bf16.gmra.mrb[8].mxu1 %vm3431_vm5, %v3405_v25 }
 0x1f0   : > { %v3143_v54 = vmul.f32 %v3111_v18, %v6524_v48  ;;  %v3174_v58 = vadd.f32 %v3142_v12, %v6518_v5  ;;  %v3047_v12 = vmul.f32 0.5, %v6524_v48 }
 0x1f1   : > { %v3177_v6 = vadd.f32 %v3145_v33, %v6521_v46  ;;  %v3208_v36 = vmul.f32 0.7978846, %v3176_v49 }
 0x1f2   : > { %v3175_v21 = vadd.f32 %v3143_v54, %v6524_v48  ;;  %v3206_v60 = vmul.f32 0.7978846, %v3174_v58 }
 0x1f3   : > { %v3209_v7 = vmul.f32 0.7978846, %v3177_v6  ;;  %4359 = vtanh.f32 %v3208_v36 }
 0x1f4   : > { %v3207_v23 = vmul.f32 0.7978846, %v3175_v21  ;;  %4361 = vtanh.f32 %v3206_v60 }
 0x1f5   : > { %4363 = vtanh.f32 %v3209_v7 }
 0x1f6   : > { %4365 = vtanh.f32 %v3207_v23 }
 0x1fd   : > { %v4360_v31 = vpop.eup %4359 }
 0x1fe   : > { %v4362_v50 = vpop.eup %4361  ;;  %v3272_v59 = vadd.f32 1.0, %v4360_v31 }
 0x1ff   : > { %v4364_v19 = vpop.eup %4363  ;;  %v3270_v10 = vadd.f32 1.0, %v4362_v50 }
 0x200   : > { %v4366_v26 = vpop.eup %4365  ;;  %v3273_v54 = vadd.f32 1.0, %v4364_v19  ;;  %v3304_v13 = vmul.f32 %v3272_v59, %v3048_v8 }
 0x201   : > { %v3271_v5 = vadd.f32 1.0, %v4366_v26  ;;  %v3302_v0 = vmul.f32 %v3270_v10, %v3046_v29 }
 0x202   : > { %v3305_v49 = vmul.f32 %v3273_v54, %v3049_v4  ;;  %v3343_v46 = vmul.f32 %v6465_v38, %v3304_v13 }
 0x203   : > { %v3303_v53 = vmul.f32 %v3271_v5, %v3047_v12  ;;  %v3341_v48 = vmul.f32 %v6465_v38, %v3302_v0 }
 0x204   : > { %v3344_v9 = vmul.f32 %v6465_v38, %v3305_v49  ;;  %v3382_v39 = vadd.f32 %v6475_v24, %v3343_v46 }
 0x205   : > { %v3342_v52 = vmul.f32 %v6465_v38, %v3303_v53  ;;  %v3380_v21 = vadd.f32 %v6475_v24, %v3341_v48 }
 0x206   : > { %v3383_v6 = vadd.f32 %v6475_v24, %v3344_v9 }
 0x207   : > { %v3381_v15 = vadd.f32 %v6475_v24, %v3342_v52 }
 0x208   : > { %v3407_v51 = vpack.c.bf16 %v3383_v6, %v3382_v39 }
 0x209   : > { %v3406_v16 = vpack.c.bf16 %v3381_v15, %v3380_v21 }
 0x20b   : > { %4240 = vmatprep.mubr.msk.bf16.mxu1 %vm3431_vm5, %v3406_v16 }
 0x20c   : > { %4241 = vmatmul.mubr.msk.bf16.gmra.mrb[12].mxu1 %vm3431_vm5, %v3407_v51 }
 0x216   : > { %v4212_v34 = vpop.f32.mrb[16].mxu0 }
 0x217   : > { %v2980_v63 = vadd.f32 %v4212_v34, %v6345_v1  ;;  %v2971_v28 = vpop.f32.mrb[17].mxu0 }
 0x218   : > { %v2972_v57 = vadd.f32 %v6345_v1, %v2971_v28  ;;  %v4213_v40 = vpop.f32.mrb[18].mxu0 }
 0x219   : > { %v3084_v43 = vmul.f32 0.044715, %v2980_v63  ;;  %v2983_v35 = vadd.f32 %v4213_v40, %v6345_v1  ;;  %v2974_v32 = vpop.f32.mrb[19].mxu0  ;;  %v3052_v60 = vmul.f32 0.5, %v2980_v63 }
 0x21a   : > { %v3082_v30 = vmul.f32 0.044715, %v2972_v57  ;;  %v2975_v37 = vadd.f32 %v6345_v1, %v2974_v32  ;;  %v3050_v7 = vmul.f32 0.5, %v2972_v57 }
 0x21b   : > { %v3116_v45 = vmul.f32 %v3084_v43, %v2980_v63  ;;  %v3085_v22 = vmul.f32 0.044715, %v2983_v35  ;;  %v3053_v28 = vmul.f32 0.5, %v2983_v35 }
 0x21c   : > { %v3114_v3 = vmul.f32 %v3082_v30, %v2972_v57  ;;  %v3083_v42 = vmul.f32 0.044715, %v2975_v37  ;;  %v3051_v32 = vmul.f32 0.5, %v2975_v37 }
 0x21d   : > { %v3148_v20 = vmul.f32 %v3116_v45, %v2980_v63  ;;  %v3117_v61 = vmul.f32 %v3085_v22, %v2983_v35 }
 0x21e   : > { %v3146_v47 = vmul.f32 %v3114_v3, %v2972_v57  ;;  %v3115_v18 = vmul.f32 %v3083_v42, %v2975_v37 }
 0x21f   : > { %v3180_v44 = vadd.f32 %v3148_v20, %v2980_v63  ;;  %v3149_v2 = vmul.f32 %v3117_v61, %v2983_v35 }
 0x220   : > { %v3178_v17 = vadd.f32 %v3146_v47, %v2972_v57  ;;  %v3147_v14 = vmul.f32 %v3115_v18, %v2975_v37 }
 0x221   : > { %v3212_v55 = vmul.f32 0.7978846, %v3180_v44  ;;  %v3181_v33 = vadd.f32 %v3149_v2, %v2983_v35 }
 0x222   : > { %v3210_v56 = vmul.f32 0.7978846, %v3178_v17  ;;  %v3179_v27 = vadd.f32 %v3147_v14, %v2975_v37 }
 0x223   : > { %4367 = vtanh.f32 %v3212_v55  ;;  %v3213_v11 = vmul.f32 0.7978846, %v3181_v33 }
 0x224   : > { %4369 = vtanh.f32 %v3210_v56  ;;  %v3211_v58 = vmul.f32 0.7978846, %v3179_v27 }
 0x225   : > { %4371 = vtanh.f32 %v3213_v11 }
 0x226   : > { %4373 = vtanh.f32 %v3211_v58 }
 0x22d   : > { %v4368_v41 = vpop.eup %4367 }
 0x22e   : > { %v4370_v36 = vpop.eup %4369  ;;  %v3276_v62 = vadd.f32 1.0, %v4368_v41 }
 0x22f   : > { %v4372_v25 = vpop.eup %4371  ;;  %v3274_v23 = vadd.f32 1.0, %v4370_v36 }
 0x230   : > { %v4374_v34 = vpop.eup %4373  ;;  %v3277_v40 = vadd.f32 1.0, %v4372_v25  ;;  %v3308_v43 = vmul.f32 %v3276_v62, %v3052_v60 }
 0x231   : > { %v3275_v30 = vadd.f32 1.0, %v4374_v34  ;;  %v3306_v45 = vmul.f32 %v3274_v23, %v3050_v7 }
 0x232   : > { %v3309_v22 = vmul.f32 %v3277_v40, %v3053_v28  ;;  %v3347_v31 = vmul.f32 %v6465_v38, %v3308_v43 }
 0x233   : > { %v3307_v3 = vmul.f32 %v3275_v30, %v3051_v32  ;;  %v3345_v42 = vmul.f32 %v6465_v38, %v3306_v45 }
 0x234   : > { %v3348_v50 = vmul.f32 %v6465_v38, %v3309_v22  ;;  %v3386_v57 = vadd.f32 %v6475_v24, %v3347_v31 }
 0x235   : > { %v3346_v63 = vmul.f32 %v6465_v38, %v3307_v3  ;;  %v3384_v35 = vadd.f32 %v6475_v24, %v3345_v42 }
 0x236   : > { %v3387_v20 = vadd.f32 %v6475_v24, %v3348_v50 }
 0x237   : > { %v3385_v37 = vadd.f32 %v6475_v24, %v3346_v63 }
 0x238   : > { %v3409_v61 = vpack.c.bf16 %v3387_v20, %v3386_v57 }
 0x239   : > { %v3408_v19 = vpack.c.bf16 %v3385_v37, %v3384_v35 }
 0x23b   : > { %4244 = vmatprep.mubr.msk.bf16.mxu1 %vm3431_vm5, %v3408_v19 }
 0x23c   : > { %4245 = vmatmul.mubr.msk.bf16.gmra.mrb[16].mxu1 %vm3431_vm5, %v3409_v61 }
 0x247   : > { %v4216_v8 = vpop.f32.mrb[20].mxu0 }
 0x248   : > { %v2996_v29 = vadd.f32 %v4216_v8, %v6345_v1  ;;  %v2987_v47 = vpop.f32.mrb[21].mxu0 }
 0x249   : > { %v2988_v18 = vadd.f32 %v6345_v1, %v2987_v47  ;;  %v4217_v26 = vpop.f32.mrb[22].mxu0 }
 0x24a   : > { %v3088_v4 = vmul.f32 0.044715, %v2996_v29  ;;  %v2999_v44 = vadd.f32 %v4217_v26, %v6345_v1  ;;  %v2990_v2 = vpop.f32.mrb[23].mxu0  ;;  %v3056_v6 = vmul.f32 0.5, %v2996_v29 }
 0x24b   : > { %v3086_v59 = vmul.f32 0.044715, %v2988_v18  ;;  %v2991_v12 = vadd.f32 %v6345_v1, %v2990_v2  ;;  %v3054_v51 = vmul.f32 0.5, %v2988_v18 }
 0x24c   : > { %v3120_v17 = vmul.f32 %v3088_v4, %v2996_v29  ;;  %v3089_v14 = vmul.f32 0.044715, %v2999_v44  ;;  %v3057_v36 = vmul.f32 0.5, %v2999_v44 }
 0x24d   : > { %v3118_v10 = vmul.f32 %v3086_v59, %v2988_v18  ;;  %v3087_v55 = vmul.f32 0.044715, %v2991_v12  ;;  %v3055_v25 = vmul.f32 0.5, %v2991_v12 }
 0x24e   : > { %v3152_v33 = vmul.f32 %v3120_v17, %v2996_v29  ;;  %v3121_v54 = vmul.f32 %v3089_v14, %v2999_v44 }
 0x24f   : > { %v3150_v13 = vmul.f32 %v3118_v10, %v2988_v18  ;;  %v3119_v56 = vmul.f32 %v3087_v55, %v2991_v12 }
 0x250   : > { %v3184_v27 = vadd.f32 %v3152_v33, %v2996_v29  ;;  %v3153_v5 = vmul.f32 %v3121_v54, %v2999_v44 }
 0x251   : > { %v3182_v0 = vadd.f32 %v3150_v13, %v2988_v18  ;;  %v3151_v11 = vmul.f32 %v3119_v56, %v2991_v12 }
 0x252   : > { %v3216_v49 = vmul.f32 0.7978846, %v3184_v27  ;;  %v3185_v46 = vadd.f32 %v3153_v5, %v2999_v44 }
 0x253   : > { %v3214_v58 = vmul.f32 0.7978846, %v3182_v0  ;;  %v3183_v53 = vadd.f32 %v3151_v11, %v2991_v12 }
 0x254   : > { %4375 = vtanh.f32 %v3216_v49  ;;  %v3217_v48 = vmul.f32 0.7978846, %v3185_v46 }
 0x255   : > { %4377 = vtanh.f32 %v3214_v58  ;;  %v3215_v9 = vmul.f32 0.7978846, %v3183_v53 }
 0x256   : > { %4379 = vtanh.f32 %v3217_v48 }
 0x257   : > { %4381 = vtanh.f32 %v3215_v9 }
 0x25e   : > { %v4376_v52 = vpop.eup %4375 }
 0x25f   : > { %v4378_v39 = vpop.eup %4377  ;;  %v3280_v21 = vadd.f32 1.0, %v4376_v52 }
 0x260   : > { %v4380_v15 = vpop.eup %4379  ;;  %v3278_v16 = vadd.f32 1.0, %v4378_v39 }
 0x261   : > { %v4382_v41 = vpop.eup %4381  ;;  %v3281_v60 = vadd.f32 1.0, %v4380_v15  ;;  %v3312_v62 = vmul.f32 %v3280_v21, %v3056_v6 }
 0x262   : > { %v3279_v7 = vadd.f32 1.0, %v4382_v41  ;;  %v3310_v23 = vmul.f32 %v3278_v16, %v3054_v51 }
 0x263   : > { %v3313_v34 = vmul.f32 %v3281_v60, %v3057_v36  ;;  %v3351_v28 = vmul.f32 %v6465_v38, %v3312_v62 }
 0x264   : > { %v3311_v40 = vmul.f32 %v3279_v7, %v3055_v25  ;;  %v3349_v43 = vmul.f32 %v6465_v38, %v3310_v23 }
 0x265   : > { %v3352_v32 = vmul.f32 %v6465_v38, %v3313_v34  ;;  %v3390_v45 = vadd.f32 %v6475_v24, %v3351_v28 }
 0x266   : > { %v3350_v30 = vmul.f32 %v6465_v38, %v3311_v40  ;;  %v3388_v31 = vadd.f32 %v6475_v24, %v3349_v43 }
 0x267   : > { %v3391_v22 = vadd.f32 %v6475_v24, %v3352_v32 }
 0x268   : > { %v3389_v3 = vadd.f32 %v6475_v24, %v3350_v30 }
 0x269   : > { %v3411_v42 = vpack.c.bf16 %v3391_v22, %v3390_v45 }
 0x26a   : > { %v3410_v50 = vpack.c.bf16 %v3389_v3, %v3388_v31 }
 0x26c   : > { %4248 = vmatprep.mubr.msk.bf16.mxu1 %vm3431_vm5, %v3410_v50 }
 0x26d   : > { %4249 = vmatmul.mubr.msk.bf16.gmra.mrb[20].mxu1 %vm3431_vm5, %v3411_v42 }
 0x277   : > { %v4220_v63 = vpop.f32.mrb[24].mxu0 }
 0x278   : > { %v3012_v57 = vadd.f32 %v4220_v63, %v6345_v1  ;;  %v3003_v20 = vpop.f32.mrb[25].mxu0 }
 0x279   : > { %v3004_v35 = vadd.f32 %v6345_v1, %v3003_v20  ;;  %v4221_v37 = vpop.f32.mrb[26].mxu0 }
 0x27a   : > { %v3092_v61 = vmul.f32 0.044715, %v3012_v57  ;;  %v3015_v19 = vadd.f32 %v4221_v37, %v6345_v1  ;;  %v3006_v8 = vpop.f32.mrb[27].mxu0  ;;  %v3060_v46 = vmul.f32 0.5, %v3012_v57 }
 0x27b   : > { %v3090_v29 = vmul.f32 0.044715, %v3004_v35  ;;  %v3007_v47 = vadd.f32 %v6345_v1, %v3006_v8  ;;  %v3058_v48 = vmul.f32 0.5, %v3004_v35 }
 0x27c   : > { %v3124_v18 = vmul.f32 %v3092_v61, %v3012_v57  ;;  %v3093_v26 = vmul.f32 0.044715, %v3015_v19  ;;  %v3061_v39 = vmul.f32 0.5, %v3015_v19  ;;  %v6620_v61 = vld [vmem:[%s6908_s10] ss:$0 sm:$0xff] }
 0x27d   : > { %v3122_v4 = vmul.f32 %v3090_v29, %v3004_v35  ;;  %v3091_v44 = vmul.f32 0.044715, %v3007_v47  ;;  %v3059_v15 = vmul.f32 0.5, %v3007_v47 }
 0x27e   : > { %v3156_v2 = vmul.f32 %v3124_v18, %v3012_v57  ;;  %v3125_v59 = vmul.f32 %v3093_v26, %v3015_v19 }
 0x27f   : > { %v3154_v12 = vmul.f32 %v3122_v4, %v3004_v35  ;;  %v3123_v17 = vmul.f32 %v3091_v44, %v3007_v47 }
 0x280   : > { %v3188_v14 = vadd.f32 %v3156_v2, %v3012_v57  ;;  %v3157_v10 = vmul.f32 %v3125_v59, %v3015_v19 }
 0x281   : > { %v3186_v55 = vadd.f32 %v3154_v12, %v3004_v35  ;;  %v3155_v33 = vmul.f32 %v3123_v17, %v3007_v47 }
 0x282   : > { %v3220_v54 = vmul.f32 0.7978846, %v3188_v14  ;;  %v3189_v13 = vadd.f32 %v3157_v10, %v3015_v19 }
 0x283   : > { %v3218_v56 = vmul.f32 0.7978846, %v3186_v55  ;;  %v3187_v27 = vadd.f32 %v3155_v33, %v3007_v47 }
 0x284   : > { %4383 = vtanh.f32 %v3220_v54  ;;  %v3221_v5 = vmul.f32 0.7978846, %v3189_v13 }
 0x285   : > { %4385 = vtanh.f32 %v3218_v56  ;;  %v3219_v0 = vmul.f32 0.7978846, %v3187_v27 }
 0x286   : > { %4387 = vtanh.f32 %v3221_v5 }
 0x287   : > { %4389 = vtanh.f32 %v3219_v0 }
 0x28e   : > { %v4384_v11 = vpop.eup %4383 }
 0x28f   : > { %v4386_v49 = vpop.eup %4385  ;;  %v3284_v58 = vadd.f32 1.0, %v4384_v11 }
 0x290   : > { %v4388_v53 = vpop.eup %4387  ;;  %v3282_v9 = vadd.f32 1.0, %v4386_v49 }
 0x291   : > { %v4390_v52 = vpop.eup %4389  ;;  %v3285_v6 = vadd.f32 1.0, %v4388_v53  ;;  %v3316_v21 = vmul.f32 %v3284_v58, %v3060_v46 }
 0x292   : > { %v3283_v51 = vadd.f32 1.0, %v4390_v52  ;;  %v3314_v16 = vmul.f32 %v3282_v9, %v3058_v48 }
 0x293   : > { %v3317_v41 = vmul.f32 %v3285_v6, %v3061_v39  ;;  %v3355_v36 = vmul.f32 %v6465_v38, %v3316_v21 }
 0x294   : > { %v3315_v60 = vmul.f32 %v3283_v51, %v3059_v15  ;;  %v3353_v62 = vmul.f32 %v6465_v38, %v3314_v16 }
 0x295   : > { %v3356_v25 = vmul.f32 %v6465_v38, %v3317_v41  ;;  %v3394_v23 = vadd.f32 %v6475_v24, %v3355_v36 }
 0x296   : > { %v3354_v7 = vmul.f32 %v6465_v38, %v3315_v60  ;;  %v3392_v28 = vadd.f32 %v6475_v24, %v3353_v62 }
 0x297   : > { %v3395_v34 = vadd.f32 %v6475_v24, %v3356_v25 }
 0x298   : > { %v3393_v40 = vadd.f32 %v6475_v24, %v3354_v7 }
 0x299   : > { %v3413_v43 = vpack.c.bf16 %v3395_v34, %v3394_v23 }
 0x29a   : > { %v3412_v32 = vpack.c.bf16 %v3393_v40, %v3392_v28 }
 0x29c   : > { %4252 = vmatprep.mubr.msk.bf16.mxu1 %vm3431_vm5, %v3412_v32 }
 0x29d   : > { %4253 = vmatmul.mubr.msk.bf16.gmra.mrb[24].mxu1 %vm3431_vm5, %v3413_v43 }
 0x2a3   : > { %v4230_v18 = vpop.f32.mrb[0].mxu1 }
 0x2a4   : > { %v3514_v44 = vpop.f32.mrb[1].mxu1 }
 0x2a5   : > { %v6630_v12 = vadd.f32 %v6620_v61, %v3514_v44  ;;  %v4231_v17 = vpop.f32.mrb[2].mxu1 }
 0x2a6   : > { %v3517_v33 = vpop.f32.mrb[3].mxu1  ;;  %v6639_v11 = vadd.f32 %v4231_v17, %v6620_v61 }
 0x2a7   : > { %v4224_v30 = vpop.f32.mrb[28].mxu0  ;;  %v3673_v56 = vmul.f32 0.044715, %v6630_v12  ;;  %v6643_v58 = vadd.f32 %v6620_v61, %v3517_v33 }
 0x2a8   : > { %v3028_v45 = vadd.f32 %v4224_v30, %v6345_v1  ;;  %v3019_v22 = vpop.f32.mrb[29].mxu0  ;;  %v3676_v52 = vmul.f32 0.044715, %v6639_v11 }
 0x2a9   : > { %v3020_v31 = vadd.f32 %v6345_v1, %v3019_v22  ;;  %v4225_v3 = vpop.f32.mrb[30].mxu0  ;;  %v3705_v46 = vmul.f32 %v3673_v56, %v6630_v12  ;;  %v3674_v21 = vmul.f32 0.044715, %v6643_v58 }
 0x2aa   : > { %v3096_v42 = vmul.f32 0.044715, %v3028_v45  ;;  %v6611_v50 = vadd.f32 %v4225_v3, %v6345_v1  ;;  %v3022_v63 = vpop.f32.mrb[31].mxu0  ;;  %v3708_v41 = vmul.f32 %v3676_v52, %v6639_v11  ;;  %v3064_v62 = vmul.f32 0.5, %v3028_v45 }
 0x2ab   : > { %v3094_v57 = vmul.f32 0.044715, %v3020_v31  ;;  %v6614_v20 = vadd.f32 %v6345_v1, %v3022_v63  ;;  %v6626_v1 = vadd.f32 %v4230_v18, %v6620_v61  ;;  %v3737_v9 = vmul.f32 %v3705_v46, %v6630_v12  ;;  %v4234_v39 = vpop.f32.mrb[4].mxu1 }
 0x2ac   : > { %v3128_v35 = vmul.f32 %v3096_v42, %v3028_v45  ;;  %v3097_v37 = vmul.f32 0.044715, %v6611_v50  ;;  %v6651_v15 = vadd.f32 %v4234_v39, %v6620_v61  ;;  %v3530_v51 = vpop.f32.mrb[5].mxu1  ;;  %v3706_v7 = vmul.f32 %v3674_v21, %v6643_v58 }
 0x2ad   : > { %v3126_v19 = vmul.f32 %v3094_v57, %v3020_v31  ;;  %v3095_v8 = vmul.f32 0.044715, %v6614_v20  ;;  %v3675_v55 = vmul.f32 0.044715, %v6626_v1  ;;  %v3769_v16 = vadd.f32 %v3737_v9, %v6630_v12  ;;  %v4235_v60 = vpop.f32.mrb[6].mxu1 }
 0x2ae   : > { %v3160_v29 = vmul.f32 %v3128_v35, %v3028_v45  ;;  %v3129_v47 = vmul.f32 %v3097_v37, %v6611_v50  ;;  %v6656_v36 = vadd.f32 %v6620_v61, %v3530_v51  ;;  %v3679_v23 = vmul.f32 0.044715, %v6651_v15  ;;  %v3533_v34 = vpop.f32.mrb[7].mxu1 }
 0x2af   : > { %v3158_v26 = vmul.f32 %v3126_v19, %v3020_v31  ;;  %v3127_v4 = vmul.f32 %v3095_v8, %v6614_v20  ;;  %v3707_v0 = vmul.f32 %v3675_v55, %v6626_v1  ;;  %v3062_v28 = vmul.f32 0.5, %v3020_v31 }
 0x2b0   : > { %v3192_v2 = vadd.f32 %v3160_v29, %v3028_v45  ;;  %v3161_v59 = vmul.f32 %v3129_v47, %v6611_v50  ;;  %v3801_v40 = vmul.f32 0.7978846, %v3769_v16  ;;  %v3740_v43 = vmul.f32 %v3708_v41, %v6639_v11 }
 0x2b1   : > { %v3190_v14 = vadd.f32 %v3158_v26, %v3020_v31  ;;  %v3159_v10 = vmul.f32 %v3127_v4, %v6614_v20  ;;  %v3739_v48 = vmul.f32 %v3707_v0, %v6626_v1  ;;  %v3677_v32 = vmul.f32 0.044715, %v6656_v36 }
 0x2b2   : > { %v3224_v54 = vmul.f32 0.7978846, %v3192_v2  ;;  %v3193_v13 = vadd.f32 %v3161_v59, %v6611_v50  ;;  %v3738_v30 = vmul.f32 %v3706_v7, %v6643_v58  ;;  %v3711_v22 = vmul.f32 %v3679_v23, %v6651_v15  ;;  %v6698_v23 = vld [vmem:[%s6909_s11] ss:$0 sm:$0xff] }
 0x2b3   : > { %v3222_v27 = vmul.f32 0.7978846, %v3190_v14  ;;  %v3191_v5 = vadd.f32 %v3159_v10, %v6614_v20  ;;  %v3771_v6 = vadd.f32 %v3739_v48, %v6626_v1  ;;  %v6665_v3 = vadd.f32 %v4235_v60, %v6620_v61 }
 0x2b4   : > { %4391 = vtanh.f32 %v3224_v54  ;;  %v3225_v49 = vmul.f32 0.7978846, %v3193_v13  ;;  %v3772_v45 = vadd.f32 %v3740_v43, %v6639_v11  ;;  %v3709_v42 = vmul.f32 %v3677_v32, %v6656_v36  ;;  %v6705_v43 = vld [vmem:[%s6910_s12] ss:$0 sm:$0xff] }
 0x2b5   : > { %4393 = vtanh.f32 %v3222_v27  ;;  %v3223_v53 = vmul.f32 0.7978846, %v3191_v5  ;;  %v3803_v25 = vmul.f32 0.7978846, %v3771_v6  ;;  %v6670_v31 = vadd.f32 %v6620_v61, %v3533_v34 }
 0x2b6   : > { %4395 = vtanh.f32 %v3225_v49  ;;  %v3065_v63 = vmul.f32 0.5, %v6611_v50  ;;  %v3770_v57 = vadd.f32 %v3738_v30, %v6643_v58  ;;  %v3743_v35 = vmul.f32 %v3711_v22, %v6651_v15 }
 0x2b7   : > { %4397 = vtanh.f32 %v3223_v53  ;;  %v3680_v37 = vmul.f32 0.044715, %v6665_v3  ;;  %v3063_v8 = vmul.f32 0.5, %v6614_v20  ;;  %v3804_v29 = vmul.f32 0.7978846, %v3772_v45 }
 0x2b8   : > { %4399 = vtanh.f32 %v3803_v25  ;;  %v3741_v47 = vmul.f32 %v3709_v42, %v6656_v36  ;;  %v3678_v18 = vmul.f32 0.044715, %v6670_v31  ;;  %v3802_v44 = vmul.f32 0.7978846, %v3770_v57 }
 0x2b9   : > { %4401 = vtanh.f32 %v3801_v40  ;;  %v3775_v2 = vadd.f32 %v3743_v35, %v6651_v15  ;;  %v3712_v50 = vmul.f32 %v3680_v37, %v6665_v3  ;;  %v3643_v6 = vmul.f32 0.5, %v6626_v1 }
 0x2ba   : > { %4403 = vtanh.f32 %v3804_v29  ;;  %v3773_v14 = vadd.f32 %v3741_v47, %v6656_v36  ;;  %v3710_v10 = vmul.f32 %v3678_v18, %v6670_v31  ;;  %v3641_v60 = vmul.f32 0.5, %v6630_v12 }
 0x2bb   : > { %4405 = vtanh.f32 %v3802_v44  ;;  %v3807_v54 = vmul.f32 0.7978846, %v3775_v2  ;;  %v3744_v5 = vmul.f32 %v3712_v50, %v6665_v3  ;;  %v3642_v37 = vmul.f32 0.5, %v6643_v58 }
 0x2bc   : > { %v3805_v27 = vmul.f32 0.7978846, %v3773_v14  ;;  %v3742_v46 = vmul.f32 %v3710_v10, %v6670_v31  ;;  %v3645_v44 = vmul.f32 0.5, %v6656_v36  ;;  %v3648_v36 = vmul.f32 0.5, %v6665_v3 }
 0x2bd   : > { %4407 = vtanh.f32 %v3807_v54  ;;  %v3776_v9 = vadd.f32 %v3744_v5, %v6665_v3 }
 0x2be   : > { %v4392_v19 = vpop.eup %4391  ;;  %4409 = vtanh.f32 %v3805_v27  ;;  %v3774_v21 = vadd.f32 %v3742_v46, %v6670_v31 }
 0x2bf   : > { %v4394_v26 = vpop.eup %4393  ;;  %v3288_v4 = vadd.f32 1.0, %v4392_v19 }
 0x2c0   : > { %v4396_v59 = vpop.eup %4395  ;;  %v3286_v17 = vadd.f32 1.0, %v4394_v26  ;;  %v3806_v34 = vmul.f32 0.7978846, %v3774_v21 }
 0x2c1   : > { %v4398_v20 = vpop.eup %4397  ;;  %v3289_v55 = vadd.f32 1.0, %v4396_v59  ;;  %v3320_v33 = vmul.f32 %v3288_v4, %v3064_v62  ;;  %v3808_v62 = vmul.f32 0.7978846, %v3776_v9 }
 0x2c2   : > { %v3287_v13 = vadd.f32 1.0, %v4398_v20  ;;  %v3318_v56 = vmul.f32 %v3286_v17, %v3062_v28  ;;  %v4400_v52 = vpop.eup %4399 }
 0x2c3   : > { %v3321_v0 = vmul.f32 %v3289_v55, %v3065_v63  ;;  %v3359_v49 = vmul.f32 %v6465_v38, %v3320_v33  ;;  %v4402_v51 = vpop.eup %4401  ;;  %v3867_v41 = vadd.f32 1.0, %v4400_v52  ;;  %4411 = vtanh.f32 %v3808_v62 }
 0x2c4   : > { %v3319_v53 = vmul.f32 %v3287_v13, %v3063_v8  ;;  %v3357_v48 = vmul.f32 %v6465_v38, %v3318_v56  ;;  %v3865_v1 = vadd.f32 1.0, %v4402_v51  ;;  %4413 = vtanh.f32 %v3806_v34  ;;  %v4404_v30 = vpop.eup %4403 }
 0x2c5   : > { %v3360_v39 = vmul.f32 %v6465_v38, %v3321_v0  ;;  %v3398_v25 = vadd.f32 %v6475_v24, %v3359_v49  ;;  %v3899_v40 = vmul.f32 %v3867_v41, %v3643_v6  ;;  %v4406_v42 = vpop.eup %4405  ;;  %v3644_v63 = vmul.f32 0.5, %v6639_v11 }
 0x2c6   : > { %v3358_v16 = vmul.f32 %v6465_v38, %v3319_v53  ;;  %v3396_v28 = vadd.f32 %v6475_v24, %v3357_v48  ;;  %v3897_v32 = vmul.f32 %v3865_v1, %v3641_v60  ;;  %v3868_v57 = vadd.f32 1.0, %v4404_v30 }
 0x2c7   : > { %v3399_v7 = vadd.f32 %v6475_v24, %v3360_v39  ;;  %v3938_v45 = vmul.f32 %v6698_v23, %v3899_v40  ;;  %v3866_v19 = vadd.f32 1.0, %v4406_v42  ;;  %v4408_v8 = vpop.eup %4407  ;;  %v3647_v11 = vmul.f32 0.5, %v6651_v15 }
 0x2c8   : > { %v3397_v38 = vadd.f32 %v6475_v24, %v3358_v16  ;;  %v3936_v24 = vmul.f32 %v6698_v23, %v3897_v32  ;;  %v3900_v47 = vmul.f32 %v3868_v57, %v3644_v63  ;;  %v4410_v18 = vpop.eup %4409  ;;  %v3871_v4 = vadd.f32 1.0, %v4408_v8 }
 0x2c9   : > { %v3415_v12 = vpack.c.bf16 %v3399_v7, %v3398_v25  ;;  %v3977_v35 = vadd.f32 %v6705_v43, %v3938_v45  ;;  %v3898_v26 = vmul.f32 %v3866_v19, %v3642_v37  ;;  %v3869_v2 = vadd.f32 1.0, %v4410_v18 }
 0x2ca   : > { %v3414_v22 = vpack.c.bf16 %v3397_v38, %v3396_v28  ;;  %v3975_v29 = vadd.f32 %v6705_v43, %v3936_v24  ;;  %v3939_v58 = vmul.f32 %v6698_v23, %v3900_v47  ;;  %v3903_v59 = vmul.f32 %v3871_v4, %v3647_v11 }
 0x2cb   : > { %4009 = vst.msk [vmem:[%s6713_s20 + $0x10] sm:$0xff] %vm474_vm1, %v3977_v35  ;;  %v3937_v50 = vmul.f32 %v6698_v23, %v3898_v26  ;;  %v3901_v14 = vmul.f32 %v3869_v2, %v3645_v44  ;;  %v3646_v56 = vmul.f32 0.5, %v6670_v31  ;;  %v4238_v31 = vpop.f32.mrb[8].mxu1 }
 0x2cc   : > { %4256 = vmatprep.mubr.msk.bf16.mxu1 %vm3431_vm5, %v3414_v22  ;;  %4007 = vst.msk [vmem:[%s6713_s20] sm:$0xff] %vm474_vm1, %v3975_v29  ;;  %v3978_v17 = vadd.f32 %v6705_v43, %v3939_v58  ;;  %v3942_v20 = vmul.f32 %v6698_v23, %v3903_v59  ;;  %v3555_v9 = vadd.f32 %v4238_v31, %v6620_v61  ;;  %v3546_v52 = vpop.f32.mrb[9].mxu1 }
 0x2cd   : > { %4257 = vmatmul.mubr.msk.bf16.gmra.mrb[28].mxu1 %vm3431_vm5, %v3415_v12  ;;  %v4412_v10 = vpop.eup %4411  ;;  %v3976_v15 = vadd.f32 %v6705_v43, %v3937_v50  ;;  %v3940_v33 = vmul.f32 %v6698_v23, %v3901_v14  ;;  %v3547_v39 = vadd.f32 %v6620_v61, %v3546_v52  ;;  %v4239_v6 = vpop.f32.mrb[10].mxu1 }
 0x2ce   : > { %v4414_v55 = vpop.eup %4413  ;;  %4010 = vst.msk [vmem:[%s6713_s20 + $0x18] sm:$0xff] %vm474_vm1, %v3978_v17  ;;  %v3872_v54 = vadd.f32 1.0, %v4412_v10  ;;  %v3981_v13 = vadd.f32 %v6705_v43, %v3942_v20  ;;  %v3683_v21 = vmul.f32 0.044715, %v3555_v9  ;;  %v3558_v51 = vadd.f32 %v4239_v6, %v6620_v61  ;;  %v3549_v16 = vpop.f32.mrb[11].mxu1 }
 0x2cf   : > { %4008 = vst.msk [vmem:[%s6713_s20 + $0x8] sm:$0xff] %vm474_vm1, %v3976_v15  ;;  %v3870_v27 = vadd.f32 1.0, %v4414_v55  ;;  %v3979_v5 = vadd.f32 %v6705_v43, %v3940_v33  ;;  %v3681_v41 = vmul.f32 0.044715, %v3547_v39  ;;  %v3550_v60 = vadd.f32 %v6620_v61, %v3549_v16 }
 0x2d0   : > { %v3904_v0 = vmul.f32 %v3872_v54, %v3648_v36  ;;  %4013 = vst.msk [vmem:[%s6713_s20 + $0x30] sm:$0xff] %vm474_vm1, %v3981_v13  ;;  %v3715_v62 = vmul.f32 %v3683_v21, %v3555_v9  ;;  %v3684_v25 = vmul.f32 0.044715, %v3558_v51  ;;  %v3651_v8 = vmul.f32 0.5, %v3555_v9 }
 0x2d1   : > { %v3902_v49 = vmul.f32 %v3870_v27, %v3646_v56  ;;  %4011 = vst.msk [vmem:[%s6713_s20 + $0x20] sm:$0xff] %vm474_vm1, %v3979_v5  ;;  %v3713_v7 = vmul.f32 %v3681_v41, %v3547_v39  ;;  %v3682_v1 = vmul.f32 0.044715, %v3550_v60  ;;  %v3649_v18 = vmul.f32 0.5, %v3547_v39 }
 0x2d2   : > { %v3943_v46 = vmul.f32 %v6698_v23, %v3904_v0  ;;  %v3747_v34 = vmul.f32 %v3715_v62, %v3555_v9  ;;  %v3716_v28 = vmul.f32 %v3684_v25, %v3558_v51  ;;  %v3652_v58 = vmul.f32 0.5, %v3558_v51 }
 0x2d3   : > { %v3941_v3 = vmul.f32 %v6698_v23, %v3902_v49  ;;  %v3745_v38 = vmul.f32 %v3713_v7, %v3547_v39  ;;  %v3714_v40 = vmul.f32 %v3682_v1, %v3550_v60  ;;  %v3650_v50 = vmul.f32 0.5, %v3550_v60 }
 0x2d4   : > { %v3982_v53 = vadd.f32 %v6705_v43, %v3943_v46  ;;  %v3779_v12 = vadd.f32 %v3747_v34, %v3555_v9  ;;  %v3748_v32 = vmul.f32 %v3716_v28, %v3558_v51 }
 0x2d5   : > { %v3980_v48 = vadd.f32 %v6705_v43, %v3941_v3  ;;  %v3777_v30 = vadd.f32 %v3745_v38, %v3547_v39  ;;  %v3746_v22 = vmul.f32 %v3714_v40, %v3550_v60 }
 0x2d6   : > { %4014 = vst.msk [vmem:[%s6713_s20 + $0x38] sm:$0xff] %vm474_vm1, %v3982_v53  ;;  %v3811_v45 = vmul.f32 0.7978846, %v3779_v12  ;;  %v3780_v42 = vadd.f32 %v3748_v32, %v3558_v51 }
 0x2d7   : > { %4012 = vst.msk [vmem:[%s6713_s20 + $0x28] sm:$0xff] %vm474_vm1, %v3980_v48  ;;  %v3809_v24 = vmul.f32 0.7978846, %v3777_v30  ;;  %v3778_v63 = vadd.f32 %v3746_v22, %v3550_v60 }
 0x2d8   : > { %4415 = vtanh.f32 %v3811_v45  ;;  %v3812_v57 = vmul.f32 0.7978846, %v3780_v42 }
 0x2d9   : > { %4417 = vtanh.f32 %v3809_v24  ;;  %v3810_v35 = vmul.f32 0.7978846, %v3778_v63 }
 0x2da   : > { %4419 = vtanh.f32 %v3812_v57 }
 0x2db   : > { %4421 = vtanh.f32 %v3810_v35 }
 0x2df   : > { %v4242_v17 = vpop.f32.mrb[12].mxu1 }
 0x2e0   : > { %v3571_v15 = vadd.f32 %v4242_v17, %v6620_v61  ;;  %v3562_v20 = vpop.f32.mrb[13].mxu1 }
 0x2e1   : > { %v6762_v36 = vadd.f32 %v6620_v61, %v3562_v20  ;;  %v4243_v54 = vpop.f32.mrb[14].mxu1 }
 0x2e2   : > { %v4416_v37 = vpop.eup %4415  ;;  %v3687_v27 = vmul.f32 0.044715, %v3571_v15  ;;  %v3565_v5 = vpop.f32.mrb[15].mxu1  ;;  %v3574_v48 = vadd.f32 %v4243_v54, %v6620_v61 }
 0x2e3   : > { %v4418_v19 = vpop.eup %4417  ;;  %v3875_v29 = vadd.f32 1.0, %v4416_v37  ;;  %v3685_v46 = vmul.f32 0.044715, %v6762_v36  ;;  %v3566_v31 = vadd.f32 %v6620_v61, %v3565_v5 }
 0x2e4   : > { %v4420_v47 = vpop.eup %4419  ;;  %v3873_v26 = vadd.f32 1.0, %v4418_v19  ;;  %v3719_v53 = vmul.f32 %v3687_v27, %v3571_v15  ;;  %v3688_v6 = vmul.f32 0.044715, %v3574_v48  ;;  %v3656_v54 = vmul.f32 0.5, %v3574_v48 }
 0x2e5   : > { %v4422_v11 = vpop.eup %4421  ;;  %v3907_v4 = vmul.f32 %v3875_v29, %v3651_v8  ;;  %v3876_v44 = vadd.f32 1.0, %v4420_v47  ;;  %v3717_v52 = vmul.f32 %v3685_v46, %v6762_v36  ;;  %v3686_v51 = vmul.f32 0.044715, %v3566_v31 }
 0x2e6   : > { %v3905_v2 = vmul.f32 %v3873_v26, %v3649_v18  ;;  %v3874_v59 = vadd.f32 1.0, %v4422_v11  ;;  %v3751_v39 = vmul.f32 %v3719_v53, %v3571_v15  ;;  %v3720_v41 = vmul.f32 %v3688_v6, %v3574_v48 }
 0x2e7   : > { %v3946_v14 = vmul.f32 %v6698_v23, %v3907_v4  ;;  %v3908_v10 = vmul.f32 %v3876_v44, %v3652_v58  ;;  %v3749_v21 = vmul.f32 %v3717_v52, %v6762_v36  ;;  %v3718_v62 = vmul.f32 %v3686_v51, %v3566_v31 }
 0x2e8   : > { %v3944_v55 = vmul.f32 %v6698_v23, %v3905_v2  ;;  %v3906_v33 = vmul.f32 %v3874_v59, %v3650_v50  ;;  %v3783_v16 = vadd.f32 %v3751_v39, %v3571_v15  ;;  %v3752_v7 = vmul.f32 %v3720_v41, %v3574_v48 }
 0x2e9   : > { %v3985_v13 = vadd.f32 %v6705_v43, %v3946_v14  ;;  %v3947_v56 = vmul.f32 %v6698_v23, %v3908_v10  ;;  %v3781_v60 = vadd.f32 %v3749_v21, %v6762_v36  ;;  %v3750_v34 = vmul.f32 %v3718_v62, %v3566_v31 }
 0x2ea   : > { %v3983_v0 = vadd.f32 %v6705_v43, %v3944_v55  ;;  %v3945_v49 = vmul.f32 %v6698_v23, %v3906_v33  ;;  %v3815_v25 = vmul.f32 0.7978846, %v3783_v16  ;;  %v3784_v28 = vadd.f32 %v3752_v7, %v3574_v48 }
 0x2eb   : > { %4017 = vst.msk [vmem:[%s6713_s20 + $0x50] sm:$0xff] %vm474_vm1, %v3985_v13  ;;  %v3986_v3 = vadd.f32 %v6705_v43, %v3947_v56  ;;  %v3813_v1 = vmul.f32 0.7978846, %v3781_v60  ;;  %v3782_v38 = vadd.f32 %v3750_v34, %v3566_v31  ;;  %v3655_v2 = vmul.f32 0.5, %v3571_v15 }
 0x2ec   : > { %4015 = vst.msk [vmem:[%s6713_s20 + $0x40] sm:$0xff] %vm474_vm1, %v3983_v0  ;;  %v3984_v9 = vadd.f32 %v6705_v43, %v3945_v49  ;;  %4423 = vtanh.f32 %v3815_v25  ;;  %v3816_v40 = vmul.f32 0.7978846, %v3784_v28  ;;  %v3653_v14 = vmul.f32 0.5, %v6762_v36 }
 0x2ed   : > { %4018 = vst.msk [vmem:[%s6713_s20 + $0x58] sm:$0xff] %vm474_vm1, %v3986_v3  ;;  %4425 = vtanh.f32 %v3813_v1  ;;  %v3814_v32 = vmul.f32 0.7978846, %v3782_v38  ;;  %v3654_v0 = vmul.f32 0.5, %v3566_v31 }
 0x2ee   : > { %4016 = vst.msk [vmem:[%s6713_s20 + $0x48] sm:$0xff] %vm474_vm1, %v3984_v9  ;;  %4427 = vtanh.f32 %v3816_v40 }
 0x2ef   : > { %4429 = vtanh.f32 %v3814_v32 }
 0x2f6   : > { %v4424_v11 = vpop.eup %4423 }
 0x2f7   : > { %v4426_v44 = vpop.eup %4425  ;;  %v3879_v50 = vadd.f32 1.0, %v4424_v11 }
 0x2f8   : > { %v3877_v10 = vadd.f32 1.0, %v4426_v44  ;;  %v4428_v27 = vpop.eup %4427 }
 0x2f9   : > { %v3911_v33 = vmul.f32 %v3879_v50, %v3655_v2  ;;  %v4430_v46 = vpop.eup %4429  ;;  %v3880_v36 = vadd.f32 1.0, %v4428_v27 }
 0x2fa   : > { %v3909_v5 = vmul.f32 %v3877_v10, %v3653_v14  ;;  %v3878_v48 = vadd.f32 1.0, %v4430_v46 }
 0x2fb   : > { %v3950_v3 = vmul.f32 %v6698_v23, %v3911_v33  ;;  %v3912_v39 = vmul.f32 %v3880_v36, %v3656_v54 }
 0x2fc   : > { %v3948_v9 = vmul.f32 %v6698_v23, %v3909_v5  ;;  %v3910_v21 = vmul.f32 %v3878_v48, %v3654_v0 }
 0x2fd   : > { %v3989_v31 = vadd.f32 %v6705_v43, %v3950_v3  ;;  %v3951_v51 = vmul.f32 %v6698_v23, %v3912_v39 }
 0x2fe   : > { %v3987_v6 = vadd.f32 %v6705_v43, %v3948_v9  ;;  %v3949_v16 = vmul.f32 %v6698_v23, %v3910_v21 }
 0x2ff   : > { %4021 = vst.msk [vmem:[%s6713_s20 + $0x70] sm:$0xff] %vm474_vm1, %v3989_v31  ;;  %v3990_v41 = vadd.f32 %v6705_v43, %v3951_v51 }
 0x300   : > { %4019 = vst.msk [vmem:[%s6713_s20 + $0x60] sm:$0xff] %vm474_vm1, %v3987_v6  ;;  %v3988_v60 = vadd.f32 %v6705_v43, %v3949_v16 }
 0x301   : > { %4022 = vst.msk [vmem:[%s6713_s20 + $0x78] sm:$0xff] %vm474_vm1, %v3990_v41 }
 0x302   : > { %4020 = vst.msk [vmem:[%s6713_s20 + $0x68] sm:$0xff] %vm474_vm1, %v3988_v60 }
 0x30f   : > { %v4246_v12 = vpop.f32.mrb[16].mxu1 }
 0x310   : > { %v3587_v30 = vadd.f32 %v4246_v12, %v6620_v61  ;;  %v3578_v22 = vpop.f32.mrb[17].mxu1 }
 0x311   : > { %v3579_v45 = vadd.f32 %v6620_v61, %v3578_v22  ;;  %v4247_v42 = vpop.f32.mrb[18].mxu1 }
 0x312   : > { %v3691_v24 = vmul.f32 0.044715, %v3587_v30  ;;  %v6787_v63 = vadd.f32 %v4247_v42, %v6620_v61  ;;  %v3581_v57 = vpop.f32.mrb[19].mxu1  ;;  %v3659_v7 = vmul.f32 0.5, %v3587_v30 }
 0x313   : > { %v3689_v35 = vmul.f32 0.044715, %v3579_v45  ;;  %v6790_v37 = vadd.f32 %v6620_v61, %v3581_v57  ;;  %v3657_v28 = vmul.f32 0.5, %v3579_v45 }
 0x314   : > { %v3723_v19 = vmul.f32 %v3691_v24, %v3587_v30  ;;  %v3692_v8 = vmul.f32 0.044715, %v6787_v63  ;;  %v3660_v32 = vmul.f32 0.5, %v6787_v63 }
 0x315   : > { %v3721_v29 = vmul.f32 %v3689_v35, %v3579_v45  ;;  %v3690_v47 = vmul.f32 0.044715, %v6790_v37  ;;  %v3658_v24 = vmul.f32 0.5, %v6790_v37 }
 0x316   : > { %v3755_v18 = vmul.f32 %v3723_v19, %v3587_v30  ;;  %v3724_v26 = vmul.f32 %v3692_v8, %v6787_v63 }
 0x317   : > { %v3753_v4 = vmul.f32 %v3721_v29, %v3579_v45  ;;  %v3722_v58 = vmul.f32 %v3690_v47, %v6790_v37 }
 0x318   : > { %v3787_v59 = vadd.f32 %v3755_v18, %v3587_v30  ;;  %v3756_v17 = vmul.f32 %v3724_v26, %v6787_v63 }
 0x319   : > { %v3785_v20 = vadd.f32 %v3753_v4, %v3579_v45  ;;  %v3754_v55 = vmul.f32 %v3722_v58, %v6790_v37 }
 0x31a   : > { %v3819_v13 = vmul.f32 0.7978846, %v3787_v59  ;;  %v3788_v56 = vadd.f32 %v3756_v17, %v6787_v63 }
 0x31b   : > { %v3817_v49 = vmul.f32 0.7978846, %v3785_v20  ;;  %v3786_v15 = vadd.f32 %v3754_v55, %v6790_v37 }
 0x31c   : > { %4431 = vtanh.f32 %v3819_v13  ;;  %v3820_v53 = vmul.f32 0.7978846, %v3788_v56 }
 0x31d   : > { %4433 = vtanh.f32 %v3817_v49  ;;  %v3818_v52 = vmul.f32 0.7978846, %v3786_v15 }
 0x31e   : > { %4435 = vtanh.f32 %v3820_v53 }
 0x31f   : > { %4437 = vtanh.f32 %v3818_v52 }
 0x326   : > { %v4432_v62 = vpop.eup %4431 }
 0x327   : > { %v4434_v25 = vpop.eup %4433  ;;  %v3883_v1 = vadd.f32 1.0, %v4432_v62 }
 0x328   : > { %v4436_v34 = vpop.eup %4435  ;;  %v3881_v38 = vadd.f32 1.0, %v4434_v25 }
 0x329   : > { %v4438_v40 = vpop.eup %4437  ;;  %v3915_v12 = vmul.f32 %v3883_v1, %v3659_v7  ;;  %v3884_v22 = vadd.f32 1.0, %v4436_v34 }
 0x32a   : > { %v3913_v42 = vmul.f32 %v3881_v38, %v3657_v28  ;;  %v3882_v57 = vadd.f32 1.0, %v4438_v40 }
 0x32b   : > { %v3954_v35 = vmul.f32 %v6698_v23, %v3915_v12  ;;  %v3916_v30 = vmul.f32 %v3884_v22, %v3660_v32 }
 0x32c   : > { %v3952_v19 = vmul.f32 %v6698_v23, %v3913_v42  ;;  %v3914_v45 = vmul.f32 %v3882_v57, %v3658_v24 }
 0x32d   : > { %v3993_v8 = vadd.f32 %v6705_v43, %v3954_v35  ;;  %v3955_v29 = vmul.f32 %v6698_v23, %v3916_v30 }
 0x32e   : > { %v3991_v47 = vadd.f32 %v6705_v43, %v3952_v19  ;;  %v3953_v63 = vmul.f32 %v6698_v23, %v3914_v45 }
 0x32f   : > { %4025 = vst.msk [vmem:[%s6713_s20 + $0x90] sm:$0xff] %vm474_vm1, %v3993_v8  ;;  %v3994_v18 = vadd.f32 %v6705_v43, %v3955_v29 }
 0x330   : > { %4023 = vst.msk [vmem:[%s6713_s20 + $0x80] sm:$0xff] %vm474_vm1, %v3991_v47  ;;  %v3992_v37 = vadd.f32 %v6705_v43, %v3953_v63 }
 0x331   : > { %4026 = vst.msk [vmem:[%s6713_s20 + $0x98] sm:$0xff] %vm474_vm1, %v3994_v18 }
 0x332   : > { %4024 = vst.msk [vmem:[%s6713_s20 + $0x88] sm:$0xff] %vm474_vm1, %v3992_v37 }
 0x340   : > { %v4250_v26 = vpop.f32.mrb[20].mxu1 }
 0x341   : > { %v3603_v11 = vadd.f32 %v4250_v26, %v6620_v61  ;;  %v3594_v4 = vpop.f32.mrb[21].mxu1 }
 0x342   : > { %v3595_v58 = vadd.f32 %v6620_v61, %v3594_v4  ;;  %v4251_v44 = vpop.f32.mrb[22].mxu1 }
 0x343   : > { %v3695_v2 = vmul.f32 0.044715, %v3603_v11  ;;  %v3606_v50 = vadd.f32 %v4251_v44, %v6620_v61  ;;  %v3597_v59 = vpop.f32.mrb[23].mxu1  ;;  %v3663_v39 = vmul.f32 0.5, %v3603_v11 }
 0x344   : > { %v3693_v17 = vmul.f32 0.044715, %v3595_v58  ;;  %v3598_v14 = vadd.f32 %v6620_v61, %v3597_v59  ;;  %v3661_v51 = vmul.f32 0.5, %v3595_v58 }
 0x345   : > { %v3727_v10 = vmul.f32 %v3695_v2, %v3603_v11  ;;  %v3696_v20 = vmul.f32 0.044715, %v3606_v50  ;;  %v3664_v62 = vmul.f32 0.5, %v3606_v50 }
 0x346   : > { %v3725_v55 = vmul.f32 %v3693_v17, %v3595_v58  ;;  %v3694_v33 = vmul.f32 0.044715, %v3598_v14  ;;  %v3662_v1 = vmul.f32 0.5, %v3598_v14 }
 0x347   : > { %v3759_v54 = vmul.f32 %v3727_v10, %v3603_v11  ;;  %v3728_v13 = vmul.f32 %v3696_v20, %v3606_v50 }
 0x348   : > { %v3757_v56 = vmul.f32 %v3725_v55, %v3595_v58  ;;  %v3726_v27 = vmul.f32 %v3694_v33, %v3598_v14 }
 0x349   : > { %v3791_v5 = vadd.f32 %v3759_v54, %v3603_v11  ;;  %v3760_v0 = vmul.f32 %v3728_v13, %v3606_v50 }
 0x34a   : > { %v3789_v49 = vadd.f32 %v3757_v56, %v3595_v58  ;;  %v3758_v15 = vmul.f32 %v3726_v27, %v3598_v14 }
 0x34b   : > { %v3823_v46 = vmul.f32 0.7978846, %v3791_v5  ;;  %v3792_v3 = vadd.f32 %v3760_v0, %v3606_v50 }
 0x34c   : > { %v3821_v36 = vmul.f32 0.7978846, %v3789_v49  ;;  %v3790_v53 = vadd.f32 %v3758_v15, %v3598_v14 }
 0x34d   : > { %4439 = vtanh.f32 %v3823_v46  ;;  %v3824_v9 = vmul.f32 0.7978846, %v3792_v3 }
 0x34e   : > { %4441 = vtanh.f32 %v3821_v36  ;;  %v3822_v48 = vmul.f32 0.7978846, %v3790_v53 }
 0x34f   : > { %4443 = vtanh.f32 %v3824_v9 }
 0x350   : > { %4445 = vtanh.f32 %v3822_v48 }
 0x357   : > { %v4440_v52 = vpop.eup %4439 }
 0x358   : > { %v4442_v31 = vpop.eup %4441  ;;  %v3887_v6 = vadd.f32 1.0, %v4440_v52 }
 0x359   : > { %v4444_v21 = vpop.eup %4443  ;;  %v3885_v16 = vadd.f32 1.0, %v4442_v31 }
 0x35a   : > { %v4446_v41 = vpop.eup %4445  ;;  %v3919_v60 = vmul.f32 %v3887_v6, %v3663_v39  ;;  %v3888_v25 = vadd.f32 1.0, %v4444_v21 }
 0x35b   : > { %v3917_v7 = vmul.f32 %v3885_v16, %v3661_v51  ;;  %v3886_v34 = vadd.f32 1.0, %v4446_v41 }
 0x35c   : > { %v3958_v28 = vmul.f32 %v6698_v23, %v3919_v60  ;;  %v3920_v38 = vmul.f32 %v3888_v25, %v3664_v62 }
 0x35d   : > { %v3956_v40 = vmul.f32 %v6698_v23, %v3917_v7  ;;  %v3918_v12 = vmul.f32 %v3886_v34, %v3662_v1 }
 0x35e   : > { %v3997_v32 = vadd.f32 %v6705_v43, %v3958_v28  ;;  %v3959_v22 = vmul.f32 %v6698_v23, %v3920_v38 }
 0x35f   : > { %v3995_v42 = vadd.f32 %v6705_v43, %v3956_v40  ;;  %v3957_v24 = vmul.f32 %v6698_v23, %v3918_v12 }
 0x360   : > { %4029 = vst.msk [vmem:[%s6713_s20 + $0xb0] sm:$0xff] %vm474_vm1, %v3997_v32  ;;  %v3998_v57 = vadd.f32 %v6705_v43, %v3959_v22 }
 0x361   : > { %4027 = vst.msk [vmem:[%s6713_s20 + $0xa0] sm:$0xff] %vm474_vm1, %v3995_v42  ;;  %v3996_v35 = vadd.f32 %v6705_v43, %v3957_v24 }
 0x362   : > { %4030 = vst.msk [vmem:[%s6713_s20 + $0xb8] sm:$0xff] %vm474_vm1, %v3998_v57 }
 0x363   : > { %4028 = vst.msk [vmem:[%s6713_s20 + $0xa8] sm:$0xff] %vm474_vm1, %v3996_v35 }
 0x370   : > { %v4254_v30 = vpop.f32.mrb[24].mxu1 }
 0x371   : > { %v3619_v19 = vadd.f32 %v4254_v30, %v6620_v61  ;;  %v3610_v45 = vpop.f32.mrb[25].mxu1 }
 0x372   : > { %v3611_v8 = vadd.f32 %v6620_v61, %v3610_v45  ;;  %v4255_v29 = vpop.f32.mrb[26].mxu1 }
 0x373   : > { %v3699_v47 = vmul.f32 0.044715, %v3619_v19  ;;  %v3622_v63 = vadd.f32 %v4255_v29, %v6620_v61  ;;  %v3613_v18 = vpop.f32.mrb[27].mxu1  ;;  %v3667_v15 = vmul.f32 0.5, %v3619_v19 }
 0x374   : > { %v3697_v37 = vmul.f32 0.044715, %v3611_v8  ;;  %v3614_v26 = vadd.f32 %v6620_v61, %v3613_v18  ;;  %v3665_v36 = vmul.f32 0.5, %v3611_v8 }
 0x375   : > { %v3731_v11 = vmul.f32 %v3699_v47, %v3619_v19  ;;  %v3700_v4 = vmul.f32 0.044715, %v3622_v63  ;;  %v3668_v52 = vmul.f32 0.5, %v3622_v63 }
 0x376   : > { %v3729_v58 = vmul.f32 %v3697_v37, %v3611_v8  ;;  %v3698_v44 = vmul.f32 0.044715, %v3614_v26  ;;  %v3666_v6 = vmul.f32 0.5, %v3614_v26 }
 0x377   : > { %v3763_v2 = vmul.f32 %v3731_v11, %v3619_v19  ;;  %v3732_v50 = vmul.f32 %v3700_v4, %v3622_v63 }
 0x378   : > { %v3761_v59 = vmul.f32 %v3729_v58, %v3611_v8  ;;  %v3730_v17 = vmul.f32 %v3698_v44, %v3614_v26 }
 0x379   : > { %v3795_v14 = vadd.f32 %v3763_v2, %v3619_v19  ;;  %v3764_v10 = vmul.f32 %v3732_v50, %v3622_v63 }
 0x37a   : > { %v3793_v20 = vadd.f32 %v3761_v59, %v3611_v8  ;;  %v3762_v55 = vmul.f32 %v3730_v17, %v3614_v26 }
 0x37b   : > { %v3827_v33 = vmul.f32 0.7978846, %v3795_v14  ;;  %v3796_v54 = vadd.f32 %v3764_v10, %v3622_v63 }
 0x37c   : > { %v3825_v13 = vmul.f32 0.7978846, %v3793_v20  ;;  %v3794_v56 = vadd.f32 %v3762_v55, %v3614_v26 }
 0x37d   : > { %4447 = vtanh.f32 %v3827_v33  ;;  %v3828_v27 = vmul.f32 0.7978846, %v3796_v54 }
 0x37e   : > { %4449 = vtanh.f32 %v3825_v13  ;;  %v3826_v5 = vmul.f32 0.7978846, %v3794_v56 }
 0x37f   : > { %4451 = vtanh.f32 %v3828_v27 }
 0x380   : > { %4453 = vtanh.f32 %v3826_v5 }
 0x387   : > { %v4448_v0 = vpop.eup %4447 }
 0x388   : > { %v4450_v49 = vpop.eup %4449  ;;  %v3891_v46 = vadd.f32 1.0, %v4448_v0 }
 0x389   : > { %v4452_v3 = vpop.eup %4451  ;;  %v3889_v53 = vadd.f32 1.0, %v4450_v49 }
 0x38a   : > { %v4454_v9 = vpop.eup %4453  ;;  %v3923_v48 = vmul.f32 %v3891_v46, %v3667_v15  ;;  %v3892_v31 = vadd.f32 1.0, %v4452_v3 }
 0x38b   : > { %v3921_v39 = vmul.f32 %v3889_v53, %v3665_v36  ;;  %v3890_v21 = vadd.f32 1.0, %v4454_v9 }
 0x38c   : > { %v3962_v51 = vmul.f32 %v6698_v23, %v3923_v48  ;;  %v3924_v16 = vmul.f32 %v3892_v31, %v3668_v52 }
 0x38d   : > { %v3960_v41 = vmul.f32 %v6698_v23, %v3921_v39  ;;  %v3922_v60 = vmul.f32 %v3890_v21, %v3666_v6 }
 0x38e   : > { %v4001_v62 = vadd.f32 %v6705_v43, %v3962_v51  ;;  %v3963_v25 = vmul.f32 %v6698_v23, %v3924_v16 }
 0x38f   : > { %v3999_v7 = vadd.f32 %v6705_v43, %v3960_v41  ;;  %v3961_v1 = vmul.f32 %v6698_v23, %v3922_v60 }
 0x390   : > { %4033 = vst.msk [vmem:[%s6713_s20 + $0xd0] sm:$0xff] %vm474_vm1, %v4001_v62  ;;  %v4002_v34 = vadd.f32 %v6705_v43, %v3963_v25 }
 0x391   : > { %4031 = vst.msk [vmem:[%s6713_s20 + $0xc0] sm:$0xff] %vm474_vm1, %v3999_v7  ;;  %v4000_v28 = vadd.f32 %v6705_v43, %v3961_v1 }
 0x392   : > { %4034 = vst.msk [vmem:[%s6713_s20 + $0xd8] sm:$0xff] %vm474_vm1, %v4002_v34 }
 0x393   : > { %4032 = vst.msk [vmem:[%s6713_s20 + $0xc8] sm:$0xff] %vm474_vm1, %v4000_v28 }
 0x3a0   : > { %v4258_v38 = vpop.f32.mrb[28].mxu1 }
 0x3a1   : > { %v3635_v40 = vadd.f32 %v4258_v38, %v6620_v61  ;;  %v3626_v12 = vpop.f32.mrb[29].mxu1 }
 0x3a2   : > { %v3627_v32 = vadd.f32 %v6620_v61, %v3626_v12  ;;  %v4259_v22 = vpop.f32.mrb[30].mxu1 }
 0x3a3   : > { %v3703_v42 = vmul.f32 0.044715, %v3635_v40  ;;  %v3638_v24 = vadd.f32 %v4259_v22, %v6620_v61  ;;  %v3629_v57 = vpop.f32.mrb[31].mxu1  ;;  %v3671_v20 = vmul.f32 0.5, %v3635_v40 }
 0x3a4   : > { %v3701_v35 = vmul.f32 0.044715, %v3627_v32  ;;  %v3630_v30 = vadd.f32 %v6620_v61, %v3629_v57  ;;  %v3669_v54 = vmul.f32 0.5, %v3627_v32 }
 0x3a5   : > { %v3735_v19 = vmul.f32 %v3703_v42, %v3635_v40  ;;  %v3704_v45 = vmul.f32 0.044715, %v3638_v24  ;;  %v3672_v5 = vmul.f32 0.5, %v3638_v24 }
 0x3a6   : > { %v3733_v8 = vmul.f32 %v3701_v35, %v3627_v32  ;;  %v3702_v29 = vmul.f32 0.044715, %v3630_v30  ;;  %v3670_v15 = vmul.f32 0.5, %v3630_v30 }
 0x3a7   : > { %v3767_v47 = vmul.f32 %v3735_v19, %v3635_v40  ;;  %v3736_v63 = vmul.f32 %v3704_v45, %v3638_v24 }
 0x3a8   : > { %v3765_v18 = vmul.f32 %v3733_v8, %v3627_v32  ;;  %v3734_v37 = vmul.f32 %v3702_v29, %v3630_v30 }
 0x3a9   : > { %v3799_v26 = vadd.f32 %v3767_v47, %v3635_v40  ;;  %v3768_v11 = vmul.f32 %v3736_v63, %v3638_v24 }
 0x3aa   : > { %v3797_v4 = vadd.f32 %v3765_v18, %v3627_v32  ;;  %v3766_v58 = vmul.f32 %v3734_v37, %v3630_v30 }
 0x3ab   : > { %v3831_v44 = vmul.f32 0.7978846, %v3799_v26  ;;  %v3800_v2 = vadd.f32 %v3768_v11, %v3638_v24 }
 0x3ac   : > { %v3829_v50 = vmul.f32 0.7978846, %v3797_v4  ;;  %v3798_v59 = vadd.f32 %v3766_v58, %v3630_v30 }
 0x3ad   : > { %4455 = vtanh.f32 %v3831_v44  ;;  %v3832_v17 = vmul.f32 0.7978846, %v3800_v2 }
 0x3ae   : > { %4457 = vtanh.f32 %v3829_v50  ;;  %v3830_v61 = vmul.f32 0.7978846, %v3798_v59 }
 0x3af   : > { %4459 = vtanh.f32 %v3832_v17 }
 0x3b0   : > { %4461 = vtanh.f32 %v3830_v61 }
 0x3b7   : > { %v4456_v14 = vpop.eup %4455 }
 0x3b8   : > { %v4458_v10 = vpop.eup %4457  ;;  %v3895_v55 = vadd.f32 1.0, %v4456_v14 }
 0x3b9   : > { %v4460_v33 = vpop.eup %4459  ;;  %v3893_v13 = vadd.f32 1.0, %v4458_v10 }
 0x3ba   : > { %v4462_v56 = vpop.eup %4461  ;;  %v3927_v27 = vmul.f32 %v3895_v55, %v3671_v20  ;;  %v3896_v0 = vadd.f32 1.0, %v4460_v33 }
 0x3bb   : > { %v3925_v49 = vmul.f32 %v3893_v13, %v3669_v54  ;;  %v3894_v46 = vadd.f32 1.0, %v4462_v56 }
 0x3bc   : > { %v3966_v3 = vmul.f32 %v6698_v23, %v3927_v27  ;;  %v3928_v36 = vmul.f32 %v3896_v0, %v3672_v5 }
 0x3bd   : > { %v3964_v53 = vmul.f32 %v6698_v23, %v3925_v49  ;;  %v3926_v9 = vmul.f32 %v3894_v46, %v3670_v15 }
 0x3be   : > { %v4005_v48 = vadd.f32 %v6705_v43, %v3966_v3  ;;  %v3967_v52 = vmul.f32 %v6698_v23, %v3928_v36 }
 0x3bf   : > { %v4003_v31 = vadd.f32 %v6705_v43, %v3964_v53  ;;  %v3965_v39 = vmul.f32 %v6698_v23, %v3926_v9 }
 0x3c0   : > { %4037 = vst.msk [vmem:[%s6713_s20 + $0xf0] sm:$0xff] %vm474_vm1, %v4005_v48  ;;  %v4006_v6 = vadd.f32 %v6705_v43, %v3967_v52 }
 0x3c1   : > { %4035 = vst.msk [vmem:[%s6713_s20 + $0xe0] sm:$0xff] %vm474_vm1, %v4003_v31  ;;  %v4004_v21 = vadd.f32 %v6705_v43, %v3965_v39 }
 0x3c2   : > { %4038 = vst.msk [vmem:[%s6713_s20 + $0xf8] sm:$0xff] %vm474_vm1, %v4006_v6 }
 0x3c3   : > { %4036 = vst.msk [vmem:[%s6713_s20 + $0xe8] sm:$0xff] %vm474_vm1, %v4004_v21 }
 0x3c4 PF: > { %s23_s25 = sadd.s32 1, %s4505_s25  }
 0x3c5   : > { %p20_p4 = scmp.ge.s32.totalorder %s23_s25, 4  }
 0x3c7   :  { %22 = sbr.rel (!%p20_p4) target bundleno = 1 (0x1), region = 103 }

</bundles_post_ra>
